<compile_context>
chip_gen: v7x
topology: tpu7x:2x2x1
jax: 0.10.0
libtpu: 0.0.40
codegen_flags: <defaults>
</compile_context>

<pallas_src>
import math
import functools

import jax
import jax.numpy as jnp
from jax import lax
from jax.experimental import pallas as pl
from jax.experimental.pallas import tpu as pltpu


# ------------------------------ shared math ---------------------------------

def _gelu(x):
    # exact (erf-based) GELU, matching torch.nn.GELU default
    return 0.5 * x * (1.0 + lax.erf(x * 0.7071067811865476))


def _layernorm(y, g, b, eps):
    mean = jnp.mean(y, axis=-1, keepdims=True)
    var = jnp.mean(jnp.square(y - mean), axis=-1, keepdims=True)
    return (y - mean) * lax.rsqrt(var + eps) * g + b


# ----------------------------- tiling helpers --------------------------------

def _pick_tm(M):
    for t in (256, 128, 64, 32, 16, 8):
        if M % t == 0:
            return t
    return M                      # full-extent block (always legal)


def _pick_tk(K):
    for t in (512, 256, 128):     # larger K tiles amortize per-grid-step overhead
        if K % t == 0:
            return t
    return K                      # full-extent block (always legal)


def _vmem_limit(*per_block_bytes):
    """Explicit scoped-VMEM limit: 2x (double-buffer) every block + margin,
    floored at 32 MiB, capped at 64 MiB (v7x physical per-TC VMEM)."""
    est = 2 * sum(int(b) for b in per_block_bytes) + (2 << 20)
    return max(32 << 20, min(64 << 20, est))


# ----------------------------- Pallas kernels ---------------------------------

def _fused_linear_kernel(*refs, apply_ln, apply_gelu, pre_ln, has_residual, eps):
    """y = residual? + GELU?( LN?( GELU(LN(x))? @ W + b ) )

    grid = (m_tiles, k_tiles); axis 1 is the K reduction.  The output block and the
    f32 accumulator scratch are resident across the K axis.  N is never tiled so the
    LayerNorm epilogue sees the full feature row.
    Ref order: x, w, b, [gamma, beta], [pre_gamma, pre_beta], [residual], out, acc.
    """
    it = iter(refs)
    x_ref = next(it)
    w_ref = next(it)
    b_ref = next(it)
    g_ref = be_ref = pg_ref = pb_ref = r_ref = None
    if apply_ln:
        g_ref = next(it)
        be_ref = next(it)
    if pre_ln:
        pg_ref = next(it)
        pb_ref = next(it)
    if has_residual:
        r_ref = next(it)
    o_ref = next(it)
    acc_ref = next(it)

    k = pl.program_id(1)

    @pl.when(k == 0)
    def _():
        # initialize accumulator with the broadcast bias (saves an epilogue add)
        acc_ref[...] = jnp.broadcast_to(b_ref[...], acc_ref.shape).astype(jnp.float32)

    xb = x_ref[...].astype(jnp.float32)
    if pre_ln:
        # pre-LN requires the full K dimension in this block (wrapper asserts tk == K)
        xb = _gelu(_layernorm(xb, pg_ref[...], pb_ref[...], eps))
    acc_ref[...] += jnp.dot(
        xb.astype(jnp.bfloat16),
        w_ref[...].astype(jnp.bfloat16),
        preferred_element_type=jnp.float32,
    )

    @pl.when(k == pl.num_programs(1) - 1)
    def _():
        y = acc_ref[...]
        if apply_ln:
            y = _layernorm(y, g_ref[...], be_ref[...], eps)
        if apply_gelu:
            y = _gelu(y)
        if has_residual:
            y = y + r_ref[...].astype(jnp.float32)
        o_ref[...] = y.astype(o_ref.dtype)


def _res_stack_kernel(h_in_ref, w_ref, b_ref, g_ref, be_ref, o_ref, cur_ref, *, eps):
    """Fused residual-MLP stack:  for l in layers:  cur = GELU(LN(cur @ W_l + b_l)) + cur.

    grid = (m_tiles, n_layers).  The (tm, H) activation/residual lives in VMEM scratch
    across the layer axis; only the per-layer weights stream from HBM.
    """
    l = pl.program_id(1)

    @pl.when(l == 0)
    def _():
        cur_ref[...] = h_in_ref[...].astype(jnp.float32)

    y = jnp.dot(
        cur_ref[...].astype(jnp.bfloat16),
        w_ref[0].astype(jnp.bfloat16),
        preferred_element_type=jnp.float32,
    )
    y = y + b_ref[0]
    y = _gelu(_layernorm(y, g_ref[0], be_ref[0], eps))
    cur_ref[...] = y + cur_ref[...]

    @pl.when(l == pl.num_programs(1) - 1)
    def _():
        o_ref[...] = cur_ref[...].astype(o_ref.dtype)


# -------------------------------- wrappers ------------------------------------

def fused_linear(x, w, b, gamma=None, beta=None, pre_gamma=None, pre_beta=None,
                 residual=None, apply_gelu=False, eps=1e-5):
    """y = residual? + GELU?(LN?( GELU(LN(x))? @ w + b ))  with x:(M,K), w:(K,N) bf16."""
    M, K = x.shape
    Kw, N = w.shape
    assert K == Kw
    apply_ln = gamma is not None
    pre_ln = pre_gamma is not None
    has_residual = residual is not None

    tm = _pick_tm(M)
    tk = K if pre_ln else _pick_tk(K)   # pre-LN needs the whole feature row of x
    assert K % tk == 0 and M % tm == 0
    n_m, n_k = M // tm, K // tk

    inputs = [x, w, b.reshape(1, N)]
    in_specs = [
        pl.BlockSpec((tm, tk), lambda m, k: (m, k)),
        pl.BlockSpec((tk, N), lambda m, k: (k, 0)),
        pl.BlockSpec((1, N), lambda m, k: (0, 0)),
    ]
    if apply_ln:
        inputs += [gamma.reshape(1, N), beta.reshape(1, N)]
        in_specs += [pl.BlockSpec((1, N), lambda m, k: (0, 0)),
                     pl.BlockSpec((1, N), lambda m, k: (0, 0))]
    if pre_ln:
        inputs += [pre_gamma.reshape(1, K), pre_beta.reshape(1, K)]
        in_specs += [pl.BlockSpec((1, K), lambda m, k: (0, 0)),
                     pl.BlockSpec((1, K), lambda m, k: (0, 0))]
    if has_residual:
        inputs.append(residual)
        in_specs.append(pl.BlockSpec((tm, N), lambda m, k: (m, 0)))

    kernel = functools.partial(
        _fused_linear_kernel,
        apply_ln=apply_ln, apply_gelu=apply_gelu,
        pre_ln=pre_ln, has_residual=has_residual, eps=eps,
    )
    vmem = _vmem_limit(
        tm * tk * x.dtype.itemsize,          # x block
        tk * N * w.dtype.itemsize,           # weight block (bf16)
        6 * max(N, K) * 4,                   # bias / LN params
        tm * N * x.dtype.itemsize,           # out block
        (tm * N * 4) if has_residual else 0, # residual block
        tm * N * 4,                          # f32 accumulator scratch
    )
    return pl.pallas_call(
        kernel,
        out_shape=jax.ShapeDtypeStruct((M, N), x.dtype),
        grid_spec=pltpu.PrefetchScalarGridSpec(
            num_scalar_prefetch=0,
            grid=(n_m, n_k),
            in_specs=in_specs,
            out_specs=pl.BlockSpec((tm, N), lambda m, k: (m, 0)),
            scratch_shapes=[pltpu.VMEM((tm, N), jnp.float32)],
        ),
        compiler_params=pltpu.CompilerParams(
            dimension_semantics=("parallel", "arbitrary"),
            vmem_limit_bytes=vmem),
    )(*inputs)


def residual_mlp_stack(h0, w_stack, b_stack, g_stack, be_stack, eps=1e-5):
    """All n_blocks residual MLP layers in one pallas_call; activation stays in VMEM."""
    M, H = h0.shape
    L = w_stack.shape[0]
    assert w_stack.shape == (L, H, H)
    tm = _pick_tm(M)
    n_m = M // tm

    b3 = b_stack.reshape(L, 1, H)
    g3 = g_stack.reshape(L, 1, H)
    be3 = be_stack.reshape(L, 1, H)

    vmem = _vmem_limit(
        tm * H * 4,                          # h_in block
        H * H * w_stack.dtype.itemsize,      # per-layer weight block (bf16)
        3 * H * 4,                           # bias / LN params
        tm * H * 4,                          # out block
        tm * H * 4,                          # resident activation scratch
    )
    return pl.pallas_call(
        functools.partial(_res_stack_kernel, eps=eps),
        out_shape=jax.ShapeDtypeStruct((M, H), h0.dtype),
        grid_spec=pltpu.PrefetchScalarGridSpec(
            num_scalar_prefetch=0,
            grid=(n_m, L),
            in_specs=[
                pl.BlockSpec((tm, H), lambda m, l: (m, 0)),
                pl.BlockSpec((1, H, H), lambda m, l: (l, 0, 0)),
                pl.BlockSpec((1, 1, H), lambda m, l: (l, 0, 0)),
                pl.BlockSpec((1, 1, H), lambda m, l: (l, 0, 0)),
                pl.BlockSpec((1, 1, H), lambda m, l: (l, 0, 0)),
            ],
            out_specs=pl.BlockSpec((tm, H), lambda m, l: (m, 0)),
            scratch_shapes=[pltpu.VMEM((tm, H), jnp.float32)],
        ),
        compiler_params=pltpu.CompilerParams(
            dimension_semantics=("parallel", "arbitrary"),
            vmem_limit_bytes=vmem),
    )(h0, w_stack, b3, g3, be3)


# ----------------------------- parameter init ----------------------------------

def init_params(key, in_dim, h, out_dim, clip_size, n_blocks, proj_h):
    params = {}
    keys = iter(jax.random.split(key, 64))

    def lin(kin, kout):
        k1, k2 = jax.random.split(next(keys))
        bound = 1.0 / math.sqrt(kin)
        w = jax.random.uniform(k1, (kin, kout), jnp.float32, -bound, bound)
        b = jax.random.uniform(k2, (kout,), jnp.float32, -bound, bound)
        return w, b

    def ln_p(n):
        k1, k2 = jax.random.split(next(keys))
        g = 1.0 + 0.02 * jax.random.normal(k1, (n,), jnp.float32)
        b = 0.02 * jax.random.normal(k2, (n,), jnp.float32)
        return g, b

    params['lin0_w'], params['lin0_b'] = lin(in_dim, h)
    params['lin0_g'], params['lin0_be'] = ln_p(h)
    for i in range(n_blocks):
        params[f'mlp{i}_w'], params[f'mlp{i}_b'] = lin(h, h)
        params[f'mlp{i}_g'], params[f'mlp{i}_be'] = ln_p(h)
    params['lin1_w'], params['lin1_b'] = lin(h, out_dim)
    # projector: LN(clip) GELU Linear(clip,ph) LN GELU Linear(ph,ph) LN GELU Linear(ph,clip)
    params['p_ln0_g'], params['p_ln0_b'] = ln_p(clip_size)
    params['p_w1'], params['p_b1'] = lin(clip_size, proj_h)
    params['p_ln1_g'], params['p_ln1_b'] = ln_p(proj_h)
    params['p_w2'], params['p_b2'] = lin(proj_h, proj_h)
    params['p_ln2_g'], params['p_ln2_b'] = ln_p(proj_h)
    params['p_w3'], params['p_b3'] = lin(proj_h, clip_size)
    return params


def prepare_device_params(params, n_blocks):
    """Cast matmul weights to bf16 (bf16 MXU operands, halved HBM weight traffic)
    and stack the residual-block parameters for the fused stack kernel."""
    bf = jnp.bfloat16
    d = {
        'lin0_w': params['lin0_w'].astype(bf),
        'lin0_b': params['lin0_b'], 'lin0_g': params['lin0_g'], 'lin0_be': params['lin0_be'],
        'mlp_w': jnp.stack([params[f'mlp{i}_w'] for i in range(n_blocks)]).astype(bf),
        'mlp_b': jnp.stack([params[f'mlp{i}_b'] for i in range(n_blocks)]),
        'mlp_g': jnp.stack([params[f'mlp{i}_g'] for i in range(n_blocks)]),
        'mlp_be': jnp.stack([params[f'mlp{i}_be'] for i in range(n_blocks)]),
        'lin1_w': params['lin1_w'].astype(bf), 'lin1_b': params['lin1_b'],
        'p_ln0_g': params['p_ln0_g'], 'p_ln0_b': params['p_ln0_b'],
        'p_w1': params['p_w1'].astype(bf), 'p_b1': params['p_b1'],
        'p_ln1_g': params['p_ln1_g'], 'p_ln1_b': params['p_ln1_b'],
        'p_w2': params['p_w2'].astype(bf), 'p_b2': params['p_b2'],
        'p_ln2_g': params['p_ln2_g'], 'p_ln2_b': params['p_ln2_b'],
        'p_w3': params['p_w3'].astype(bf), 'p_b3': params['p_b3'],
    }
    return d


# ------------------------------ forward pass -----------------------------------

def brain_mlp_forward(x, dp, *, n_blocks, clip_size, fuse_blocks=True):
    bs = x.shape[0]
    x = x.reshape(bs, -1)

    # lin0: Linear -> LayerNorm -> GELU -> Dropout(identity)
    h = fused_linear(x, dp['lin0_w'], dp['lin0_b'],
                     dp['lin0_g'], dp['lin0_be'], apply_gelu=True)

    H = dp['mlp_w'].shape[-1]
    # Fused stack keeps one full (H,H) bf16 weight block double-buffered in VMEM.
    # For very large H (e.g. production h=4096 on v7x's 64 MiB VMEM) fall back to
    # per-layer K-tiled weight streaming.
    if fuse_blocks and 2 * H * H * dp['mlp_w'].dtype.itemsize <= (40 << 20):
        h = residual_mlp_stack(h, dp['mlp_w'], dp['mlp_b'], dp['mlp_g'], dp['mlp_be'])
    else:
        residual = h
        for i in range(n_blocks):
            h = fused_linear(h, dp['mlp_w'][i], dp['mlp_b'][i],
                             dp['mlp_g'][i], dp['mlp_be'][i],
                             residual=residual, apply_gelu=True)
            residual = h

    out = fused_linear(h, dp['lin1_w'], dp['lin1_b'])          # (bs, out_dim)

    # projector on out.reshape(bs, -1, clip_size); leading LN+GELU fused into matmul 1
    n_clip = out.shape[1] // clip_size
    p = out.reshape(bs * n_clip, clip_size)
    p = fused_linear(p, dp['p_w1'], dp['p_b1'],
                     gamma=dp['p_ln1_g'], beta=dp['p_ln1_b'],
                     pre_gamma=dp['p_ln0_g'], pre_beta=dp['p_ln0_b'],
                     apply_gelu=True)
    p = fused_linear(p, dp['p_w2'], dp['p_b2'],
                     gamma=dp['p_ln2_g'], beta=dp['p_ln2_b'], apply_gelu=True)
    p = fused_linear(p, dp['p_w3'], dp['p_b3'])
    return out, p.reshape(bs, n_clip, clip_size)


# ---------------------------- pure-JAX reference --------------------------------
# Same math as the torch module; matmuls use bf16 operands with f32 accumulation to
# match the kernel's MXU precision policy (everything else in f32).

def _mm_bf16(a, w):
    return jnp.dot(a.astype(jnp.bfloat16).astype(jnp.float32),
                   w.astype(jnp.bfloat16).astype(jnp.float32))


def reference_forward(x, params, n_blocks, clip_size):
    eps = 1e-5
    bs = x.shape[0]
    x = x.reshape(bs, -1)
    h = _gelu(_layernorm(_mm_bf16(x, params['lin0_w']) + params['lin0_b'],
                         params['lin0_g'], params['lin0_be'], eps))
    residual = h
    for i in range(n_blocks):
        h = _gelu(_layernorm(_mm_bf16(h, params[f'mlp{i}_w']) + params[f'mlp{i}_b'],
                             params[f'mlp{i}_g'], params[f'mlp{i}_be'], eps))
        h = h + residual
        residual = h
    out = _mm_bf16(h, params['lin1_w']) + params['lin1_b']
    n_clip = out.shape[1] // clip_size
    p = out.reshape(bs * n_clip, clip_size)
    p = _gelu(_layernorm(p, params['p_ln0_g'], params['p_ln0_b'], eps))
    p = _gelu(_layernorm(_mm_bf16(p, params['p_w1']) + params['p_b1'],
                         params['p_ln1_g'], params['p_ln1_b'], eps))
    p = _gelu(_layernorm(_mm_bf16(p, params['p_w2']) + params['p_b2'],
                         params['p_ln2_g'], params['p_ln2_b'], eps))
    p = _mm_bf16(p, params['p_w3']) + params['p_b3']
    return out, p.reshape(bs, n_clip, clip_size)


# ------------------------------------ main ---------------------------------------

if __name__ == "__main__":
    # Small config consistent with the module (h / projector-hidden shrunk to keep the
    # synthetic test small; structure identical to BrainMLP).
    bs, in_dim, h, out_dim, clip_size, n_blocks, proj_h = 2, 512, 512, 256, 256, 4, 512

    key = jax.random.PRNGKey(0)
    kx, kp = jax.random.split(key)
    x = jax.random.normal(kx, (bs, 1, in_dim), jnp.float32)   # (bs, 1, in_dim) like docstring
    params = init_params(kp, in_dim, h, out_dim, clip_size, n_blocks, proj_h)
    dparams = prepare_device_params(params, n_blocks)

    fwd_fused = jax.jit(functools.partial(
        brain_mlp_forward, n_blocks=n_blocks, clip_size=clip_size, fuse_blocks=True))
    fwd_layered = jax.jit(functools.partial(
        brain_mlp_forward, n_blocks=n_blocks, clip_size=clip_size, fuse_blocks=False))

    out, proj = fwd_fused(x, dparams)
    out = jax.block_until_ready(out)
    proj = jax.block_until_ready(proj)

    out2, proj2 = fwd_layered(x, dparams)
    out2 = jax.block_until_ready(out2)
    proj2 = jax.block_until_ready(proj2)

    ref_out, ref_proj = reference_forward(x, params, n_blocks, clip_size)

    assert out.shape == (bs, out_dim)
    assert proj.shape == (bs, out_dim // clip_size, clip_size)
    assert jnp.allclose(out, ref_out, rtol=5e-3, atol=5e-3), "lin1 output mismatch (fused stack)"
    assert jnp.allclose(proj, ref_proj, rtol=5e-3, atol=5e-3), "projector output mismatch (fused stack)"
    assert jnp.allclose(out2, ref_out, rtol=5e-3, atol=5e-3), "lin1 output mismatch (per-layer)"
    assert jnp.allclose(proj2, ref_proj, rtol=5e-3, atol=5e-3), "projector output mismatch (per-layer)"

    print("KERNEL_OK")
</pallas_src>

<mosaic_0001>
module attributes {stable_mosaic.version = 11 : i64} {
  func.func @_res_stack_kernel(%arg0: i32, %arg1: i32, %arg2: memref<2x512xf32, #tpu.memory_space<vmem>>, %arg3: memref<1x512x512xbf16, #tpu.memory_space<vmem>>, %arg4: memref<1x1x512xf32, #tpu.memory_space<vmem>>, %arg5: memref<1x1x512xf32, #tpu.memory_space<vmem>>, %arg6: memref<1x1x512xf32, #tpu.memory_space<vmem>>, %arg7: memref<2x512xf32, #tpu.memory_space<vmem>>, %arg8: memref<2x512xf32, #tpu.memory_space<vmem>>) attributes {dimension_semantics = [#tpu.dimension_semantics<parallel>, #tpu.dimension_semantics<arbitrary>], iteration_bounds = array<i64: 1, 4>, scalar_prefetch = 0 : i64, scratch_operands = 1 : i64, tpu.core_type = #tpu.core_type<tc>, window_params = [{transform_indices = @transform_0, window_bounds = array<i64: 2, 512>}, {transform_indices = @transform_1, window_bounds = array<i64: 1, 512, 512>}, {transform_indices = @transform_2, window_bounds = array<i64: 1, 1, 512>}, {transform_indices = @transform_3, window_bounds = array<i64: 1, 1, 512>}, {transform_indices = @transform_4, window_bounds = array<i64: 1, 1, 512>}, {transform_indices = @transform_5, window_bounds = array<i64: 2, 512>}]} {
    %c0_i32 = arith.constant 0 : i32
    %0 = arith.cmpi eq, %arg1, %c0_i32 : i32
    %1 = arith.extui %0 : i1 to i32
    %c0_i32_0 = arith.constant 0 : i32
    %2 = arith.cmpi ne, %1, %c0_i32_0 : i32
    scf.if %2 {
      %c0_27 = arith.constant 0 : index
      %c0_28 = arith.constant 0 : index
      %52 = vector.load %arg2[%c0_27, %c0_28] : memref<2x512xf32, #tpu.memory_space<vmem>>, vector<2x512xf32>
      %c0_29 = arith.constant 0 : index
      %c0_30 = arith.constant 0 : index
      %53 = vector.load %arg8[%c0_29, %c0_30] : memref<2x512xf32, #tpu.memory_space<vmem>>, vector<2x512xf32>
      tpu.vector_store %arg8[%c0_29, %c0_30], %52 {strides = array<i32>} : memref<2x512xf32, #tpu.memory_space<vmem>>, vector<2x512xf32>,
    } else {
    }
    %c0 = arith.constant 0 : index
    %c0_1 = arith.constant 0 : index
    %3 = vector.load %arg8[%c0, %c0_1] : memref<2x512xf32, #tpu.memory_space<vmem>>, vector<2x512xf32>
    %4 = arith.truncf %3 : vector<2x512xf32> to vector<2x512xbf16>
    %c0_2 = arith.constant 0 : index
    %c0_3 = arith.constant 0 : index
    %c0_4 = arith.constant 0 : index
    %5 = vector.load %arg3[%c0_2, %c0_3, %c0_4] : memref<1x512x512xbf16, #tpu.memory_space<vmem>>, vector<1x512x512xbf16>
    %6 = vector.shape_cast %5 : vector<1x512x512xbf16> to vector<512x512xbf16>
    %cst = arith.constant dense<0.000000e+00> : vector<2x512xf32>
    %7 = tpu.matmul %4, %6, %cst {dimension_numbers = #tpu.dot_dimension_numbers<[1], [0], [0], [1], [0, 0, 1, 1], [], []>} : vector<2x512xbf16>, vector<512x512xbf16>, vector<2x512xf32> -> vector<2x512xf32>
    %c0_5 = arith.constant 0 : index
    %c0_6 = arith.constant 0 : index
    %c0_7 = arith.constant 0 : index
    %8 = vector.load %arg4[%c0_5, %c0_6, %c0_7] : memref<1x1x512xf32, #tpu.memory_space<vmem>>, vector<1x1x512xf32>
    %9 = vector.shape_cast %8 : vector<1x1x512xf32> to vector<1x512xf32>
    %10 = vector.broadcast %9 : vector<1x512xf32> to vector<2x512xf32>
    %11 = arith.addf %7, %10 : vector<2x512xf32>
    %c0_8 = arith.constant 0 : index
    %c0_9 = arith.constant 0 : index
    %c0_10 = arith.constant 0 : index
    %12 = vector.load %arg5[%c0_8, %c0_9, %c0_10] : memref<1x1x512xf32, #tpu.memory_space<vmem>>, vector<1x1x512xf32>
    %13 = vector.shape_cast %12 : vector<1x1x512xf32> to vector<1x512xf32>
    %c0_11 = arith.constant 0 : index
    %c0_12 = arith.constant 0 : index
    %c0_13 = arith.constant 0 : index
    %14 = vector.load %arg6[%c0_11, %c0_12, %c0_13] : memref<1x1x512xf32, #tpu.memory_space<vmem>>, vector<1x1x512xf32>
    %15 = vector.shape_cast %14 : vector<1x1x512xf32> to vector<1x512xf32>
    %cst_14 = arith.constant dense<0.000000e+00> : vector<2xf32>
    %16 = vector.multi_reduction <add>, %11, %cst_14 [1] : vector<2x512xf32> to vector<2xf32>
    %17 = vector.shape_cast %16 : vector<2xf32> to vector<2x1xf32>
    %cst_15 = arith.constant 5.120000e+02 : f32
    %18 = vector.broadcast %cst_15 : f32 to vector<2x1xf32>
    %19 = arith.divf %17, %18 : vector<2x1xf32>
    %20 = vector.broadcast %19 : vector<2x1xf32> to vector<2x512xf32>
    %21 = arith.subf %11, %20 : vector<2x512xf32>
    %22 = arith.mulf %21, %21 : vector<2x512xf32>
    %cst_16 = arith.constant dense<0.000000e+00> : vector<2xf32>
    %23 = vector.multi_reduction <add>, %22, %cst_16 [1] : vector<2x512xf32> to vector<2xf32>
    %24 = vector.shape_cast %23 : vector<2xf32> to vector<2x1xf32>
    %cst_17 = arith.constant 5.120000e+02 : f32
    %25 = vector.broadcast %cst_17 : f32 to vector<2x1xf32>
    %26 = arith.divf %24, %25 : vector<2x1xf32>
    %27 = vector.broadcast %19 : vector<2x1xf32> to vector<2x512xf32>
    %28 = arith.subf %11, %27 : vector<2x512xf32>
    %cst_18 = arith.constant 9.99999974E-6 : f32
    %29 = vector.broadcast %cst_18 : f32 to vector<2x1xf32>
    %30 = arith.addf %26, %29 : vector<2x1xf32>
    %31 = math.rsqrt %30 : vector<2x1xf32>
    %32 = vector.broadcast %31 : vector<2x1xf32> to vector<2x512xf32>
    %33 = arith.mulf %28, %32 : vector<2x512xf32>
    %34 = vector.broadcast %13 : vector<1x512xf32> to vector<2x512xf32>
    %35 = arith.mulf %33, %34 : vector<2x512xf32>
    %36 = vector.broadcast %15 : vector<1x512xf32> to vector<2x512xf32>
    %37 = arith.addf %35, %36 : vector<2x512xf32>
    %cst_19 = arith.constant 5.000000e-01 : f32
    %38 = vector.broadcast %cst_19 : f32 to vector<2x512xf32>
    %39 = arith.mulf %38, %37 : vector<2x512xf32>
    %cst_20 = arith.constant 0.707106769 : f32
    %40 = vector.broadcast %cst_20 : f32 to vector<2x512xf32>
    %41 = arith.mulf %37, %40 : vector<2x512xf32>
    %42 = math.erf %41 : vector<2x512xf32>
    %cst_21 = arith.constant 1.000000e+00 : f32
    %43 = vector.broadcast %cst_21 : f32 to vector<2x512xf32>
    %44 = arith.addf %43, %42 : vector<2x512xf32>
    %45 = arith.mulf %39, %44 : vector<2x512xf32>
    %c0_22 = arith.constant 0 : index
    %c0_23 = arith.constant 0 : index
    %46 = vector.load %arg8[%c0_22, %c0_23] : memref<2x512xf32, #tpu.memory_space<vmem>>, vector<2x512xf32>
    %47 = arith.addf %45, %46 : vector<2x512xf32>
    %c0_24 = arith.constant 0 : index
    %c0_25 = arith.constant 0 : index
    %48 = vector.load %arg8[%c0_24, %c0_25] : memref<2x512xf32, #tpu.memory_space<vmem>>, vector<2x512xf32>
    tpu.vector_store %arg8[%c0_24, %c0_25], %47 {strides = array<i32>} : memref<2x512xf32, #tpu.memory_space<vmem>>, vector<2x512xf32>,
    %c3_i32 = arith.constant 3 : i32
    %49 = arith.cmpi eq, %arg1, %c3_i32 : i32
    %50 = arith.extui %49 : i1 to i32
    %c0_i32_26 = arith.constant 0 : i32
    %51 = arith.cmpi ne, %50, %c0_i32_26 : i32
    scf.if %51 {
      %c0_27 = arith.constant 0 : index
      %c0_28 = arith.constant 0 : index
      %52 = vector.load %arg8[%c0_27, %c0_28] : memref<2x512xf32, #tpu.memory_space<vmem>>, vector<2x512xf32>
      %c0_29 = arith.constant 0 : index
      %c0_30 = arith.constant 0 : index
      %53 = vector.load %arg7[%c0_29, %c0_30] : memref<2x512xf32, #tpu.memory_space<vmem>>, vector<2x512xf32>
      tpu.vector_store %arg7[%c0_29, %c0_30], %52 {strides = array<i32>} : memref<2x512xf32, #tpu.memory_space<vmem>>, vector<2x512xf32>,
    } else {
    }
    return
  }
  func.func @transform_0(%arg0: i32, %arg1: i32) -> (i32, i32) {
    %c0_i32 = arith.constant 0 : i32
    %c0_i32_0 = arith.constant 0 : i32
    return %arg0, %c0_i32 : i32, i32
  }
  func.func @transform_1(%arg0: i32, %arg1: i32) -> (i32, i32, i32) {
    %c0_i32 = arith.constant 0 : i32
    %c0_i32_0 = arith.constant 0 : i32
    %c0_i32_1 = arith.constant 0 : i32
    return %arg1, %c0_i32, %c0_i32_0 : i32, i32, i32
  }
  func.func @transform_2(%arg0: i32, %arg1: i32) -> (i32, i32, i32) {
    %c0_i32 = arith.constant 0 : i32
    %c0_i32_0 = arith.constant 0 : i32
    %c0_i32_1 = arith.constant 0 : i32
    return %arg1, %c0_i32, %c0_i32_0 : i32, i32, i32
  }
  func.func @transform_3(%arg0: i32, %arg1: i32) -> (i32, i32, i32) {
    %c0_i32 = arith.constant 0 : i32
    %c0_i32_0 = arith.constant 0 : i32
    %c0_i32_1 = arith.constant 0 : i32
    return %arg1, %c0_i32, %c0_i32_0 : i32, i32, i32
  }
  func.func @transform_4(%arg0: i32, %arg1: i32) -> (i32, i32, i32) {
    %c0_i32 = arith.constant 0 : i32
    %c0_i32_0 = arith.constant 0 : i32
    %c0_i32_1 = arith.constant 0 : i32
    return %arg1, %c0_i32, %c0_i32_0 : i32, i32, i32
  }
  func.func @transform_5(%arg0: i32, %arg1: i32) -> (i32, i32) {
    %c0_i32 = arith.constant 0 : i32
    %c0_i32_0 = arith.constant 0 : i32
    return %arg0, %c0_i32 : i32, i32
  }
}

module attributes {stable_mosaic.version = 11 : i64} {
  func.func @_fused_linear_kernel(%arg0: i32, %arg1: i32, %arg2: memref<2x512xf32, #tpu.memory_space<vmem>>, %arg3: memref<512x512xbf16, #tpu.memory_space<vmem>>, %arg4: memref<1x512xf32, #tpu.memory_space<vmem>>, %arg5: memref<1x512xf32, #tpu.memory_space<vmem>>, %arg6: memref<1x512xf32, #tpu.memory_space<vmem>>, %arg7: memref<2x512xf32, #tpu.memory_space<vmem>>, %arg8: memref<2x512xf32, #tpu.memory_space<vmem>>) attributes {dimension_semantics = [#tpu.dimension_semantics<parallel>, #tpu.dimension_semantics<arbitrary>], iteration_bounds = array<i64: 1, 1>, scalar_prefetch = 0 : i64, scratch_operands = 1 : i64, tpu.core_type = #tpu.core_type<tc>, window_params = [{transform_indices = @transform_0, window_bounds = array<i64: 2, 512>}, {transform_indices = @transform_1, window_bounds = array<i64: 512, 512>}, {pipeline_mode = #tpu.pipeline_mode<synchronous>, transform_indices = @transform_2, window_bounds = array<i64: 1, 512>}, {pipeline_mode = #tpu.pipeline_mode<synchronous>, transform_indices = @transform_3, window_bounds = array<i64: 1, 512>}, {pipeline_mode = #tpu.pipeline_mode<synchronous>, transform_indices = @transform_4, window_bounds = array<i64: 1, 512>}, {transform_indices = @transform_5, window_bounds = array<i64: 2, 512>}]} {
    %c0_i32 = arith.constant 0 : i32
    %0 = arith.cmpi eq, %arg1, %c0_i32 : i32
    %1 = arith.extui %0 : i1 to i32
    %c0_i32_0 = arith.constant 0 : i32
    %2 = arith.cmpi ne, %1, %c0_i32_0 : i32
    scf.if %2 {
      %c0_10 = arith.constant 0 : index
      %c0_11 = arith.constant 0 : index
      %13 = vector.load %arg4[%c0_10, %c0_11] : memref<1x512xf32, #tpu.memory_space<vmem>>, vector<1x512xf32>
      %14 = vector.shape_cast %13 : vector<1x512xf32> to vector<1x512xf32>
      %15 = vector.broadcast %14 : vector<1x512xf32> to vector<2x512xf32>
      %c0_12 = arith.constant 0 : index
      %c0_13 = arith.constant 0 : index
      %16 = vector.load %arg8[%c0_12, %c0_13] : memref<2x512xf32, #tpu.memory_space<vmem>>, vector<2x512xf32>
      tpu.vector_store %arg8[%c0_12, %c0_13], %15 {strides = array<i32>} : memref<2x512xf32, #tpu.memory_space<vmem>>, vector<2x512xf32>,
    } else {
    }
    %c0 = arith.constant 0 : index
    %c0_1 = arith.constant 0 : index
    %3 = vector.load %arg2[%c0, %c0_1] : memref<2x512xf32, #tpu.memory_space<vmem>>, vector<2x512xf32>
    %c0_2 = arith.constant 0 : index
    %c0_3 = arith.constant 0 : index
    %4 = vector.load %arg8[%c0_2, %c0_3] : memref<2x512xf32, #tpu.memory_space<vmem>>, vector<2x512xf32>
    %5 = arith.truncf %3 : vector<2x512xf32> to vector<2x512xbf16>
    %c0_4 = arith.constant 0 : index
    %c0_5 = arith.constant 0 : index
    %6 = vector.load %arg3[%c0_4, %c0_5] : memref<512x512xbf16, #tpu.memory_space<vmem>>, vector<512x512xbf16>
    %cst = arith.constant dense<0.000000e+00> : vector<2x512xf32>
    %7 = tpu.matmul %5, %6, %cst {dimension_numbers = #tpu.dot_dimension_numbers<[1], [0], [0], [1], [0, 0, 1, 1], [], []>} : vector<2x512xbf16>, vector<512x512xbf16>, vector<2x512xf32> -> vector<2x512xf32>
    %8 = arith.addf %4, %7 : vector<2x512xf32>
    %c0_6 = arith.constant 0 : index
    %c0_7 = arith.constant 0 : index
    %9 = vector.load %arg8[%c0_6, %c0_7] : memref<2x512xf32, #tpu.memory_space<vmem>>, vector<2x512xf32>
    tpu.vector_store %arg8[%c0_6, %c0_7], %8 {strides = array<i32>} : memref<2x512xf32, #tpu.memory_space<vmem>>, vector<2x512xf32>,
    %c0_i32_8 = arith.constant 0 : i32
    %10 = arith.cmpi eq, %arg1, %c0_i32_8 : i32
    %11 = arith.extui %10 : i1 to i32
    %c0_i32_9 = arith.constant 0 : i32
    %12 = arith.cmpi ne, %11, %c0_i32_9 : i32
    scf.if %12 {
      %c0_10 = arith.constant 0 : index
      %c0_11 = arith.constant 0 : index
      %13 = vector.load %arg8[%c0_10, %c0_11] : memref<2x512xf32, #tpu.memory_space<vmem>>, vector<2x512xf32>
      %c0_12 = arith.constant 0 : index
      %c0_13 = arith.constant 0 : index
      %14 = vector.load %arg5[%c0_12, %c0_13] : memref<1x512xf32, #tpu.memory_space<vmem>>, vector<1x512xf32>
      %c0_14 = arith.constant 0 : index
      %c0_15 = arith.constant 0 : index
      %15 = vector.load %arg6[%c0_14, %c0_15] : memref<1x512xf32, #tpu.memory_space<vmem>>, vector<1x512xf32>
      %cst_16 = arith.constant dense<0.000000e+00> : vector<2xf32>
      %16 = vector.multi_reduction <add>, %13, %cst_16 [1] : vector<2x512xf32> to vector<2xf32>
      %17 = vector.shape_cast %16 : vector<2xf32> to vector<2x1xf32>
      %cst_17 = arith.constant 5.120000e+02 : f32
      %18 = vector.broadcast %cst_17 : f32 to vector<2x1xf32>
      %19 = arith.divf %17, %18 : vector<2x1xf32>
      %20 = vector.broadcast %19 : vector<2x1xf32> to vector<2x512xf32>
      %21 = arith.subf %13, %20 : vector<2x512xf32>
      %22 = arith.mulf %21, %21 : vector<2x512xf32>
      %cst_18 = arith.constant dense<0.000000e+00> : vector<2xf32>
      %23 = vector.multi_reduction <add>, %22, %cst_18 [1] : vector<2x512xf32> to vector<2xf32>
      %24 = vector.shape_cast %23 : vector<2xf32> to vector<2x1xf32>
      %cst_19 = arith.constant 5.120000e+02 : f32
      %25 = vector.broadcast %cst_19 : f32 to vector<2x1xf32>
      %26 = arith.divf %24, %25 : vector<2x1xf32>
      %27 = vector.broadcast %19 : vector<2x1xf32> to vector<2x512xf32>
      %28 = arith.subf %13, %27 : vector<2x512xf32>
      %cst_20 = arith.constant 9.99999974E-6 : f32
      %29 = vector.broadcast %cst_20 : f32 to vector<2x1xf32>
      %30 = arith.addf %26, %29 : vector<2x1xf32>
      %31 = math.rsqrt %30 : vector<2x1xf32>
      %32 = vector.broadcast %31 : vector<2x1xf32> to vector<2x512xf32>
      %33 = arith.mulf %28, %32 : vector<2x512xf32>
      %34 = vector.broadcast %14 : vector<1x512xf32> to vector<2x512xf32>
      %35 = arith.mulf %33, %34 : vector<2x512xf32>
      %36 = vector.broadcast %15 : vector<1x512xf32> to vector<2x512xf32>
      %37 = arith.addf %35, %36 : vector<2x512xf32>
      %cst_21 = arith.constant 5.000000e-01 : f32
      %38 = vector.broadcast %cst_21 : f32 to vector<2x512xf32>
      %39 = arith.mulf %38, %37 : vector<2x512xf32>
      %cst_22 = arith.constant 0.707106769 : f32
      %40 = vector.broadcast %cst_22 : f32 to vector<2x512xf32>
      %41 = arith.mulf %37, %40 : vector<2x512xf32>
      %42 = math.erf %41 : vector<2x512xf32>
      %cst_23 = arith.constant 1.000000e+00 : f32
      %43 = vector.broadcast %cst_23 : f32 to vector<2x512xf32>
      %44 = arith.addf %43, %42 : vector<2x512xf32>
      %45 = arith.mulf %39, %44 : vector<2x512xf32>
      %c0_24 = arith.constant 0 : index
      %c0_25 = arith.constant 0 : index
      %46 = vector.load %arg7[%c0_24, %c0_25] : memref<2x512xf32, #tpu.memory_space<vmem>>, vector<2x512xf32>
      tpu.vector_store %arg7[%c0_24, %c0_25], %45 {strides = array<i32>} : memref<2x512xf32, #tpu.memory_space<vmem>>, vector<2x512xf32>,
    } else {
    }
    return
  }
  func.func @transform_0(%arg0: i32, %arg1: i32) -> (i32, i32) {
    %c0_i32 = arith.constant 0 : i32
    return %arg0, %arg1 : i32, i32
  }
  func.func @transform_1(%arg0: i32, %arg1: i32) -> (i32, i32) {
    %c0_i32 = arith.constant 0 : i32
    %c0_i32_0 = arith.constant 0 : i32
    return %arg1, %c0_i32 : i32, i32
  }
  func.func @transform_2(%arg0: i32, %arg1: i32) -> (i32, i32) {
    %c0_i32 = arith.constant 0 : i32
    %c0_i32_0 = arith.constant 0 : i32
    %c0_i32_1 = arith.constant 0 : i32
    return %c0_i32, %c0_i32_0 : i32, i32
  }
  func.func @transform_3(%arg0: i32, %arg1: i32) -> (i32, i32) {
    %c0_i32 = arith.constant 0 : i32
    %c0_i32_0 = arith.constant 0 : i32
    %c0_i32_1 = arith.constant 0 : i32
    return %c0_i32, %c0_i32_0 : i32, i32
  }
  func.func @transform_4(%arg0: i32, %arg1: i32) -> (i32, i32) {
    %c0_i32 = arith.constant 0 : i32
    %c0_i32_0 = arith.constant 0 : i32
    %c0_i32_1 = arith.constant 0 : i32
    return %c0_i32, %c0_i32_0 : i32, i32
  }
  func.func @transform_5(%arg0: i32, %arg1: i32) -> (i32, i32) {
    %c0_i32 = arith.constant 0 : i32
    %c0_i32_0 = arith.constant 0 : i32
    return %arg0, %c0_i32 : i32, i32
  }
}

module attributes {stable_mosaic.version = 11 : i64} {
  func.func @_fused_linear_kernel(%arg0: i32, %arg1: i32, %arg2: memref<2x512xf32, #tpu.memory_space<vmem>>, %arg3: memref<512x256xbf16, #tpu.memory_space<vmem>>, %arg4: memref<1x256xf32, #tpu.memory_space<vmem>>, %arg5: memref<2x256xf32, #tpu.memory_space<vmem>>, %arg6: memref<2x256xf32, #tpu.memory_space<vmem>>) attributes {dimension_semantics = [#tpu.dimension_semantics<parallel>, #tpu.dimension_semantics<arbitrary>], iteration_bounds = array<i64: 1, 1>, scalar_prefetch = 0 : i64, scratch_operands = 1 : i64, tpu.core_type = #tpu.core_type<tc>, window_params = [{transform_indices = @transform_0, window_bounds = array<i64: 2, 512>}, {transform_indices = @transform_1, window_bounds = array<i64: 512, 256>}, {pipeline_mode = #tpu.pipeline_mode<synchronous>, transform_indices = @transform_2, window_bounds = array<i64: 1, 256>}, {transform_indices = @transform_3, window_bounds = array<i64: 2, 256>}]} {
    %c0_i32 = arith.constant 0 : i32
    %0 = arith.cmpi eq, %arg1, %c0_i32 : i32
    %1 = arith.extui %0 : i1 to i32
    %c0_i32_0 = arith.constant 0 : i32
    %2 = arith.cmpi ne, %1, %c0_i32_0 : i32
    scf.if %2 {
      %c0_10 = arith.constant 0 : index
      %c0_11 = arith.constant 0 : index
      %13 = vector.load %arg4[%c0_10, %c0_11] : memref<1x256xf32, #tpu.memory_space<vmem>>, vector<1x256xf32>
      %14 = vector.shape_cast %13 : vector<1x256xf32> to vector<1x256xf32>
      %15 = vector.broadcast %14 : vector<1x256xf32> to vector<2x256xf32>
      %c0_12 = arith.constant 0 : index
      %c0_13 = arith.constant 0 : index
      %16 = vector.load %arg6[%c0_12, %c0_13] : memref<2x256xf32, #tpu.memory_space<vmem>>, vector<2x256xf32>
      tpu.vector_store %arg6[%c0_12, %c0_13], %15 {strides = array<i32>} : memref<2x256xf32, #tpu.memory_space<vmem>>, vector<2x256xf32>,
    } else {
    }
    %c0 = arith.constant 0 : index
    %c0_1 = arith.constant 0 : index
    %3 = vector.load %arg2[%c0, %c0_1] : memref<2x512xf32, #tpu.memory_space<vmem>>, vector<2x512xf32>
    %c0_2 = arith.constant 0 : index
    %c0_3 = arith.constant 0 : index
    %4 = vector.load %arg6[%c0_2, %c0_3] : memref<2x256xf32, #tpu.memory_space<vmem>>, vector<2x256xf32>
    %5 = arith.truncf %3 : vector<2x512xf32> to vector<2x512xbf16>
    %c0_4 = arith.constant 0 : index
    %c0_5 = arith.constant 0 : index
    %6 = vector.load %arg3[%c0_4, %c0_5] : memref<512x256xbf16, #tpu.memory_space<vmem>>, vector<512x256xbf16>
    %cst = arith.constant dense<0.000000e+00> : vector<2x256xf32>
    %7 = tpu.matmul %5, %6, %cst {dimension_numbers = #tpu.dot_dimension_numbers<[1], [0], [0], [1], [0, 0, 1, 1], [], []>} : vector<2x512xbf16>, vector<512x256xbf16>, vector<2x256xf32> -> vector<2x256xf32>
    %8 = arith.addf %4, %7 : vector<2x256xf32>
    %c0_6 = arith.constant 0 : index
    %c0_7 = arith.constant 0 : index
    %9 = vector.load %arg6[%c0_6, %c0_7] : memref<2x256xf32, #tpu.memory_space<vmem>>, vector<2x256xf32>
    tpu.vector_store %arg6[%c0_6, %c0_7], %8 {strides = array<i32>} : memref<2x256xf32, #tpu.memory_space<vmem>>, vector<2x256xf32>,
    %c0_i32_8 = arith.constant 0 : i32
    %10 = arith.cmpi eq, %arg1, %c0_i32_8 : i32
    %11 = arith.extui %10 : i1 to i32
    %c0_i32_9 = arith.constant 0 : i32
    %12 = arith.cmpi ne, %11, %c0_i32_9 : i32
    scf.if %12 {
      %c0_10 = arith.constant 0 : index
      %c0_11 = arith.constant 0 : index
      %13 = vector.load %arg6[%c0_10, %c0_11] : memref<2x256xf32, #tpu.memory_space<vmem>>, vector<2x256xf32>
      %c0_12 = arith.constant 0 : index
      %c0_13 = arith.constant 0 : index
      %14 = vector.load %arg5[%c0_12, %c0_13] : memref<2x256xf32, #tpu.memory_space<vmem>>, vector<2x256xf32>
      tpu.vector_store %arg5[%c0_12, %c0_13], %13 {strides = array<i32>} : memref<2x256xf32, #tpu.memory_space<vmem>>, vector<2x256xf32>,
    } else {
    }
    return
  }
  func.func @transform_0(%arg0: i32, %arg1: i32) -> (i32, i32) {
    %c0_i32 = arith.constant 0 : i32
    return %arg0, %arg1 : i32, i32
  }
  func.func @transform_1(%arg0: i32, %arg1: i32) -> (i32, i32) {
    %c0_i32 = arith.constant 0 : i32
    %c0_i32_0 = arith.constant 0 : i32
    return %arg1, %c0_i32 : i32, i32
  }
  func.func @transform_2(%arg0: i32, %arg1: i32) -> (i32, i32) {
    %c0_i32 = arith.constant 0 : i32
    %c0_i32_0 = arith.constant 0 : i32
    %c0_i32_1 = arith.constant 0 : i32
    return %c0_i32, %c0_i32_0 : i32, i32
  }
  func.func @transform_3(%arg0: i32, %arg1: i32) -> (i32, i32) {
    %c0_i32 = arith.constant 0 : i32
    %c0_i32_0 = arith.constant 0 : i32
    return %arg0, %c0_i32 : i32, i32
  }
}

module attributes {stable_mosaic.version = 11 : i64} {
  func.func @_fused_linear_kernel(%arg0: i32, %arg1: i32, %arg2: memref<2x256xf32, #tpu.memory_space<vmem>>, %arg3: memref<256x512xbf16, #tpu.memory_space<vmem>>, %arg4: memref<1x512xf32, #tpu.memory_space<vmem>>, %arg5: memref<1x512xf32, #tpu.memory_space<vmem>>, %arg6: memref<1x512xf32, #tpu.memory_space<vmem>>, %arg7: memref<1x256xf32, #tpu.memory_space<vmem>>, %arg8: memref<1x256xf32, #tpu.memory_space<vmem>>, %arg9: memref<2x512xf32, #tpu.memory_space<vmem>>, %arg10: memref<2x512xf32, #tpu.memory_space<vmem>>) attributes {dimension_semantics = [#tpu.dimension_semantics<parallel>, #tpu.dimension_semantics<arbitrary>], iteration_bounds = array<i64: 1, 1>, scalar_prefetch = 0 : i64, scratch_operands = 1 : i64, tpu.core_type = #tpu.core_type<tc>, window_params = [{transform_indices = @transform_0, window_bounds = array<i64: 2, 256>}, {transform_indices = @transform_1, window_bounds = array<i64: 256, 512>}, {pipeline_mode = #tpu.pipeline_mode<synchronous>, transform_indices = @transform_2, window_bounds = array<i64: 1, 512>}, {pipeline_mode = #tpu.pipeline_mode<synchronous>, transform_indices = @transform_3, window_bounds = array<i64: 1, 512>}, {pipeline_mode = #tpu.pipeline_mode<synchronous>, transform_indices = @transform_4, window_bounds = array<i64: 1, 512>}, {pipeline_mode = #tpu.pipeline_mode<synchronous>, transform_indices = @transform_5, window_bounds = array<i64: 1, 256>}, {pipeline_mode = #tpu.pipeline_mode<synchronous>, transform_indices = @transform_6, window_bounds = array<i64: 1, 256>}, {transform_indices = @transform_7, window_bounds = array<i64: 2, 512>}]} {
    %c0_i32 = arith.constant 0 : i32
    %0 = arith.cmpi eq, %arg1, %c0_i32 : i32
    %1 = arith.extui %0 : i1 to i32
    %c0_i32_0 = arith.constant 0 : i32
    %2 = arith.cmpi ne, %1, %c0_i32_0 : i32
    scf.if %2 {
      %c0_22 = arith.constant 0 : index
      %c0_23 = arith.constant 0 : index
      %45 = vector.load %arg4[%c0_22, %c0_23] : memref<1x512xf32, #tpu.memory_space<vmem>>, vector<1x512xf32>
      %46 = vector.shape_cast %45 : vector<1x512xf32> to vector<1x512xf32>
      %47 = vector.broadcast %46 : vector<1x512xf32> to vector<2x512xf32>
      %c0_24 = arith.constant 0 : index
      %c0_25 = arith.constant 0 : index
      %48 = vector.load %arg10[%c0_24, %c0_25] : memref<2x512xf32, #tpu.memory_space<vmem>>, vector<2x512xf32>
      tpu.vector_store %arg10[%c0_24, %c0_25], %47 {strides = array<i32>} : memref<2x512xf32, #tpu.memory_space<vmem>>, vector<2x512xf32>,
    } else {
    }
    %c0 = arith.constant 0 : index
    %c0_1 = arith.constant 0 : index
    %3 = vector.load %arg2[%c0, %c0_1] : memref<2x256xf32, #tpu.memory_space<vmem>>, vector<2x256xf32>
    %c0_2 = arith.constant 0 : index
    %c0_3 = arith.constant 0 : index
    %4 = vector.load %arg7[%c0_2, %c0_3] : memref<1x256xf32, #tpu.memory_space<vmem>>, vector<1x256xf32>
    %c0_4 = arith.constant 0 : index
    %c0_5 = arith.constant 0 : index
    %5 = vector.load %arg8[%c0_4, %c0_5] : memref<1x256xf32, #tpu.memory_space<vmem>>, vector<1x256xf32>
    %cst = arith.constant dense<0.000000e+00> : vector<2xf32>
    %6 = vector.multi_reduction <add>, %3, %cst [1] : vector<2x256xf32> to vector<2xf32>
    %7 = vector.shape_cast %6 : vector<2xf32> to vector<2x1xf32>
    %cst_6 = arith.constant 2.560000e+02 : f32
    %8 = vector.broadcast %cst_6 : f32 to vector<2x1xf32>
    %9 = arith.divf %7, %8 : vector<2x1xf32>
    %10 = vector.broadcast %9 : vector<2x1xf32> to vector<2x256xf32>
    %11 = arith.subf %3, %10 : vector<2x256xf32>
    %12 = arith.mulf %11, %11 : vector<2x256xf32>
    %cst_7 = arith.constant dense<0.000000e+00> : vector<2xf32>
    %13 = vector.multi_reduction <add>, %12, %cst_7 [1] : vector<2x256xf32> to vector<2xf32>
    %14 = vector.shape_cast %13 : vector<2xf32> to vector<2x1xf32>
    %cst_8 = arith.constant 2.560000e+02 : f32
    %15 = vector.broadcast %cst_8 : f32 to vector<2x1xf32>
    %16 = arith.divf %14, %15 : vector<2x1xf32>
    %17 = vector.broadcast %9 : vector<2x1xf32> to vector<2x256xf32>
    %18 = arith.subf %3, %17 : vector<2x256xf32>
    %cst_9 = arith.constant 9.99999974E-6 : f32
    %19 = vector.broadcast %cst_9 : f32 to vector<2x1xf32>
    %20 = arith.addf %16, %19 : vector<2x1xf32>
    %21 = math.rsqrt %20 : vector<2x1xf32>
    %22 = vector.broadcast %21 : vector<2x1xf32> to vector<2x256xf32>
    %23 = arith.mulf %18, %22 : vector<2x256xf32>
    %24 = vector.broadcast %4 : vector<1x256xf32> to vector<2x256xf32>
    %25 = arith.mulf %23, %24 : vector<2x256xf32>
    %26 = vector.broadcast %5 : vector<1x256xf32> to vector<2x256xf32>
    %27 = arith.addf %25, %26 : vector<2x256xf32>
    %cst_10 = arith.constant 5.000000e-01 : f32
    %28 = vector.broadcast %cst_10 : f32 to vector<2x256xf32>
    %29 = arith.mulf %28, %27 : vector<2x256xf32>
    %cst_11 = arith.constant 0.707106769 : f32
    %30 = vector.broadcast %cst_11 : f32 to vector<2x256xf32>
    %31 = arith.mulf %27, %30 : vector<2x256xf32>
    %32 = math.erf %31 : vector<2x256xf32>
    %cst_12 = arith.constant 1.000000e+00 : f32
    %33 = vector.broadcast %cst_12 : f32 to vector<2x256xf32>
    %34 = arith.addf %33, %32 : vector<2x256xf32>
    %35 = arith.mulf %29, %34 : vector<2x256xf32>
    %c0_13 = arith.constant 0 : index
    %c0_14 = arith.constant 0 : index
    %36 = vector.load %arg10[%c0_13, %c0_14] : memref<2x512xf32, #tpu.memory_space<vmem>>, vector<2x512xf32>
    %37 = arith.truncf %35 : vector<2x256xf32> to vector<2x256xbf16>
    %c0_15 = arith.constant 0 : index
    %c0_16 = arith.constant 0 : index
    %38 = vector.load %arg3[%c0_15, %c0_16] : memref<256x512xbf16, #tpu.memory_space<vmem>>, vector<256x512xbf16>
    %cst_17 = arith.constant dense<0.000000e+00> : vector<2x512xf32>
    %39 = tpu.matmul %37, %38, %cst_17 {dimension_numbers = #tpu.dot_dimension_numbers<[1], [0], [0], [1], [0, 0, 1, 1], [], []>} : vector<2x256xbf16>, vector<256x512xbf16>, vector<2x512xf32> -> vector<2x512xf32>
    %40 = arith.addf %36, %39 : vector<2x512xf32>
    %c0_18 = arith.constant 0 : index
    %c0_19 = arith.constant 0 : index
    %41 = vector.load %arg10[%c0_18, %c0_19] : memref<2x512xf32, #tpu.memory_space<vmem>>, vector<2x512xf32>
    tpu.vector_store %arg10[%c0_18, %c0_19], %40 {strides = array<i32>} : memref<2x512xf32, #tpu.memory_space<vmem>>, vector<2x512xf32>,
    %c0_i32_20 = arith.constant 0 : i32
    %42 = arith.cmpi eq, %arg1, %c0_i32_20 : i32
    %43 = arith.extui %42 : i1 to i32
    %c0_i32_21 = arith.constant 0 : i32
    %44 = arith.cmpi ne, %43, %c0_i32_21 : i32
    scf.if %44 {
      %c0_22 = arith.constant 0 : index
      %c0_23 = arith.constant 0 : index
      %45 = vector.load %arg10[%c0_22, %c0_23] : memref<2x512xf32, #tpu.memory_space<vmem>>, vector<2x512xf32>
      %c0_24 = arith.constant 0 : index
      %c0_25 = arith.constant 0 : index
      %46 = vector.load %arg5[%c0_24, %c0_25] : memref<1x512xf32, #tpu.memory_space<vmem>>, vector<1x512xf32>
      %c0_26 = arith.constant 0 : index
      %c0_27 = arith.constant 0 : index
      %47 = vector.load %arg6[%c0_26, %c0_27] : memref<1x512xf32, #tpu.memory_space<vmem>>, vector<1x512xf32>
      %cst_28 = arith.constant dense<0.000000e+00> : vector<2xf32>
      %48 = vector.multi_reduction <add>, %45, %cst_28 [1] : vector<2x512xf32> to vector<2xf32>
      %49 = vector.shape_cast %48 : vector<2xf32> to vector<2x1xf32>
      %cst_29 = arith.constant 5.120000e+02 : f32
      %50 = vector.broadcast %cst_29 : f32 to vector<2x1xf32>
      %51 = arith.divf %49, %50 : vector<2x1xf32>
      %52 = vector.broadcast %51 : vector<2x1xf32> to vector<2x512xf32>
      %53 = arith.subf %45, %52 : vector<2x512xf32>
      %54 = arith.mulf %53, %53 : vector<2x512xf32>
      %cst_30 = arith.constant dense<0.000000e+00> : vector<2xf32>
      %55 = vector.multi_reduction <add>, %54, %cst_30 [1] : vector<2x512xf32> to vector<2xf32>
      %56 = vector.shape_cast %55 : vector<2xf32> to vector<2x1xf32>
      %cst_31 = arith.constant 5.120000e+02 : f32
      %57 = vector.broadcast %cst_31 : f32 to vector<2x1xf32>
      %58 = arith.divf %56, %57 : vector<2x1xf32>
      %59 = vector.broadcast %51 : vector<2x1xf32> to vector<2x512xf32>
      %60 = arith.subf %45, %59 : vector<2x512xf32>
      %cst_32 = arith.constant 9.99999974E-6 : f32
      %61 = vector.broadcast %cst_32 : f32 to vector<2x1xf32>
      %62 = arith.addf %58, %61 : vector<2x1xf32>
      %63 = math.rsqrt %62 : vector<2x1xf32>
      %64 = vector.broadcast %63 : vector<2x1xf32> to vector<2x512xf32>
      %65 = arith.mulf %60, %64 : vector<2x512xf32>
      %66 = vector.broadcast %46 : vector<1x512xf32> to vector<2x512xf32>
      %67 = arith.mulf %65, %66 : vector<2x512xf32>
      %68 = vector.broadcast %47 : vector<1x512xf32> to vector<2x512xf32>
      %69 = arith.addf %67, %68 : vector<2x512xf32>
      %cst_33 = arith.constant 5.000000e-01 : f32
      %70 = vector.broadcast %cst_33 : f32 to vector<2x512xf32>
      %71 = arith.mulf %70, %69 : vector<2x512xf32>
      %cst_34 = arith.constant 0.707106769 : f32
      %72 = vector.broadcast %cst_34 : f32 to vector<2x512xf32>
      %73 = arith.mulf %69, %72 : vector<2x512xf32>
      %74 = math.erf %73 : vector<2x512xf32>
      %cst_35 = arith.constant 1.000000e+00 : f32
      %75 = vector.broadcast %cst_35 : f32 to vector<2x512xf32>
      %76 = arith.addf %75, %74 : vector<2x512xf32>
      %77 = arith.mulf %71, %76 : vector<2x512xf32>
      %c0_36 = arith.constant 0 : index
      %c0_37 = arith.constant 0 : index
      %78 = vector.load %arg9[%c0_36, %c0_37] : memref<2x512xf32, #tpu.memory_space<vmem>>, vector<2x512xf32>
      tpu.vector_store %arg9[%c0_36, %c0_37], %77 {strides = array<i32>} : memref<2x512xf32, #tpu.memory_space<vmem>>, vector<2x512xf32>,
    } else {
    }
    return
  }
  func.func @transform_0(%arg0: i32, %arg1: i32) -> (i32, i32) {
    %c0_i32 = arith.constant 0 : i32
    return %arg0, %arg1 : i32, i32
  }
  func.func @transform_1(%arg0: i32, %arg1: i32) -> (i32, i32) {
    %c0_i32 = arith.constant 0 : i32
    %c0_i32_0 = arith.constant 0 : i32
    return %arg1, %c0_i32 : i32, i32
  }
  func.func @transform_2(%arg0: i32, %arg1: i32) -> (i32, i32) {
    %c0_i32 = arith.constant 0 : i32
    %c0_i32_0 = arith.constant 0 : i32
    %c0_i32_1 = arith.constant 0 : i32
    return %c0_i32, %c0_i32_0 : i32, i32
  }
  func.func @transform_3(%arg0: i32, %arg1: i32) -> (i32, i32) {
    %c0_i32 = arith.constant 0 : i32
    %c0_i32_0 = arith.constant 0 : i32
    %c0_i32_1 = arith.constant 0 : i32
    return %c0_i32, %c0_i32_0 : i32, i32
  }
  func.func @transform_4(%arg0: i32, %arg1: i32) -> (i32, i32) {
    %c0_i32 = arith.constant 0 : i32
    %c0_i32_0 = arith.constant 0 : i32
    %c0_i32_1 = arith.constant 0 : i32
    return %c0_i32, %c0_i32_0 : i32, i32
  }
  func.func @transform_5(%arg0: i32, %arg1: i32) -> (i32, i32) {
    %c0_i32 = arith.constant 0 : i32
    %c0_i32_0 = arith.constant 0 : i32
    %c0_i32_1 = arith.constant 0 : i32
    return %c0_i32, %c0_i32_0 : i32, i32
  }
  func.func @transform_6(%arg0: i32, %arg1: i32) -> (i32, i32) {
    %c0_i32 = arith.constant 0 : i32
    %c0_i32_0 = arith.constant 0 : i32
    %c0_i32_1 = arith.constant 0 : i32
    return %c0_i32, %c0_i32_0 : i32, i32
  }
  func.func @transform_7(%arg0: i32, %arg1: i32) -> (i32, i32) {
    %c0_i32 = arith.constant 0 : i32
    %c0_i32_0 = arith.constant 0 : i32
    return %arg0, %c0_i32 : i32, i32
  }
}

module attributes {stable_mosaic.version = 11 : i64} {
  func.func @_fused_linear_kernel(%arg0: i32, %arg1: i32, %arg2: memref<2x512xf32, #tpu.memory_space<vmem>>, %arg3: memref<512x512xbf16, #tpu.memory_space<vmem>>, %arg4: memref<1x512xf32, #tpu.memory_space<vmem>>, %arg5: memref<1x512xf32, #tpu.memory_space<vmem>>, %arg6: memref<1x512xf32, #tpu.memory_space<vmem>>, %arg7: memref<2x512xf32, #tpu.memory_space<vmem>>, %arg8: memref<2x512xf32, #tpu.memory_space<vmem>>) attributes {dimension_semantics = [#tpu.dimension_semantics<parallel>, #tpu.dimension_semantics<arbitrary>], iteration_bounds = array<i64: 1, 1>, scalar_prefetch = 0 : i64, scratch_operands = 1 : i64, tpu.core_type = #tpu.core_type<tc>, window_params = [{transform_indices = @transform_0, window_bounds = array<i64: 2, 512>}, {transform_indices = @transform_1, window_bounds = array<i64: 512, 512>}, {pipeline_mode = #tpu.pipeline_mode<synchronous>, transform_indices = @transform_2, window_bounds = array<i64: 1, 512>}, {pipeline_mode = #tpu.pipeline_mode<synchronous>, transform_indices = @transform_3, window_bounds = array<i64: 1, 512>}, {pipeline_mode = #tpu.pipeline_mode<synchronous>, transform_indices = @transform_4, window_bounds = array<i64: 1, 512>}, {transform_indices = @transform_5, window_bounds = array<i64: 2, 512>}]} {
    %c0_i32 = arith.constant 0 : i32
    %0 = arith.cmpi eq, %arg1, %c0_i32 : i32
    %1 = arith.extui %0 : i1 to i32
    %c0_i32_0 = arith.constant 0 : i32
    %2 = arith.cmpi ne, %1, %c0_i32_0 : i32
    scf.if %2 {
      %c0_10 = arith.constant 0 : index
      %c0_11 = arith.constant 0 : index
      %13 = vector.load %arg4[%c0_10, %c0_11] : memref<1x512xf32, #tpu.memory_space<vmem>>, vector<1x512xf32>
      %14 = vector.shape_cast %13 : vector<1x512xf32> to vector<1x512xf32>
      %15 = vector.broadcast %14 : vector<1x512xf32> to vector<2x512xf32>
      %c0_12 = arith.constant 0 : index
      %c0_13 = arith.constant 0 : index
      %16 = vector.load %arg8[%c0_12, %c0_13] : memref<2x512xf32, #tpu.memory_space<vmem>>, vector<2x512xf32>
      tpu.vector_store %arg8[%c0_12, %c0_13], %15 {strides = array<i32>} : memref<2x512xf32, #tpu.memory_space<vmem>>, vector<2x512xf32>,
    } else {
    }
    %c0 = arith.constant 0 : index
    %c0_1 = arith.constant 0 : index
    %3 = vector.load %arg2[%c0, %c0_1] : memref<2x512xf32, #tpu.memory_space<vmem>>, vector<2x512xf32>
    %c0_2 = arith.constant 0 : index
    %c0_3 = arith.constant 0 : index
    %4 = vector.load %arg8[%c0_2, %c0_3] : memref<2x512xf32, #tpu.memory_space<vmem>>, vector<2x512xf32>
    %5 = arith.truncf %3 : vector<2x512xf32> to vector<2x512xbf16>
    %c0_4 = arith.constant 0 : index
    %c0_5 = arith.constant 0 : index
    %6 = vector.load %arg3[%c0_4, %c0_5] : memref<512x512xbf16, #tpu.memory_space<vmem>>, vector<512x512xbf16>
    %cst = arith.constant dense<0.000000e+00> : vector<2x512xf32>
    %7 = tpu.matmul %5, %6, %cst {dimension_numbers = #tpu.dot_dimension_numbers<[1], [0], [0], [1], [0, 0, 1, 1], [], []>} : vector<2x512xbf16>, vector<512x512xbf16>, vector<2x512xf32> -> vector<2x512xf32>
    %8 = arith.addf %4, %7 : vector<2x512xf32>
    %c0_6 = arith.constant 0 : index
    %c0_7 = arith.constant 0 : index
    %9 = vector.load %arg8[%c0_6, %c0_7] : memref<2x512xf32, #tpu.memory_space<vmem>>, vector<2x512xf32>
    tpu.vector_store %arg8[%c0_6, %c0_7], %8 {strides = array<i32>} : memref<2x512xf32, #tpu.memory_space<vmem>>, vector<2x512xf32>,
    %c0_i32_8 = arith.constant 0 : i32
    %10 = arith.cmpi eq, %arg1, %c0_i32_8 : i32
    %11 = arith.extui %10 : i1 to i32
    %c0_i32_9 = arith.constant 0 : i32
    %12 = arith.cmpi ne, %11, %c0_i32_9 : i32
    scf.if %12 {
      %c0_10 = arith.constant 0 : index
      %c0_11 = arith.constant 0 : index
      %13 = vector.load %arg8[%c0_10, %c0_11] : memref<2x512xf32, #tpu.memory_space<vmem>>, vector<2x512xf32>
      %c0_12 = arith.constant 0 : index
      %c0_13 = arith.constant 0 : index
      %14 = vector.load %arg5[%c0_12, %c0_13] : memref<1x512xf32, #tpu.memory_space<vmem>>, vector<1x512xf32>
      %c0_14 = arith.constant 0 : index
      %c0_15 = arith.constant 0 : index
      %15 = vector.load %arg6[%c0_14, %c0_15] : memref<1x512xf32, #tpu.memory_space<vmem>>, vector<1x512xf32>
      %cst_16 = arith.constant dense<0.000000e+00> : vector<2xf32>
      %16 = vector.multi_reduction <add>, %13, %cst_16 [1] : vector<2x512xf32> to vector<2xf32>
      %17 = vector.shape_cast %16 : vector<2xf32> to vector<2x1xf32>
      %cst_17 = arith.constant 5.120000e+02 : f32
      %18 = vector.broadcast %cst_17 : f32 to vector<2x1xf32>
      %19 = arith.divf %17, %18 : vector<2x1xf32>
      %20 = vector.broadcast %19 : vector<2x1xf32> to vector<2x512xf32>
      %21 = arith.subf %13, %20 : vector<2x512xf32>
      %22 = arith.mulf %21, %21 : vector<2x512xf32>
      %cst_18 = arith.constant dense<0.000000e+00> : vector<2xf32>
      %23 = vector.multi_reduction <add>, %22, %cst_18 [1] : vector<2x512xf32> to vector<2xf32>
      %24 = vector.shape_cast %23 : vector<2xf32> to vector<2x1xf32>
      %cst_19 = arith.constant 5.120000e+02 : f32
      %25 = vector.broadcast %cst_19 : f32 to vector<2x1xf32>
      %26 = arith.divf %24, %25 : vector<2x1xf32>
      %27 = vector.broadcast %19 : vector<2x1xf32> to vector<2x512xf32>
      %28 = arith.subf %13, %27 : vector<2x512xf32>
      %cst_20 = arith.constant 9.99999974E-6 : f32
      %29 = vector.broadcast %cst_20 : f32 to vector<2x1xf32>
      %30 = arith.addf %26, %29 : vector<2x1xf32>
      %31 = math.rsqrt %30 : vector<2x1xf32>
      %32 = vector.broadcast %31 : vector<2x1xf32> to vector<2x512xf32>
      %33 = arith.mulf %28, %32 : vector<2x512xf32>
      %34 = vector.broadcast %14 : vector<1x512xf32> to vector<2x512xf32>
      %35 = arith.mulf %33, %34 : vector<2x512xf32>
      %36 = vector.broadcast %15 : vector<1x512xf32> to vector<2x512xf32>
      %37 = arith.addf %35, %36 : vector<2x512xf32>
      %cst_21 = arith.constant 5.000000e-01 : f32
      %38 = vector.broadcast %cst_21 : f32 to vector<2x512xf32>
      %39 = arith.mulf %38, %37 : vector<2x512xf32>
      %cst_22 = arith.constant 0.707106769 : f32
      %40 = vector.broadcast %cst_22 : f32 to vector<2x512xf32>
      %41 = arith.mulf %37, %40 : vector<2x512xf32>
      %42 = math.erf %41 : vector<2x512xf32>
      %cst_23 = arith.constant 1.000000e+00 : f32
      %43 = vector.broadcast %cst_23 : f32 to vector<2x512xf32>
      %44 = arith.addf %43, %42 : vector<2x512xf32>
      %45 = arith.mulf %39, %44 : vector<2x512xf32>
      %c0_24 = arith.constant 0 : index
      %c0_25 = arith.constant 0 : index
      %46 = vector.load %arg7[%c0_24, %c0_25] : memref<2x512xf32, #tpu.memory_space<vmem>>, vector<2x512xf32>
      tpu.vector_store %arg7[%c0_24, %c0_25], %45 {strides = array<i32>} : memref<2x512xf32, #tpu.memory_space<vmem>>, vector<2x512xf32>,
    } else {
    }
    return
  }
  func.func @transform_0(%arg0: i32, %arg1: i32) -> (i32, i32) {
    %c0_i32 = arith.constant 0 : i32
    return %arg0, %arg1 : i32, i32
  }
  func.func @transform_1(%arg0: i32, %arg1: i32) -> (i32, i32) {
    %c0_i32 = arith.constant 0 : i32
    %c0_i32_0 = arith.constant 0 : i32
    return %arg1, %c0_i32 : i32, i32
  }
  func.func @transform_2(%arg0: i32, %arg1: i32) -> (i32, i32) {
    %c0_i32 = arith.constant 0 : i32
    %c0_i32_0 = arith.constant 0 : i32
    %c0_i32_1 = arith.constant 0 : i32
    return %c0_i32, %c0_i32_0 : i32, i32
  }
  func.func @transform_3(%arg0: i32, %arg1: i32) -> (i32, i32) {
    %c0_i32 = arith.constant 0 : i32
    %c0_i32_0 = arith.constant 0 : i32
    %c0_i32_1 = arith.constant 0 : i32
    return %c0_i32, %c0_i32_0 : i32, i32
  }
  func.func @transform_4(%arg0: i32, %arg1: i32) -> (i32, i32) {
    %c0_i32 = arith.constant 0 : i32
    %c0_i32_0 = arith.constant 0 : i32
    %c0_i32_1 = arith.constant 0 : i32
    return %c0_i32, %c0_i32_0 : i32, i32
  }
  func.func @transform_5(%arg0: i32, %arg1: i32) -> (i32, i32) {
    %c0_i32 = arith.constant 0 : i32
    %c0_i32_0 = arith.constant 0 : i32
    return %arg0, %c0_i32 : i32, i32
  }
}

</mosaic_0001>

<bundles_post_ra>
// kernel: brain_mlp_forward.8
= control target key start
LH: loop header
LB: loop body
LE: loop exit
PB: predicated region body
PF: predicated region fallthrough
CT: control target
= control target key end

     0   :  { %v20_v36 = vlaneseq  ;;  %v719_v37 = vmov 1983009808   ;;  %s951_s1 = inlined_call_operand.vmem [shape: bf16[512,256], index: 1, kind: input, shape index: {}]   ;;  %s952_s0 = inlined_call_operand.vmem [shape: f32[2,512], index: 0, kind: input, shape index: {}]   ;;  %s953_s2 = inlined_call_operand.vmem [shape: f32[1,256], index: 2, kind: input, shape index: {}]   ;;  %s954_s3 = inlined_call_operand.vmem [shape: f32[2,256], index: 3, kind: output, shape index: {}]  }
   0x1   :  { %v622_v0 = vld [vmem:[%s951_s1 + $0x4] ss:$8 sps:$4 sm:$0xff]   ;;  %v626_v2 = vld [vmem:[%s951_s1] ss:$8 sps:$4 sm:$0xff]   ;;  %v628_v4 = vld [vmem:[%s951_s1 + $0x14] ss:$8 sps:$4 sm:$0xff]   ;;  %v43_v38 = vunpack.c.l.s4 %v719_v37 }
   0x2   :  { %v624_v1 = vld [vmem:[%s951_s1 + $0x104] ss:$8 sps:$4 sm:$0xff]   ;;  %450 = vmatprep.subr.bf16.mxu1 %v622_v0  ;;  %v627_v3 = vld [vmem:[%s951_s1 + $0x100] ss:$8 sps:$4 sm:$0xff]   ;;  %v630_v5 = vld [vmem:[%s951_s1 + $0x114] ss:$8 sps:$4 sm:$0xff]  }
   0x3   :  { %491 = vmatprep.subr.bf16.mxu0 %v624_v1  ;;  %451 = vmatpush1.bf16.msra.mxu1 %v626_v2  ;;  %v632_v6 = vld [vmem:[%s951_s1 + $0x10] ss:$8 sps:$4 sm:$0xff]   ;;  %v634_v8 = vld [vmem:[%s951_s1 + $0x24] ss:$8 sps:$4 sm:$0xff]   ;;  %v638_v10 = vld [vmem:[%s951_s1 + $0x20] ss:$8 sps:$4 sm:$0xff]   ;;  %v44_v43 = vunpack.c.0.s8 %v43_v38 }
   0x4   :  { %492 = vmatpush1.bf16.msra.mxu0 %v627_v3  ;;  %452 = vmatprep.subr.bf16.mxu1 %v628_v4  ;;  %v633_v7 = vld [vmem:[%s951_s1 + $0x110] ss:$8 sps:$4 sm:$0xff]   ;;  %v636_v9 = vld [vmem:[%s951_s1 + $0x124] ss:$8 sps:$4 sm:$0xff]   ;;  %v639_v11 = vld [vmem:[%s951_s1 + $0x120] ss:$8 sps:$4 sm:$0xff]  }
   0x5   :  { %493 = vmatprep.subr.bf16.mxu0 %v630_v5  ;;  %v640_v12 = vld [vmem:[%s951_s1 + $0x34] ss:$8 sps:$4 sm:$0xff]   ;;  %v644_v14 = vld [vmem:[%s951_s1 + $0x30] ss:$8 sps:$4 sm:$0xff]   ;;  %v646_v16 = vld [vmem:[%s951_s1 + $0x44] ss:$8 sps:$4 sm:$0xff]  }
   0x6   :  { %v642_v13 = vld [vmem:[%s951_s1 + $0x134] ss:$8 sps:$4 sm:$0xff]   ;;  %v645_v15 = vld [vmem:[%s951_s1 + $0x130] ss:$8 sps:$4 sm:$0xff]   ;;  %v648_v17 = vld [vmem:[%s951_s1 + $0x144] ss:$8 sps:$4 sm:$0xff]  }
   0x7   :  { %453 = vmatpush1.bf16.msra.mxu1 %v632_v6  ;;  %v650_v18 = vld [vmem:[%s951_s1 + $0x40] ss:$8 sps:$4 sm:$0xff]   ;;  %v652_v20 = vld [vmem:[%s951_s1 + $0x54] ss:$8 sps:$4 sm:$0xff]   ;;  %v656_v22 = vld [vmem:[%s951_s1 + $0x50] ss:$8 sps:$4 sm:$0xff]  }
   0x8   :  { %494 = vmatpush1.bf16.msra.mxu0 %v633_v7  ;;  %454 = vmatprep.subr.bf16.mxu1 %v634_v8  ;;  %v651_v19 = vld [vmem:[%s951_s1 + $0x140] ss:$8 sps:$4 sm:$0xff]   ;;  %v654_v21 = vld [vmem:[%s951_s1 + $0x154] ss:$8 sps:$4 sm:$0xff]   ;;  %v657_v23 = vld [vmem:[%s951_s1 + $0x150] ss:$8 sps:$4 sm:$0xff]  }
   0x9   :  { %495 = vmatprep.subr.bf16.mxu0 %v636_v9  ;;  %v658_v24 = vld [vmem:[%s951_s1 + $0x64] ss:$8 sps:$4 sm:$0xff]   ;;  %v662_v26 = vld [vmem:[%s951_s1 + $0x60] ss:$8 sps:$4 sm:$0xff]   ;;  %v664_v28 = vld [vmem:[%s951_s1 + $0x74] ss:$8 sps:$4 sm:$0xff]  }
   0xa   :  { %v660_v25 = vld [vmem:[%s951_s1 + $0x164] ss:$8 sps:$4 sm:$0xff]   ;;  %v663_v27 = vld [vmem:[%s951_s1 + $0x160] ss:$8 sps:$4 sm:$0xff]   ;;  %v666_v29 = vld [vmem:[%s951_s1 + $0x174] ss:$8 sps:$4 sm:$0xff]  }
   0xb   :  { %455 = vmatpush1.bf16.msra.mxu1 %v638_v10  ;;  %v668_v30 = vld [vmem:[%s951_s1 + $0x70] ss:$8 sps:$4 sm:$0xff]   ;;  %v670_v32 = vld [vmem:[%s951_s1 + $0x84] ss:$8 sps:$4 sm:$0xff]   ;;  %v674_v34 = vld [vmem:[%s951_s1 + $0x80] ss:$8 sps:$4 sm:$0xff]  }
   0xc   :  { %496 = vmatpush1.bf16.msra.mxu0 %v639_v11  ;;  %456 = vmatprep.subr.bf16.mxu1 %v640_v12  ;;  %v669_v31 = vld [vmem:[%s951_s1 + $0x170] ss:$8 sps:$4 sm:$0xff]   ;;  %v672_v33 = vld [vmem:[%s951_s1 + $0x184] ss:$8 sps:$4 sm:$0xff]   ;;  %v675_v35 = vld [vmem:[%s951_s1 + $0x180] ss:$8 sps:$4 sm:$0xff]  }
   0xd   :  { %497 = vmatprep.subr.bf16.mxu0 %v642_v13  ;;  %v676_v39 = vld [vmem:[%s951_s1 + $0x94] ss:$8 sps:$4 sm:$0xff]   ;;  %v680_v41 = vld [vmem:[%s951_s1 + $0x90] ss:$8 sps:$4 sm:$0xff]   ;;  %v857_v42 = vshrl.u32 %v20_v36, 7  ;;  %v38_v52 = vld [vmem:[%s952_s0] sm:$0xff] }
   0xe   :  { %v678_v40 = vld [vmem:[%s951_s1 + $0x194] ss:$8 sps:$4 sm:$0xff]   ;;  %v681_v44 = vld [vmem:[%s951_s1 + $0x190] ss:$8 sps:$4 sm:$0xff]   ;;  %v682_v45 = vld [vmem:[%s951_s1 + $0xa4] ss:$8 sps:$4 sm:$0xff]   ;;  %v41_v54 = vcombine.high %v38_v52, %v38_v52 }
   0xf   :  { %457 = vmatpush1.bf16.msra.mxu1 %v644_v14  ;;  %v684_v46 = vld [vmem:[%s951_s1 + $0x1a4] ss:$8 sps:$4 sm:$0xff]   ;;  %v686_v47 = vld [vmem:[%s951_s1 + $0xa0] ss:$8 sps:$4 sm:$0xff]   ;;  %v875_v49 = vsub.s32 %v44_v43, %v857_v42  ;;  %v688_v50 = vld [vmem:[%s951_s1 + $0xb4] ss:$8 sps:$4 sm:$0xff]  }
  0x10   :  { %498 = vmatpush1.bf16.msra.mxu0 %v645_v15  ;;  %458 = vmatprep.subr.bf16.mxu1 %v646_v16  ;;  %v687_v48 = vld [vmem:[%s951_s1 + $0x1a0] ss:$8 sps:$4 sm:$0xff]   ;;  %v690_v51 = vld [vmem:[%s951_s1 + $0x1b4] ss:$8 sps:$4 sm:$0xff]   ;;  %v692_v55 = vld [vmem:[%s951_s1 + $0xb0] ss:$8 sps:$4 sm:$0xff]  }
  0x11   :  { %499 = vmatprep.subr.bf16.mxu0 %v648_v17  ;;  %v48_v53 = vrot.slane %v38_v52, %v875_v49  ;;  %v693_v56 = vld [vmem:[%s951_s1 + $0x1b0] ss:$8 sps:$4 sm:$0xff]   ;;  %v694_v57 = vld [vmem:[%s951_s1 + $0xc4] ss:$8 sps:$4 sm:$0xff]   ;;  %v55_v60 = vrot.slane %v41_v54, %v875_v49  ;;  %v698_v63 = vld [vmem:[%s951_s1 + $0xc0] ss:$8 sps:$4 sm:$0xff]  }
  0x12   :  { %v696_v58 = vld [vmem:[%s951_s1 + $0x1c4] ss:$8 sps:$4 sm:$0xff]   ;;  %v699_v0 = vld [vmem:[%s951_s1 + $0x1c0] ss:$8 sps:$4 sm:$0xff]   ;;  %v700_v1 = vld [vmem:[%s951_s1 + $0xd4] ss:$8 sps:$4 sm:$0xff]  }
  0x13   :  { %459 = vmatpush1.bf16.msra.mxu1 %v650_v18  ;;  %v56_v59 = vcombine.high %v48_v53, %v48_v53  ;;  %v57_v62 = vcombine.high %v55_v60, %v55_v60  ;;  %v702_v2 = vld [vmem:[%s951_s1 + $0x1d4] ss:$8 sps:$4 sm:$0xff]   ;;  %v704_v4 = vld [vmem:[%s951_s1 + $0xd0] ss:$8 sps:$4 sm:$0xff]   ;;  %v706_v6 = vld [vmem:[%s951_s1 + $0xe4] ss:$8 sps:$4 sm:$0xff]   ;;  %v62_v14 = vpack.c.bf16 %v48_v53, %v48_v53  ;;  %v64_v15 = vpack.c.bf16 %v55_v60, %v55_v60 }
  0x14   :  { %500 = vmatpush1.bf16.msra.mxu0 %v651_v19  ;;  %460 = vmatprep.subr.bf16.mxu1 %v652_v20  ;;  %v705_v5 = vld [vmem:[%s951_s1 + $0x1d0] ss:$8 sps:$4 sm:$0xff]   ;;  %v708_v7 = vld [vmem:[%s951_s1 + $0x1e4] ss:$8 sps:$4 sm:$0xff]   ;;  %v710_v8 = vld [vmem:[%s951_s1 + $0xe0] ss:$8 sps:$4 sm:$0xff]  }
  0x15   :  { %501 = vmatprep.subr.bf16.mxu0 %v654_v21  ;;  %v63_v61 = vpack.c.bf16 %v56_v59, %v56_v59  ;;  %v65_v3 = vpack.c.bf16 %v57_v62, %v57_v62  ;;  %v711_v9 = vld [vmem:[%s951_s1 + $0x1e0] ss:$8 sps:$4 sm:$0xff]   ;;  %v712_v10 = vld [vmem:[%s951_s1 + $0xf4] ss:$8 sps:$4 sm:$0xff]   ;;  %v716_v12 = vld [vmem:[%s951_s1 + $0xf0] ss:$8 sps:$4 sm:$0xff]  }
  0x16   :  { %v714_v11 = vld [vmem:[%s951_s1 + $0x1f4] ss:$8 sps:$4 sm:$0xff]   ;;  %v717_v13 = vld [vmem:[%s951_s1 + $0x1f0] ss:$8 sps:$4 sm:$0xff]   ;;  %v22_v16 = vsub.s32 0, %v857_v42  ;;  %v26_v17 = vsub.s32 1, %v857_v42 }
  0x17   :  { %461 = vmatpush1.bf16.msra.mxu1 %v656_v22  ;;  %482 = vmatprep.mubr.bf16.mxu1 %v63_v61  ;;  %v18_v18 = vld [vmem:[%s953_s2] sm:$0x3] }
  0x18   :  { %502 = vmatpush1.bf16.msra.mxu0 %v657_v23  ;;  %462 = vmatprep.subr.bf16.mxu1 %v658_v24  ;;  %v23_v19 = vrot.slane %v18_v18, %v22_v16  ;;  %v27_v20 = vrot.slane %v18_v18, %v26_v17 }
  0x19   :  { %503 = vmatprep.subr.bf16.mxu0 %v660_v25  ;;  %523 = vmatprep.mubr.bf16.mxu0 %v65_v3 }
  0x1a   :  { %v28_v21 = vcombine.low %v23_v19, %v27_v20 }
  0x1b   :  { %463 = vmatpush1.bf16.msra.mxu1 %v662_v26 }
  0x1c   :  { %504 = vmatpush1.bf16.msra.mxu0 %v663_v27  ;;  %464 = vmatprep.subr.bf16.mxu1 %v664_v28  ;;  %554 = vst.sshfl [vmem:[#allocation2] sm:$0x33 pattern:$0x76325410] %v28_v21 }
  0x1d   :  { %505 = vmatprep.subr.bf16.mxu0 %v666_v29 }
  0x1f   :  { %465 = vmatpush1.bf16.msra.mxu1 %v668_v30 }
  0x20   :  { %506 = vmatpush1.bf16.msra.mxu0 %v669_v31  ;;  %466 = vmatprep.subr.bf16.mxu1 %v670_v32 }
  0x21   :  { %507 = vmatprep.subr.bf16.mxu0 %v672_v33 }
  0x23   :  { %467 = vmatpush1.bf16.msra.mxu1 %v674_v34  ;;  %v39_v33 = vld [vmem:[#allocation2] sm:$0xf] }
  0x24   :  { %508 = vmatpush1.bf16.msra.mxu0 %v675_v35  ;;  %468 = vmatprep.subr.bf16.mxu1 %v676_v39 }
  0x25   :  { %509 = vmatprep.subr.bf16.mxu0 %v678_v40 }
  0x27   :  { %469 = vmatpush1.bf16.msra.mxu1 %v680_v41 }
  0x28   :  { %510 = vmatpush1.bf16.msra.mxu0 %v681_v44  ;;  %470 = vmatprep.subr.bf16.mxu1 %v682_v45 }
  0x29   :  { %511 = vmatprep.subr.bf16.mxu0 %v684_v46 }
  0x2b   :  { %471 = vmatpush1.bf16.msra.mxu1 %v686_v47 }
  0x2c   :  { %512 = vmatpush1.bf16.msra.mxu0 %v687_v48  ;;  %472 = vmatprep.subr.bf16.mxu1 %v688_v50 }
  0x2d   :  { %513 = vmatprep.subr.bf16.mxu0 %v690_v51 }
  0x2f   :  { %473 = vmatpush1.bf16.msra.mxu1 %v692_v55 }
  0x30   :  { %514 = vmatpush1.bf16.msra.mxu0 %v693_v56  ;;  %474 = vmatprep.subr.bf16.mxu1 %v694_v57 }
  0x31   :  { %515 = vmatprep.subr.bf16.mxu0 %v696_v58 }
  0x33   :  { %475 = vmatpush1.bf16.msra.mxu1 %v698_v63 }
  0x34   :  { %516 = vmatpush1.bf16.msra.mxu0 %v699_v0  ;;  %476 = vmatprep.subr.bf16.mxu1 %v700_v1 }
  0x35   :  { %517 = vmatprep.subr.bf16.mxu0 %v702_v2 }
  0x37   :  { %477 = vmatpush1.bf16.msra.mxu1 %v704_v4 }
  0x38   :  { %518 = vmatpush1.bf16.msra.mxu0 %v705_v5  ;;  %478 = vmatprep.subr.bf16.mxu1 %v706_v6 }
  0x39   :  { %519 = vmatprep.subr.bf16.mxu0 %v708_v7 }
  0x3b   :  { %479 = vmatpush1.bf16.msra.mxu1 %v710_v8 }
  0x3c   :  { %520 = vmatpush1.bf16.msra.mxu0 %v711_v9  ;;  %480 = vmatprep.subr.bf16.mxu1 %v712_v10 }
  0x3d   :  { %521 = vmatprep.subr.bf16.mxu0 %v714_v11 }
  0x3f   :  { %481 = vmatpush1.bf16.msra.mxu1 %v716_v12 }
  0x40   :  { %522 = vmatpush1.bf16.msra.mxu0 %v717_v13 }
  0x42   :  { %483 = vmatmul.mubr.bf16.vlgmr.msra.gmra.mrb[0].mxu1 %v62_v14 }
  0x43   :  { %524 = vmatmul.mubr.bf16.vlgmr.msra.gmra.mrb[0].mxu0 %v64_v15 }
 0x115   :  { %v484_v22 = vpop.f32.mrb[0].mxu1 }
 0x116   :  { %v525_v23 = vpop.f32.mrb[0].mxu0  ;;  %v486_v25 = vpop.f32.mrb[1].mxu1 }
 0x117   :  { %v526_v24 = vadd.f32 %v525_v23, %v484_v22  ;;  %v527_v26 = vpop.f32.mrb[1].mxu0  ;;  %v488_v28 = vpop.f32.mrb[2].mxu1 }
 0x118   :  { %v528_v27 = vadd.f32 %v527_v26, %v486_v25  ;;  %v529_v29 = vpop.f32.mrb[2].mxu0  ;;  %v489_v30 = vpop.f32.mrb[3].mxu1 }
 0x119   :  { %v530_v31 = vpop.f32.mrb[3].mxu0 }
 0x11a   :  { %v534_v32 = vcombine.low %v526_v24, %v528_v27 }
 0x11c   :  { %v541_v34 = vrot.slane %v534_v32, %v875_v49 }
 0x11e   :  { %v543_v35 = vadd.f32 %v541_v34, %v39_v33 }
 0x120   :  { %544 = vst [vmem:[#allocation2] sm:$0xf] %v543_v35 }
 0x127   :  { %v548_v36 = vld [vmem:[#allocation2] sm:$0xf] }
 0x128   :  { %549 = vst [vmem:[%s954_s3] sm:$0xf] %v548_v36 }

// kernel: brain_mlp_forward.6
= control target key start
LH: loop header
LB: loop body
LE: loop exit
PB: predicated region body
PF: predicated region fallthrough
CT: control target
= control target key end

     0   :  { %10 = vsyncpa [#allocation4], 0  ;;  %s1846_s0 = inlined_call_operand.vmem [shape: f32[2,512], index: 0, kind: input, shape index: {}]   ;;  %s1847_s1 = inlined_call_operand.hbm [shape: bf16[512,512], index: 1, kind: input, shape index: {}]   ;;  %s1848_s2 = inlined_call_operand.hbm [shape: f32[1,512], index: 2, kind: input, shape index: {}]   ;;  %s1849_s3 = inlined_call_operand.hbm [shape: f32[1,512], index: 3, kind: input, shape index: {}]   ;;  %s1850_s4 = inlined_call_operand.hbm [shape: f32[1,512], index: 4, kind: input, shape index: {}]   ;;  %s1851_s5 = inlined_call_operand.vmem [shape: f32[2,512], index: 5, kind: output, shape index: {}]  }
   0x1   :  { %11 = vsyncpa [#allocation6], 0 }
   0x2   :  { %12 = vsyncpa [#allocation9], 0  ;;  %s1709_s18 = smov [#allocation5]   ;;  %s1710_s20 = smov [#allocation3]  }
   0x3   :  { %s33_s19 = sshll.u32 %s1709_s18, 4  ;;  %s20_s21 = sshll.u32 %s1710_s20, 4  ;;  %s34_s19 = int_to_ptr.vmem [resolvable:$true] %s33_s19  ;;  %s1747_s21 = int_to_ptr.vmem [resolvable:$true] %s20_s21 }
   0x4   :  { %s1615_s24 = scalar_lea.hbm %s1848_s2, 64 }
   0x5   :  { %p1616_p0 = scmp.ne.s32.totalorder %s1848_s2, %s1615_s24  ;;  %p1619_p1 = scmp.lt.u32.totalorder %s1615_s24, %s1848_s2 }
   0x7   :  { %p1621_p2 = pnand %p1619_p1, %p1616_p0 }
   0x9   :  { %1624 = shalt.err (!%p1621_p2)
}
   0xa   :  { %s1625_s29 = scalar_lea.vmem %s34_s19, 64  ;;  %p1630_p4 = scmp.lt.s32.totalorder %s34_s19, %s34_s19 }
   0xb   :  { %p1626_p3 = scmp.ne.s32.totalorder %s34_s19, %s1625_s29  ;;  %p1631_p5 = scmp.lt.s32.totalorder %s1625_s29, %s1625_s29 }
   0xd   :  { %p1632_p6 = por %p1631_p5, %p1630_p4 }
   0xf   :  { %p1633_p7 = pnand %p1632_p6, %p1626_p3 }
  0x11   :  { %1636 = shalt.err (!%p1633_p7)
}
  0x12   :  { %36 = dma.hbm_to_vmem [thread:$0]  %s1848_s2, 64, %s34_s19, [#allocation6]  }
  0x13   :  { %s1637_s9 = scalar_lea.hbm %s1847_s1, 16384 }
  0x14   :  { %p1638_p8 = scmp.ne.s32.totalorder %s1847_s1, %s1637_s9  ;;  %p1641_p9 = scmp.lt.u32.totalorder %s1637_s9, %s1847_s1 }
  0x16   :  { %p1643_p10 = pnand %p1641_p9, %p1638_p8 }
  0x18   :  { %1646 = shalt.err (!%p1643_p10)
}
  0x19   :  { %s1647_s14 = scalar_lea.vmem %s1747_s21, 16384  ;;  %p1652_p12 = scmp.lt.s32.totalorder %s1747_s21, %s1747_s21 }
  0x1a   :  { %p1648_p11 = scmp.ne.s32.totalorder %s1747_s21, %s1647_s14  ;;  %p1653_p13 = scmp.lt.s32.totalorder %s1647_s14, %s1647_s14 }
  0x1c   :  { %p1654_p0 = por %p1653_p13, %p1652_p12 }
  0x1e   :  { %p1655_p1 = pnand %p1654_p0, %p1648_p11 }
  0x20   :  { %1658 = shalt.err (!%p1655_p1)
}
  0x21   :  { %s1711_s2 = smov 256   ;;  %s1712_s15 = smov 16  }
  0x22   :  { %26 = dma.hbm_to_vmem [thread:$0]  %s1847_s1, 16384, %s1747_s21, [#allocation4], %s1711_s2, %s1711_s2, %s1712_s15  }
  0x23   :  { %s1713_s18 = smov [#allocation7]   ;;  %s1714_s20 = smov [#allocation8]  }
  0x24   :  { %s43_s19 = sshll.u32 %s1713_s18, 4  ;;  %s53_s22 = sshll.u32 %s1714_s20, 4  ;;  %s44_s19 = int_to_ptr.vmem [resolvable:$true] %s43_s19  ;;  %s54_s22 = int_to_ptr.vmem [resolvable:$true] %s53_s22 }
  0x25   :  { %s1659_s25 = scalar_lea.hbm %s1849_s3, 64 }
  0x26   :  { %p1660_p2 = scmp.ne.s32.totalorder %s1849_s3, %s1659_s25  ;;  %p1663_p3 = scmp.lt.u32.totalorder %s1659_s25, %s1849_s3 }
  0x28   :  { %p1665_p4 = pnand %p1663_p3, %p1660_p2 }
  0x2a   :  { %1668 = shalt.err (!%p1665_p4)
}
  0x2b   :  { %s1669_s1 = scalar_lea.vmem %s44_s19, 64  ;;  %p1674_p6 = scmp.lt.s32.totalorder %s44_s19, %s44_s19 }
  0x2c   :  { %p1670_p5 = scmp.ne.s32.totalorder %s44_s19, %s1669_s1  ;;  %p1675_p7 = scmp.lt.s32.totalorder %s1669_s1, %s1669_s1 }
  0x2e   :  { %p1676_p8 = por %p1675_p7, %p1674_p6 }
  0x30   :  { %p1677_p9 = pnand %p1676_p8, %p1670_p5 }
  0x32   :  { %1680 = shalt.err (!%p1677_p9)
}
  0x33   :  { %46 = dma.hbm_to_vmem [thread:$0]  %s1849_s3, 64, %s44_s19, [#allocation6]  }
  0x34   :  { %s1681_s8 = scalar_lea.hbm %s1850_s4, 64 }
  0x35   :  { %p1682_p10 = scmp.ne.s32.totalorder %s1850_s4, %s1681_s8  ;;  %p1685_p11 = scmp.lt.u32.totalorder %s1681_s8, %s1850_s4 }
  0x37   :  { %p1687_p12 = pnand %p1685_p11, %p1682_p10 }
  0x39   :  { %1690 = shalt.err (!%p1687_p12)
}
  0x3a   :  { %s1691_s13 = scalar_lea.vmem %s54_s22, 64  ;;  %p1696_p0 = scmp.lt.s32.totalorder %s54_s22, %s54_s22 }
  0x3b   :  { %p1692_p13 = scmp.ne.s32.totalorder %s54_s22, %s1691_s13  ;;  %p1697_p1 = scmp.lt.s32.totalorder %s1691_s13, %s1691_s13 }
  0x3d   :  { %p1698_p2 = por %p1697_p1, %p1696_p0 }
  0x3f   :  { %p1699_p3 = pnand %p1698_p2, %p1692_p13 }
  0x41   :  { %1702 = shalt.err (!%p1699_p3)
}
  0x42   :  { %56 = dma.hbm_to_vmem [thread:$0]  %s1850_s4, 64, %s54_s22, [#allocation9]  }
  0x43   :  { %1703 = dma.done.wait [#allocation4], 16384  }
  0x44   :  { %1704 = vsyncadd [#allocation4], 4294950912 }
  0x45   :  { %1705 = dma.done.wait [#allocation6], 128  }
  0x46   :  { %1706 = vsyncadd [#allocation6], 4294967168 }
  0x47   :  { %1707 = dma.done.wait [#allocation9], 64  }
  0x48   :  { %1708 = vsyncadd [#allocation9], 4294967232  ;;  %v1418_v0 = vld [vmem:[#allocation3 + $0x4] ss:$16 sps:$4 sm:$0xff]   ;;  %v1420_v1 = vld [vmem:[#allocation3 + $0xc] ss:$16 sps:$4 sm:$0xff]   ;;  %v75_v36 = vlaneseq }
  0x49   :  { %906 = vmatprep.subr.bf16.mxu0 %v1418_v0  ;;  %v1422_v2 = vld [vmem:[#allocation3] ss:$16 sps:$4 sm:$0xff]   ;;  %v1423_v3 = vld [vmem:[#allocation3 + $0x8] ss:$16 sps:$4 sm:$0xff]   ;;  %988 = vmatprep.subr.bf16.mxu1 %v1420_v1  ;;  %v1424_v4 = vld [vmem:[#allocation3 + $0x24] ss:$16 sps:$4 sm:$0xff]  }
  0x4a   :  { %907 = vmatpush1.bf16.msra.mxu0 %v1422_v2  ;;  %989 = vmatpush1.bf16.msra.mxu1 %v1423_v3  ;;  %v1426_v5 = vld [vmem:[#allocation3 + $0x2c] ss:$16 sps:$4 sm:$0xff]   ;;  %v1428_v6 = vld [vmem:[#allocation3 + $0x20] ss:$16 sps:$4 sm:$0xff]   ;;  %v1429_v7 = vld [vmem:[#allocation3 + $0x28] ss:$16 sps:$4 sm:$0xff]  }
  0x4b   :  { %908 = vmatprep.subr.bf16.mxu0 %v1424_v4  ;;  %990 = vmatprep.subr.bf16.mxu1 %v1426_v5  ;;  %v1430_v8 = vld [vmem:[#allocation3 + $0x44] ss:$16 sps:$4 sm:$0xff]   ;;  %v1432_v9 = vld [vmem:[#allocation3 + $0x4c] ss:$16 sps:$4 sm:$0xff]   ;;  %v1434_v10 = vld [vmem:[#allocation3 + $0x40] ss:$16 sps:$4 sm:$0xff]  }
  0x4c   :  { %v1435_v11 = vld [vmem:[#allocation3 + $0x48] ss:$16 sps:$4 sm:$0xff]   ;;  %v1436_v12 = vld [vmem:[#allocation3 + $0x64] ss:$16 sps:$4 sm:$0xff]   ;;  %v1438_v13 = vld [vmem:[#allocation3 + $0x6c] ss:$16 sps:$4 sm:$0xff]  }
  0x4d   :  { %v1440_v14 = vld [vmem:[#allocation3 + $0x60] ss:$16 sps:$4 sm:$0xff]   ;;  %v1441_v15 = vld [vmem:[#allocation3 + $0x68] ss:$16 sps:$4 sm:$0xff]   ;;  %v1442_v16 = vld [vmem:[#allocation3 + $0x84] ss:$16 sps:$4 sm:$0xff]  }
  0x4e   :  { %909 = vmatpush1.bf16.msra.mxu0 %v1428_v6  ;;  %991 = vmatpush1.bf16.msra.mxu1 %v1429_v7  ;;  %v1444_v17 = vld [vmem:[#allocation3 + $0x8c] ss:$16 sps:$4 sm:$0xff]   ;;  %v1446_v18 = vld [vmem:[#allocation3 + $0x80] ss:$16 sps:$4 sm:$0xff]   ;;  %v1447_v19 = vld [vmem:[#allocation3 + $0x88] ss:$16 sps:$4 sm:$0xff]  }
  0x4f   :  { %910 = vmatprep.subr.bf16.mxu0 %v1430_v8  ;;  %992 = vmatprep.subr.bf16.mxu1 %v1432_v9  ;;  %v1448_v20 = vld [vmem:[#allocation3 + $0xa4] ss:$16 sps:$4 sm:$0xff]   ;;  %v1450_v21 = vld [vmem:[#allocation3 + $0xac] ss:$16 sps:$4 sm:$0xff]   ;;  %v1452_v22 = vld [vmem:[#allocation3 + $0xa0] ss:$16 sps:$4 sm:$0xff]  }
  0x50   :  { %v1453_v23 = vld [vmem:[#allocation3 + $0xa8] ss:$16 sps:$4 sm:$0xff]   ;;  %v1454_v24 = vld [vmem:[#allocation3 + $0xc4] ss:$16 sps:$4 sm:$0xff]   ;;  %v1456_v25 = vld [vmem:[#allocation3 + $0xcc] ss:$16 sps:$4 sm:$0xff]  }
  0x51   :  { %v1458_v26 = vld [vmem:[#allocation3 + $0xc0] ss:$16 sps:$4 sm:$0xff]   ;;  %v1459_v27 = vld [vmem:[#allocation3 + $0xc8] ss:$16 sps:$4 sm:$0xff]   ;;  %v1460_v28 = vld [vmem:[#allocation3 + $0xe4] ss:$16 sps:$4 sm:$0xff]  }
  0x52   :  { %911 = vmatpush1.bf16.msra.mxu0 %v1434_v10  ;;  %993 = vmatpush1.bf16.msra.mxu1 %v1435_v11  ;;  %v1462_v29 = vld [vmem:[#allocation3 + $0xec] ss:$16 sps:$4 sm:$0xff]   ;;  %v1464_v30 = vld [vmem:[#allocation3 + $0xe0] ss:$16 sps:$4 sm:$0xff]   ;;  %v1465_v31 = vld [vmem:[#allocation3 + $0xe8] ss:$16 sps:$4 sm:$0xff]  }
  0x53   :  { %912 = vmatprep.subr.bf16.mxu0 %v1436_v12  ;;  %994 = vmatprep.subr.bf16.mxu1 %v1438_v13  ;;  %v1466_v32 = vld [vmem:[#allocation3 + $0x104] ss:$16 sps:$4 sm:$0xff]   ;;  %v1468_v33 = vld [vmem:[#allocation3 + $0x10c] ss:$16 sps:$4 sm:$0xff]   ;;  %v1470_v34 = vld [vmem:[#allocation3 + $0x100] ss:$16 sps:$4 sm:$0xff]  }
  0x54   :  { %v1471_v35 = vld [vmem:[#allocation3 + $0x108] ss:$16 sps:$4 sm:$0xff]   ;;  %v1715_v37 = vmov 1983009808   ;;  %v1472_v39 = vld [vmem:[#allocation3 + $0x124] ss:$16 sps:$4 sm:$0xff]  }
  0x55   :  { %v94_v38 = vunpack.c.l.s4 %v1715_v37  ;;  %v1474_v40 = vld [vmem:[#allocation3 + $0x12c] ss:$16 sps:$4 sm:$0xff]   ;;  %v1476_v41 = vld [vmem:[#allocation3 + $0x120] ss:$16 sps:$4 sm:$0xff]   ;;  %v1802_v42 = vshrl.u32 %v75_v36, 7  ;;  %vm1122_vm0 = vcmask 1041408  }
  0x56   :  { %913 = vmatpush1.bf16.msra.mxu0 %v1440_v14  ;;  %995 = vmatpush1.bf16.msra.mxu1 %v1441_v15  ;;  %v1477_v44 = vld [vmem:[#allocation3 + $0x128] ss:$16 sps:$4 sm:$0xff]   ;;  %v1478_v45 = vld [vmem:[#allocation3 + $0x144] ss:$16 sps:$4 sm:$0xff]   ;;  %v1480_v46 = vld [vmem:[#allocation3 + $0x14c] ss:$16 sps:$4 sm:$0xff]  }
  0x57   :  { %914 = vmatprep.subr.bf16.mxu0 %v1442_v16  ;;  %996 = vmatprep.subr.bf16.mxu1 %v1444_v17  ;;  %v95_v43 = vunpack.c.0.s8 %v94_v38  ;;  %v1482_v47 = vld [vmem:[#allocation3 + $0x140] ss:$16 sps:$4 sm:$0xff]   ;;  %v1483_v48 = vld [vmem:[#allocation3 + $0x148] ss:$16 sps:$4 sm:$0xff]   ;;  %v1484_v50 = vld [vmem:[#allocation3 + $0x164] ss:$16 sps:$4 sm:$0xff]  }
  0x58   :  { %v1486_v51 = vld [vmem:[#allocation3 + $0x16c] ss:$16 sps:$4 sm:$0xff]   ;;  %v110_v52 = vld [vmem:[%s1846_s0] sm:$0xff]  ;;  %v1489_v55 = vld [vmem:[#allocation3 + $0x168] ss:$16 sps:$4 sm:$0xff]  }
  0x59   :  { %v1805_v49 = vsub.s32 %v95_v43, %v1802_v42  ;;  %v1488_v53 = vld [vmem:[#allocation3 + $0x160] ss:$16 sps:$4 sm:$0xff]   ;;  %v1490_v56 = vld [vmem:[#allocation3 + $0x184] ss:$16 sps:$4 sm:$0xff]   ;;  %v1492_v57 = vld [vmem:[#allocation3 + $0x18c] ss:$16 sps:$4 sm:$0xff]   ;;  %v113_v4 = vcombine.high %v110_v52, %v110_v52 }
  0x5a   :  { %915 = vmatpush1.bf16.msra.mxu0 %v1446_v18  ;;  %997 = vmatpush1.bf16.msra.mxu1 %v1447_v19  ;;  %v1494_v59 = vld [vmem:[#allocation3 + $0x180] ss:$16 sps:$4 sm:$0xff]   ;;  %v1495_v61 = vld [vmem:[#allocation3 + $0x188] ss:$16 sps:$4 sm:$0xff]   ;;  %v1496_v62 = vld [vmem:[#allocation3 + $0x1a4] ss:$16 sps:$4 sm:$0xff]  }
  0x5b   :  { %916 = vmatprep.subr.bf16.mxu0 %v1448_v20  ;;  %998 = vmatprep.subr.bf16.mxu1 %v1450_v21  ;;  %v120_v54 = vrot.slane %v110_v52, %v1805_v49  ;;  %v1498_v63 = vld [vmem:[#allocation3 + $0x1ac] ss:$16 sps:$4 sm:$0xff]   ;;  %v1500_v0 = vld [vmem:[#allocation3 + $0x1a0] ss:$16 sps:$4 sm:$0xff]   ;;  %v1501_v1 = vld [vmem:[#allocation3 + $0x1a8] ss:$16 sps:$4 sm:$0xff]   ;;  %v1812_v9 = vrot.slane %v113_v4, %v1805_v49 }
  0x5c   :  { %v1502_v2 = vld [vmem:[#allocation3 + $0x1c4] ss:$16 sps:$4 sm:$0xff]   ;;  %v1504_v3 = vld [vmem:[#allocation3 + $0x1cc] ss:$16 sps:$4 sm:$0xff]   ;;  %v1506_v5 = vld [vmem:[#allocation3 + $0x1c0] ss:$16 sps:$4 sm:$0xff]  }
  0x5d   :  { %v128_v58 = vcombine.high %v120_v54, %v120_v54  ;;  %v1507_v6 = vld [vmem:[#allocation3 + $0x1c8] ss:$16 sps:$4 sm:$0xff]   ;;  %v1508_v7 = vld [vmem:[#allocation3 + $0x1e4] ss:$16 sps:$4 sm:$0xff]   ;;  %v1510_v8 = vld [vmem:[#allocation3 + $0x1ec] ss:$16 sps:$4 sm:$0xff]   ;;  %v129_v14 = vcombine.high %v1812_v9, %v1812_v9  ;;  %v134_v16 = vpack.c.bf16 %v120_v54, %v120_v54 }
  0x5e   :  { %917 = vmatpush1.bf16.msra.mxu0 %v1452_v22  ;;  %999 = vmatpush1.bf16.msra.mxu1 %v1453_v23  ;;  %v1512_v10 = vld [vmem:[#allocation3 + $0x1e0] ss:$16 sps:$4 sm:$0xff]   ;;  %v1513_v11 = vld [vmem:[#allocation3 + $0x1e8] ss:$16 sps:$4 sm:$0xff]   ;;  %v1517_v12 = vld [vmem:[#allocation3 + $0x204] ss:$16 sps:$4 sm:$0xff]  }
  0x5f   :  { %918 = vmatprep.subr.bf16.mxu0 %v1454_v24  ;;  %1000 = vmatprep.subr.bf16.mxu1 %v1456_v25  ;;  %v135_v60 = vpack.c.bf16 %v128_v58, %v128_v58  ;;  %v1520_v13 = vld [vmem:[#allocation3 + $0x20c] ss:$16 sps:$4 sm:$0xff]   ;;  %v1515_v15 = vld [vmem:[#allocation3 + $0x200] ss:$16 sps:$4 sm:$0xff]   ;;  %v1518_v17 = vld [vmem:[#allocation3 + $0x208] ss:$16 sps:$4 sm:$0xff]   ;;  %v137_v20 = vpack.c.bf16 %v129_v14, %v129_v14 }
  0x60   :  { %v1523_v18 = vld [vmem:[#allocation3 + $0x224] ss:$16 sps:$4 sm:$0xff]   ;;  %v1526_v19 = vld [vmem:[#allocation3 + $0x22c] ss:$16 sps:$4 sm:$0xff]   ;;  %v1521_v21 = vld [vmem:[#allocation3 + $0x220] ss:$16 sps:$4 sm:$0xff]  }
  0x61   :  { %938 = vmatprep.mubr.bf16.mxu0 %v135_v60  ;;  %1020 = vmatprep.mubr.bf16.mxu1 %v135_v60  ;;  %v1524_v22 = vld [vmem:[#allocation3 + $0x228] ss:$16 sps:$4 sm:$0xff]   ;;  %v1529_v23 = vld [vmem:[#allocation3 + $0x244] ss:$16 sps:$4 sm:$0xff]   ;;  %v1532_v24 = vld [vmem:[#allocation3 + $0x24c] ss:$16 sps:$4 sm:$0xff]  }
  0x62   :  { %919 = vmatpush1.bf16.msra.mxu0 %v1458_v26  ;;  %1001 = vmatpush1.bf16.msra.mxu1 %v1459_v27  ;;  %v1527_v25 = vld [vmem:[#allocation3 + $0x240] ss:$16 sps:$4 sm:$0xff]   ;;  %v1530_v26 = vld [vmem:[#allocation3 + $0x248] ss:$16 sps:$4 sm:$0xff]   ;;  %v1535_v27 = vld [vmem:[#allocation3 + $0x264] ss:$16 sps:$4 sm:$0xff]  }
  0x63   :  { %920 = vmatprep.subr.bf16.mxu0 %v1460_v28  ;;  %1002 = vmatprep.subr.bf16.mxu1 %v1462_v29  ;;  %v1538_v28 = vld [vmem:[#allocation3 + $0x26c] ss:$16 sps:$4 sm:$0xff]   ;;  %v1533_v29 = vld [vmem:[#allocation3 + $0x260] ss:$16 sps:$4 sm:$0xff]   ;;  %v1548_v38 = vld [vmem:[#allocation3 + $0x2a8] ss:$16 sps:$4 sm:$0xff]  }
  0x64   :  { %v1550_v36 = vld [vmem:[#allocation3 + $0x2ac] ss:$16 sps:$4 sm:$0xff]   ;;  %v1545_v37 = vld [vmem:[#allocation3 + $0x2a0] ss:$16 sps:$4 sm:$0xff]   ;;  %v1554_v43 = vld [vmem:[#allocation3 + $0x2c8] ss:$16 sps:$4 sm:$0xff]  }
  0x65   :  { %v1566_v52 = vld [vmem:[#allocation3 + $0x308] ss:$16 sps:$4 sm:$0xff]   ;;  %v1574_v54 = vld [vmem:[#allocation3 + $0x32c] ss:$16 sps:$4 sm:$0xff]   ;;  %v1607_v14 = vld [vmem:[#allocation3 + $0x3e4] ss:$16 sps:$4 sm:$0xff]  }
  0x66   :  { %921 = vmatpush1.bf16.msra.mxu0 %v1464_v30  ;;  %1003 = vmatpush1.bf16.msra.mxu1 %v1465_v31  ;;  %v1536_v30 = vld [vmem:[#allocation3 + $0x268] ss:$16 sps:$4 sm:$0xff]   ;;  %v1541_v31 = vld [vmem:[#allocation3 + $0x284] ss:$16 sps:$4 sm:$0xff]   ;;  %v1580_v58 = vld [vmem:[#allocation3 + $0x34c] ss:$16 sps:$4 sm:$0xff]  }
  0x67   :  { %922 = vmatprep.subr.bf16.mxu0 %v1466_v32  ;;  %1004 = vmatprep.subr.bf16.mxu1 %v1468_v33  ;;  %v1544_v32 = vld [vmem:[#allocation3 + $0x28c] ss:$16 sps:$4 sm:$0xff]   ;;  %v1539_v33 = vld [vmem:[#allocation3 + $0x280] ss:$16 sps:$4 sm:$0xff]   ;;  %v1578_v60 = vld [vmem:[#allocation3 + $0x348] ss:$16 sps:$4 sm:$0xff]  }
  0x68   :  { %v1590_v4 = vld [vmem:[#allocation3 + $0x388] ss:$16 sps:$4 sm:$0xff]  }
  0x6a   :  { %923 = vmatpush1.bf16.msra.mxu0 %v1470_v34  ;;  %1005 = vmatpush1.bf16.msra.mxu1 %v1471_v35  ;;  %v1542_v34 = vld [vmem:[#allocation3 + $0x288] ss:$16 sps:$4 sm:$0xff]   ;;  %v1547_v35 = vld [vmem:[#allocation3 + $0x2a4] ss:$16 sps:$4 sm:$0xff]  }
  0x6b   :  { %924 = vmatprep.subr.bf16.mxu0 %v1472_v39  ;;  %1006 = vmatprep.subr.bf16.mxu1 %v1474_v40  ;;  %v1553_v39 = vld [vmem:[#allocation3 + $0x2c4] ss:$16 sps:$4 sm:$0xff]   ;;  %v1556_v40 = vld [vmem:[#allocation3 + $0x2cc] ss:$16 sps:$4 sm:$0xff]  }
  0x6e   :  { %925 = vmatpush1.bf16.msra.mxu0 %v1476_v41  ;;  %1007 = vmatpush1.bf16.msra.mxu1 %v1477_v44  ;;  %v1551_v41 = vld [vmem:[#allocation3 + $0x2c0] ss:$16 sps:$4 sm:$0xff]   ;;  %v1559_v44 = vld [vmem:[#allocation3 + $0x2e4] ss:$16 sps:$4 sm:$0xff]  }
  0x6f   :  { %926 = vmatprep.subr.bf16.mxu0 %v1478_v45  ;;  %1008 = vmatprep.subr.bf16.mxu1 %v1480_v46  ;;  %v1562_v45 = vld [vmem:[#allocation3 + $0x2ec] ss:$16 sps:$4 sm:$0xff]   ;;  %v1557_v46 = vld [vmem:[#allocation3 + $0x2e0] ss:$16 sps:$4 sm:$0xff]  }
  0x72   :  { %927 = vmatpush1.bf16.msra.mxu0 %v1482_v47  ;;  %1009 = vmatpush1.bf16.msra.mxu1 %v1483_v48  ;;  %v1560_v47 = vld [vmem:[#allocation3 + $0x2e8] ss:$16 sps:$4 sm:$0xff]   ;;  %v1565_v48 = vld [vmem:[#allocation3 + $0x304] ss:$16 sps:$4 sm:$0xff]  }
  0x73   :  { %928 = vmatprep.subr.bf16.mxu0 %v1484_v50  ;;  %1010 = vmatprep.subr.bf16.mxu1 %v1486_v51  ;;  %v1568_v50 = vld [vmem:[#allocation3 + $0x30c] ss:$16 sps:$4 sm:$0xff]   ;;  %v1563_v51 = vld [vmem:[#allocation3 + $0x300] ss:$16 sps:$4 sm:$0xff]  }
  0x76   :  { %929 = vmatpush1.bf16.msra.mxu0 %v1488_v53  ;;  %1011 = vmatpush1.bf16.msra.mxu1 %v1489_v55  ;;  %v1571_v53 = vld [vmem:[#allocation3 + $0x324] ss:$16 sps:$4 sm:$0xff]   ;;  %v1569_v55 = vld [vmem:[#allocation3 + $0x320] ss:$16 sps:$4 sm:$0xff]  }
  0x77   :  { %930 = vmatprep.subr.bf16.mxu0 %v1490_v56  ;;  %1012 = vmatprep.subr.bf16.mxu1 %v1492_v57  ;;  %v1572_v56 = vld [vmem:[#allocation3 + $0x328] ss:$16 sps:$4 sm:$0xff]   ;;  %v1577_v57 = vld [vmem:[#allocation3 + $0x344] ss:$16 sps:$4 sm:$0xff]  }
  0x7a   :  { %931 = vmatpush1.bf16.msra.mxu0 %v1494_v59  ;;  %1013 = vmatpush1.bf16.msra.mxu1 %v1495_v61  ;;  %v1575_v59 = vld [vmem:[#allocation3 + $0x340] ss:$16 sps:$4 sm:$0xff]   ;;  %v1583_v61 = vld [vmem:[#allocation3 + $0x364] ss:$16 sps:$4 sm:$0xff]  }
  0x7b   :  { %932 = vmatprep.subr.bf16.mxu0 %v1496_v62  ;;  %1014 = vmatprep.subr.bf16.mxu1 %v1498_v63  ;;  %v1586_v62 = vld [vmem:[#allocation3 + $0x36c] ss:$16 sps:$4 sm:$0xff]   ;;  %v1581_v63 = vld [vmem:[#allocation3 + $0x360] ss:$16 sps:$4 sm:$0xff]  }
  0x7e   :  { %933 = vmatpush1.bf16.msra.mxu0 %v1500_v0  ;;  %1015 = vmatpush1.bf16.msra.mxu1 %v1501_v1  ;;  %v1584_v0 = vld [vmem:[#allocation3 + $0x368] ss:$16 sps:$4 sm:$0xff]   ;;  %v1589_v1 = vld [vmem:[#allocation3 + $0x384] ss:$16 sps:$4 sm:$0xff]  }
  0x7f   :  { %934 = vmatprep.subr.bf16.mxu0 %v1502_v2  ;;  %1016 = vmatprep.subr.bf16.mxu1 %v1504_v3  ;;  %v1592_v2 = vld [vmem:[#allocation3 + $0x38c] ss:$16 sps:$4 sm:$0xff]   ;;  %v1587_v3 = vld [vmem:[#allocation3 + $0x380] ss:$16 sps:$4 sm:$0xff]  }
  0x82   :  { %935 = vmatpush1.bf16.msra.mxu0 %v1506_v5  ;;  %1017 = vmatpush1.bf16.msra.mxu1 %v1507_v6  ;;  %v1595_v5 = vld [vmem:[#allocation3 + $0x3a4] ss:$16 sps:$4 sm:$0xff]   ;;  %v1598_v6 = vld [vmem:[#allocation3 + $0x3ac] ss:$16 sps:$4 sm:$0xff]  }
  0x83   :  { %936 = vmatprep.subr.bf16.mxu0 %v1508_v7  ;;  %1018 = vmatprep.subr.bf16.mxu1 %v1510_v8  ;;  %v1593_v7 = vld [vmem:[#allocation3 + $0x3a0] ss:$16 sps:$4 sm:$0xff]   ;;  %v1596_v8 = vld [vmem:[#allocation3 + $0x3a8] ss:$16 sps:$4 sm:$0xff]  }
  0x86   :  { %937 = vmatpush1.bf16.msra.mxu0 %v1512_v10  ;;  %1019 = vmatpush1.bf16.msra.mxu1 %v1513_v11  ;;  %v1601_v10 = vld [vmem:[#allocation3 + $0x3c4] ss:$16 sps:$4 sm:$0xff]   ;;  %v1604_v11 = vld [vmem:[#allocation3 + $0x3cc] ss:$16 sps:$4 sm:$0xff]  }
  0x87   :  { %947 = vmatprep.subr.bf16.mxu0 %v1517_v12  ;;  %1029 = vmatprep.subr.bf16.mxu1 %v1520_v13  ;;  %v1599_v12 = vld [vmem:[#allocation3 + $0x3c0] ss:$16 sps:$4 sm:$0xff]   ;;  %v1602_v13 = vld [vmem:[#allocation3 + $0x3c8] ss:$16 sps:$4 sm:$0xff]  }
  0x89   :  { %939 = vmatmul.mubr.bf16.vlgmr.msra.gmra.mrb[0].mxu0 %v134_v16  ;;  %1021 = vmatmul.mubr.bf16.vlgmr.msra.gmra.mrb[0].mxu1 %v134_v16  ;;  %v1605_v16 = vld [vmem:[#allocation3 + $0x3e0] ss:$16 sps:$4 sm:$0xff]  }
  0x8a   :  { %948 = vmatpush1.bf16.msra.mxu0 %v1515_v15  ;;  %1030 = vmatpush1.bf16.msra.mxu1 %v1518_v17  ;;  %v1610_v15 = vld [vmem:[#allocation3 + $0x3ec] ss:$16 sps:$4 sm:$0xff]   ;;  %v1608_v17 = vld [vmem:[#allocation3 + $0x3e8] ss:$16 sps:$4 sm:$0xff]  }
  0x8b   :  { %949 = vmatprep.subr.bf16.mxu0 %v1523_v18  ;;  %1031 = vmatprep.subr.bf16.mxu1 %v1526_v19  ;;  %v136_v18 = vpack.c.bf16 %v1812_v9, %v1812_v9  ;;  %v77_v19 = vsub.s32 0, %v1802_v42 }
  0x8c   :  { %979 = vmatprep.mubr.bf16.mxu0 %v137_v20  ;;  %1061 = vmatprep.mubr.bf16.mxu1 %v137_v20  ;;  %v81_v20 = vsub.s32 1, %v1802_v42 }
  0x8e   :  { %950 = vmatpush1.bf16.msra.mxu0 %v1521_v21  ;;  %1032 = vmatpush1.bf16.msra.mxu1 %v1524_v22  ;;  %v85_v21 = vsub.s32 2, %v1802_v42  ;;  %v89_v22 = vsub.s32 3, %v1802_v42 }
  0x8f   :  { %951 = vmatprep.subr.bf16.mxu0 %v1529_v23  ;;  %1033 = vmatprep.subr.bf16.mxu1 %v1532_v24  ;;  %v73_v23 = vld [vmem:[#allocation5] sm:$0xf] }
  0x90   :  { %v78_v24 = vrot.slane %v73_v23, %v77_v19 }
  0x92   :  { %952 = vmatpush1.bf16.msra.mxu0 %v1527_v25  ;;  %1034 = vmatpush1.bf16.msra.mxu1 %v1530_v26  ;;  %v82_v25 = vrot.slane %v73_v23, %v81_v20  ;;  %v86_v26 = vrot.slane %v73_v23, %v85_v21 }
  0x93   :  { %953 = vmatprep.subr.bf16.mxu0 %v1535_v27  ;;  %1035 = vmatprep.subr.bf16.mxu1 %v1538_v28  ;;  %v90_v27 = vrot.slane %v73_v23, %v89_v22 }
  0x94   :  { %v91_v28 = vcombine.low %v78_v24, %v82_v25 }
  0x96   :  { %954 = vmatpush1.bf16.msra.mxu0 %v1533_v29  ;;  %1036 = vmatpush1.bf16.msra.mxu1 %v1536_v30  ;;  %v92_v29 = vcombine.low %v86_v26, %v90_v27 }
  0x97   :  { %955 = vmatprep.subr.bf16.mxu0 %v1541_v31  ;;  %1037 = vmatprep.subr.bf16.mxu1 %v1544_v32  ;;  %v99_v31 = vrot.slane %v91_v28, %v1805_v49 }
  0x98   :  { %v106_v32 = vrot.slane %v92_v29, %v1805_v49 }
  0x9a   :  { %956 = vmatpush1.bf16.msra.mxu0 %v1539_v33  ;;  %1038 = vmatpush1.bf16.msra.mxu1 %v1542_v34 }
  0x9b   :  { %957 = vmatprep.subr.bf16.mxu0 %v1547_v35  ;;  %1039 = vmatprep.subr.bf16.mxu1 %v1550_v36 }
  0x9e   :  { %958 = vmatpush1.bf16.msra.mxu0 %v1545_v37  ;;  %1040 = vmatpush1.bf16.msra.mxu1 %v1548_v38 }
  0x9f   :  { %959 = vmatprep.subr.bf16.mxu0 %v1553_v39  ;;  %1041 = vmatprep.subr.bf16.mxu1 %v1556_v40 }
  0xa2   :  { %960 = vmatpush1.bf16.msra.mxu0 %v1551_v41  ;;  %1042 = vmatpush1.bf16.msra.mxu1 %v1554_v43  ;;  %v107_v43 = vcombine.low %v99_v31, %v106_v32 }
  0xa3   :  { %961 = vmatprep.subr.bf16.mxu0 %v1559_v44  ;;  %1043 = vmatprep.subr.bf16.mxu1 %v1562_v45 }
  0xa6   :  { %962 = vmatpush1.bf16.msra.mxu0 %v1557_v46  ;;  %1044 = vmatpush1.bf16.msra.mxu1 %v1560_v47 }
  0xa7   :  { %963 = vmatprep.subr.bf16.mxu0 %v1565_v48  ;;  %1045 = vmatprep.subr.bf16.mxu1 %v1568_v50 }
  0xaa   :  { %964 = vmatpush1.bf16.msra.mxu0 %v1563_v51  ;;  %1046 = vmatpush1.bf16.msra.mxu1 %v1566_v52 }
  0xab   :  { %965 = vmatprep.subr.bf16.mxu0 %v1571_v53  ;;  %1047 = vmatprep.subr.bf16.mxu1 %v1574_v54 }
  0xae   :  { %966 = vmatpush1.bf16.msra.mxu0 %v1569_v55  ;;  %1048 = vmatpush1.bf16.msra.mxu1 %v1572_v56 }
  0xaf   :  { %967 = vmatprep.subr.bf16.mxu0 %v1577_v57  ;;  %1049 = vmatprep.subr.bf16.mxu1 %v1580_v58 }
  0xb2   :  { %968 = vmatpush1.bf16.msra.mxu0 %v1575_v59  ;;  %1050 = vmatpush1.bf16.msra.mxu1 %v1578_v60  ;;  %v1098_v60 = vld [vmem:[#allocation7] sm:$0xf] }
  0xb3   :  { %969 = vmatprep.subr.bf16.mxu0 %v1583_v61  ;;  %1051 = vmatprep.subr.bf16.mxu1 %v1586_v62  ;;  %v1099_v61 = vld [vmem:[#allocation8] sm:$0xf]  ;;  %v1193_v62 = vrot.slane %v1098_v60, %v77_v19 }
  0xb6   :  { %970 = vmatpush1.bf16.msra.mxu0 %v1581_v63  ;;  %1052 = vmatpush1.bf16.msra.mxu1 %v1584_v0  ;;  %v1197_v63 = vrot.slane %v1098_v60, %v81_v20  ;;  %v1201_v0 = vrot.slane %v1098_v60, %v85_v21 }
  0xb7   :  { %971 = vmatprep.subr.bf16.mxu0 %v1589_v1  ;;  %1053 = vmatprep.subr.bf16.mxu1 %v1592_v2  ;;  %v1205_v1 = vrot.slane %v1098_v60, %v89_v22  ;;  %v1229_v2 = vrot.slane %v1099_v61, %v77_v19 }
  0xba   :  { %972 = vmatpush1.bf16.msra.mxu0 %v1587_v3  ;;  %1054 = vmatpush1.bf16.msra.mxu1 %v1590_v4  ;;  %v1233_v3 = vrot.slane %v1099_v61, %v81_v20  ;;  %v1237_v4 = vrot.slane %v1099_v61, %v85_v21 }
  0xbb   :  { %973 = vmatprep.subr.bf16.mxu0 %v1595_v5  ;;  %1055 = vmatprep.subr.bf16.mxu1 %v1598_v6  ;;  %v1241_v5 = vrot.slane %v1099_v61, %v89_v22  ;;  %v1206_v6 = vcombine.low %v1193_v62, %v1197_v63 }
  0xbe   :  { %974 = vmatpush1.bf16.msra.mxu0 %v1593_v7  ;;  %1056 = vmatpush1.bf16.msra.mxu1 %v1596_v8  ;;  %v1207_v7 = vcombine.low %v1201_v0, %v1205_v1  ;;  %v1242_v8 = vcombine.low %v1229_v2, %v1233_v3 }
  0xbf   :  { %975 = vmatprep.subr.bf16.mxu0 %v1601_v10  ;;  %1057 = vmatprep.subr.bf16.mxu1 %v1604_v11  ;;  %v1243_v10 = vcombine.low %v1237_v4, %v1241_v5  ;;  %v1214_v11 = vrot.slane %v1206_v6, %v1805_v49 }
  0xc2   :  { %976 = vmatpush1.bf16.msra.mxu0 %v1599_v12  ;;  %1058 = vmatpush1.bf16.msra.mxu1 %v1602_v13  ;;  %v1221_v12 = vrot.slane %v1207_v7, %v1805_v49  ;;  %v1250_v13 = vrot.slane %v1242_v8, %v1805_v49 }
  0xc3   :  { %977 = vmatprep.subr.bf16.mxu0 %v1607_v14  ;;  %1059 = vmatprep.subr.bf16.mxu1 %v1610_v15  ;;  %v1257_v14 = vrot.slane %v1243_v10, %v1805_v49 }
  0xc4   :  { %v1222_v15 = vcombine.low %v1214_v11, %v1221_v12 }
  0xc6   :  { %978 = vmatpush1.bf16.msra.mxu0 %v1605_v16  ;;  %1060 = vmatpush1.bf16.msra.mxu1 %v1608_v17  ;;  %v1258_v16 = vcombine.low %v1250_v13, %v1257_v14  ;;  %v1716_v17 = vmov 269488144  }
  0xc9   :  { %980 = vmatmul.mubr.bf16.vlgmr.msra.gmra.mrb[0].mxu0 %v136_v18  ;;  %1062 = vmatmul.mubr.bf16.vlgmr.msra.gmra.mrb[0].mxu1 %v136_v18  ;;  %v1136_v18 = vunpack.c.l.s4 %v1716_v17 }
  0xcb   :  { %v1137_v19 = vunpack.c.0.s8 %v1136_v18 }
  0xcd   :  { %v1140_v20 = vsub.s32 %v1137_v19, %v1802_v42 }
 0x19c   :  { %v981_v9 = vpop.f32.mrb[0].mxu0  ;;  %v1063_v30 = vpop.f32.mrb[0].mxu1 }
 0x19d   :  { %v983_v33 = vpop.f32.mrb[1].mxu0  ;;  %v1065_v34 = vpop.f32.mrb[1].mxu1 }
 0x19e   :  { %v1074_v35 = vcombine.low %v981_v9, %v983_v33  ;;  %v1075_v36 = vcombine.low %v1063_v30, %v1065_v34  ;;  %v985_v37 = vpop.f32.mrb[2].mxu0  ;;  %v1067_v38 = vpop.f32.mrb[2].mxu1 }
 0x19f   :  { %v986_v39 = vpop.f32.mrb[3].mxu0  ;;  %v1068_v40 = vpop.f32.mrb[3].mxu1 }
 0x1a0   :  { %v1082_v41 = vrot.slane %v1074_v35, %v1805_v49  ;;  %v1089_v44 = vrot.slane %v1075_v36, %v1805_v49 }
 0x1a2   :  { %v1090_v45 = vcombine.low %v1082_v41, %v1089_v44 }
 0x1a4   :  { %v1092_v46 = vadd.f32 %v1090_v45, %v107_v43 }
 0x1a6   :  { %v1101_v47 = vcombine.high %v1092_v46, %v1092_v46  ;;  %v1108_v48 = vrot.slane %v1092_v46, %v1805_v49 }
 0x1a8   :  { %v1115_v50 = vrot.slane %v1101_v47, %v1805_v49  ;;  %v1116_v51 = vcombine.high %v1108_v48, %v1108_v48  ;;  %v1123_v53 = vsel %vm1122_vm0, %v1108_v48, 0.0 }
 0x1aa   :  { %v1117_v52 = vcombine.high %v1115_v50, %v1115_v50  ;;  %v1124_v54 = vsel %vm1122_vm0, %v1116_v51, 0.0  ;;  %v1126_v56 = vsel %vm1122_vm0, %v1115_v50, 0.0 }
 0x1ab   :  { %v1125_v55 = vadd.f32 %v1124_v54, %v1123_v53 }
 0x1ac   :  { %v1128_v58 = vsel %vm1122_vm0, %v1117_v52, 0.0 }
 0x1ad   :  { %v1127_v57 = vadd.f32 %v1126_v56, %v1125_v55 }
 0x1af   :  { %v1129_v59 = vadd.f32 %v1128_v58, %v1127_v57 }
 0x1b1   :  { %1130 = vadd.xlane.f32.xlu0 %v1129_v59 }
 0x23e   :  { %v1131_v21 = vpop.xlane.xlu0 %1130 }
 0x23f   :  { %v1133_v22 = vmul.f32 0.001953125, %v1131_v21 }
 0x241   :  { %v1141_v23 = vrot.slane %v1133_v22, %v1140_v20 }
 0x243   :  { %v1143_v24 = vsub.f32 %v1092_v46, %v1141_v23 }
 0x245   :  { %v1144_v25 = vmul.f32 %v1143_v24, %v1143_v24 }
 0x247   :  { %v1146_v26 = vcombine.high %v1144_v25, %v1144_v25  ;;  %v1153_v27 = vrot.slane %v1144_v25, %v1805_v49 }
 0x249   :  { %v1160_v28 = vrot.slane %v1146_v26, %v1805_v49  ;;  %v1161_v29 = vcombine.high %v1153_v27, %v1153_v27  ;;  %v1167_v30 = vsel %vm1122_vm0, %v1153_v27, 0.0 }
 0x24b   :  { %v1162_v9 = vcombine.high %v1160_v28, %v1160_v28  ;;  %v1168_v31 = vsel %vm1122_vm0, %v1161_v29, 0.0  ;;  %v1170_v33 = vsel %vm1122_vm0, %v1160_v28, 0.0 }
 0x24c   :  { %v1169_v32 = vadd.f32 %v1168_v31, %v1167_v30 }
 0x24d   :  { %v1172_v34 = vsel %vm1122_vm0, %v1162_v9, 0.0 }
 0x24e   :  { %v1171_v42 = vadd.f32 %v1170_v33, %v1169_v32 }
 0x250   :  { %v1173_v35 = vadd.f32 %v1172_v34, %v1171_v42 }
 0x252   :  { %1174 = vadd.xlane.f32.xlu0 %v1173_v35 }
 0x2df   :  { %v1175_v36 = vpop.xlane.xlu0 %1174 }
 0x2e0   :  { %v1176_v37 = vmul.f32 0.001953125, %v1175_v36 }
 0x2e2   :  { %v1177_v38 = vadd.f32 1e-05, %v1176_v37 }
 0x2e4   :  { %1611 = vrsqrt.f32 %v1177_v38 }
 0x2ee   :  { %v1612_v39 = vpop.eup %1611 }
 0x2ef   :  { %v1186_v49 = vrot.slane %v1612_v39, %v1140_v20 }
 0x2f1   :  { %v1188_v40 = vmul.f32 %v1186_v49, %v1143_v24 }
 0x2f3   :  { %v1224_v41 = vmul.f32 %v1222_v15, %v1188_v40 }
 0x2f5   :  { %v1260_v43 = vadd.f32 %v1258_v16, %v1224_v41 }
 0x2f7   :  { %v1262_v44 = vmul.f32 0.70710677, %v1260_v43  ;;  %v1261_v46 = vmul.f32 0.5, %v1260_v43 }
 0x2f9   :  { %1613 = verf.f32 %v1262_v44 }
 0x303   :  { %v1614_v45 = vpop.eup %1613 }
 0x304   :  { %v1264_v47 = vadd.f32 1.0, %v1614_v45 }
 0x306   :  { %v1265_v48 = vmul.f32 %v1264_v47, %v1261_v46 }
 0x308   :  { %1266 = vst [vmem:[%s1851_s5] sm:$0xff] %v1265_v48 }
 0x309   :  { %1271 = vsyncpa [#allocation4], 1 }
 0x30a   :  { %1272 = vsyncpa [#allocation6], 1 }
 0x30b   :  { %1273 = vsyncpa [#allocation9], 1 }

// kernel: brain_mlp_forward.7
= control target key start
LH: loop header
LB: loop body
LE: loop exit
PB: predicated region body
PF: predicated region fallthrough
CT: control target
= control target key end

     0   :  { %10 = vsyncpa [#allocation4], 0  ;;  %s2467_s0 = inlined_call_operand.vmem [shape: f32[2,512], index: 0, kind: input, shape index: {}]   ;;  %s2468_s1 = inlined_call_operand.hbm [shape: bf16[4,512,512], index: 1, kind: input, shape index: {}]   ;;  %s2469_s2 = inlined_call_operand.vmem [shape: f32[4,1,512], index: 2, kind: input, shape index: {}]   ;;  %s2470_s3 = inlined_call_operand.vmem [shape: f32[4,1,512], index: 3, kind: input, shape index: {}]   ;;  %s2471_s4 = inlined_call_operand.vmem [shape: f32[4,1,512], index: 4, kind: input, shape index: {}]   ;;  %s2472_s5 = inlined_call_operand.vmem [shape: f32[2,512], index: 5, kind: output, shape index: {}]  }
   0x1   :  { %12 = vsyncpa [#allocation4 + $0x1], 0  ;;  %s2114_s18 = smov 0   ;;  %s2116_s19 = smov 0  }
   0x2   :  { %s2118_s20 = smov 0   ;;  %s2120_s21 = smov 0  }
   0x3   :  { %s2122_s22 = smov 0   ;;  %s2124_s23 = smov 0  }
   0x4 LB: > { %s1579_s24 = sadd.s32 4294967295, %s2078_s23   ;;  %s27_s25 = sadd.s32 1, %s2074_s22  ;;  %s2078_s23 = sphi %s2124_s23, %s18_s23   ;;  %s2074_s22 = sphi %s2122_s22, %s2480_s22   ;;  %s2070_s21 = sphi %s2120_s21, %s2479_s21   ;;  %s2066_s20 = sphi %s2118_s20, %s2478_s20   ;;  %s2062_s19 = sphi %s2116_s19, %s2477_s19   ;;  %s2058_s18 = sphi %s2114_s18, %s2476_s18  }
   0x5   : > { %p28_p0 = scmp.ge.s32.totalorder %s27_s25, 4  ;;  %s63_s26 = sadd.s32 1, %s2066_s20 }
   0x6   : > { %p70_p1 = scmp.ne.s32.totalorder %s2066_s20, %s2062_s19  ;;  %p71_p2 = scmp.eq.s32.totalorder %s2078_s23, 0 }
   0x7   : > { %s2482_s25 = smov (%p28_p0, %s27_s25), 0  ;;  %p76_p4 = scmp.ne.s32.totalorder %s2062_s19, %s2058_s18 }
   0x8   : > { %p2150_p3 = por %p71_p2, %p70_p1  ;;  %s60_s28 = ssub.s32 %s2074_s22, %s2482_s25 }
   0x9   : > { %p77_p5 = scmp.eq.s32.totalorder %s1579_s24, 0  ;;  %p61_p6 = scmp.eq.s32.totalorder %s60_s28, 0 }
   0xa   : > { %p1743_p8 = scmp.lt.s32.totalorder %s2078_s23, 4  ;;  %s212_s6 = sand.u32 1, %s2066_s20  }
   0xb   : > { %p2157_p7 = por %p77_p5, %p76_p4  ;;  %s1724_s7 = sshll.u32 %s2074_s22, 14 }
   0xc   : > { %s2163_s30 = scalar_select %p61_p6, %s2066_s20, %s63_s26  }
   0xd   : > { %s1583_s8 = sshll.u32 %s212_s6, 10  ;;  %s2170_s11 = scalar_lea.hbm %s2468_s1, %s1724_s7 }
   0xe   : > { %s216_s12 = scalar_lea.vmem [#allocation3], %s1583_s8  ;;  %p2174_p9 = pnand %p1743_p8, %p2150_p3 }
   0xf   : > { %s223_s13 = sshll.u32 %s216_s12, 4  ;;  %s2180_s15 = scalar_lea.sflag [#allocation4], %s212_s6  ;;  %s2178_s13 = int_to_ptr.vmem [resolvable:$true] %s223_s13 }
  0x10   : > { %s1998_s16 = scalar_lea.hbm %s2170_s11, 16384  ;;  %p2000_p11 = pneg %p2174_p9 }
  0x11   : > { %p1999_p10 = scmp.ne.s32.totalorder %s2170_s11, %s1998_s16  ;;  %s2003_s24 = scalar_lea.hbm %s2468_s1, 65536 }
  0x12   : > { %p2004_p0 = scmp.lt.u32.totalorder %s2170_s11, %s2468_s1  ;;  %p2005_p1 = scmp.lt.u32.totalorder %s2003_s24, %s1998_s16 }
  0x13   : > { %p2001_p12 = pnand %p2000_p11, %p1999_p10  ;;  %p2007_p3 = scmp.lt.u32.totalorder %s1998_s16, %s2170_s11 }
  0x14   : > { %p2006_p2 = por %p2005_p1, %p2004_p0 }
  0x15   : > { %p2002_p13 = pneg %p2001_p12 }
  0x16   : > { %p2008_p4 = por %p2007_p3, %p2006_p2 }
  0x18   : > { %p2009_p5 = pnand %p2008_p4, %p2002_p13 }
  0x1a   : > { %2012 = shalt.err (!%p2009_p5)
}
  0x1b   : > { %s2013_s28 = scalar_lea.vmem %s2178_s13, 16384  ;;  %s2080_s6 = smov [#allocation3]  }
  0x1c   : > { %p2014_p6 = scmp.ne.s32.totalorder %s2178_s13, %s2013_s28  ;;  %s2018_s7 = sshll.u32 %s2080_s6, 4  ;;  %s2019_s7 = int_to_ptr.vmem [resolvable:$false] %s2018_s7 }
  0x1d   : > { %s2020_s8 = scalar_lea.vmem %s2019_s7, 32768  ;;  %p2021_p12 = scmp.lt.s32.totalorder %s2178_s13, %s2019_s7 }
  0x1e   : > { %p2016_p8 = pnand %p2014_p6, %p2000_p11  ;;  %p2022_p0 = scmp.lt.s32.totalorder %s2020_s8, %s2013_s28 }
  0x20   : > { %p2017_p10 = pneg %p2016_p8  ;;  %p2023_p1 = por %p2022_p0, %p2021_p12 }
  0x22   : > { %p2024_p2 = pnand %p2023_p1, %p2017_p10 }
  0x24   : > { %2027 = shalt.err (!%p2024_p2)
}
  0x25   : > { %s2081_s9 = smov 256   ;;  %s2082_s10 = smov 16  }
  0x26   : > { %1742 = dma.hbm_to_vmem [thread:$0]  (!%p2174_p9), %s2170_s11, 16384, %s2178_s13, %s2180_s15, %s2081_s9, %s2081_s9, %s2082_s10  }
  0x27   : > { %p1586_p11 = scmp.ge.s32.totalorder %s2078_s23, 1  ;;  %p252_p13 = scmp.lt.s32.totalorder %s2078_s23, 5 }
  0x29   : > { %p253_p3 = pnand %p1586_p11, %p252_p13 }
  0x2a   : > { %s258_s12 = sand.u32 (!%p253_p3), 1, %s2062_s19  }
  0x2b   : > { %256 = sbr.rel (%p253_p3) target bundleno = 767 (0x2ff), region = 40  ;;  %s1587_s16 = sshll.u32 (!%p253_p3), %s258_s12, 10 }
  0x2c   : > { %s259_s17 = scalar_lea.sflag (!%p253_p3), [#allocation4], %s258_s12  ;;  %s2211_s18 = scalar_lea.vmem (!%p253_p3), [#allocation3], %s1587_s16 }
  0x32   : > { %2053 = dma.done.wait (%p2157_p7), %s259_s17, 16384  }
  0x33   : > { %2055 = vsyncadd (%p2157_p7), %s259_s17, 4294950912  ;;  %p311_p4 = scmp.lt.s32.totalorder %s2070_s21, 3  ;;  %p1591_p7 = scmp.ne.s32.totalorder %s2070_s21, 0 }
  0x34   : > { %v332_v0 = vld [vmem:[%s2467_s0] sm:$0xff] (!%p1591_p7) }
  0x35   : > { %s312_s11 = scalar_select %p311_p4, %s2070_s21, 3 }
  0x36   : > { %331 = sbr.rel (%p1591_p7) target bundleno = 61 (0x3d), region = 48  ;;  %333 = vst [vmem:[#allocation2] sm:$0xff] (!%p1591_p7), %v332_v0 }
  0x37   : > { %s2219_s13 = sshll.u32 %s312_s11, 2 }
  0x38   : > { %s314_s24 = scalar_lea.vmem %s2469_s2, %s2219_s13  ;;  %s318_s28 = scalar_lea.vmem %s2470_s3, %s2219_s13 }
  0x39   : > { %s322_s7 = scalar_lea.vmem %s2471_s4, %s2219_s13 }
  0x3d PF: > { %v1795_v1 = vld [vmem:[%s2211_s18 + $0x4] ss:$16 sps:$4 sm:$0xff]   ;;  %v1797_v2 = vld [vmem:[%s2211_s18 + $0xc] ss:$16 sps:$4 sm:$0xff]   ;;  %v1799_v3 = vld [vmem:[%s2211_s18] ss:$16 sps:$4 sm:$0xff]   ;;  %v340_v39 = vlaneseq }
  0x3e   : > { %1151 = vmatprep.subr.bf16.mxu0 %v1795_v1  ;;  %v1800_v4 = vld [vmem:[%s2211_s18 + $0x8] ss:$16 sps:$4 sm:$0xff]   ;;  %1233 = vmatprep.subr.bf16.mxu1 %v1797_v2  ;;  %v1801_v5 = vld [vmem:[%s2211_s18 + $0x24] ss:$16 sps:$4 sm:$0xff]   ;;  %v1803_v6 = vld [vmem:[%s2211_s18 + $0x2c] ss:$16 sps:$4 sm:$0xff]  }
  0x3f   : > { %1152 = vmatpush1.bf16.msra.mxu0 %v1799_v3  ;;  %1234 = vmatpush1.bf16.msra.mxu1 %v1800_v4  ;;  %v1805_v7 = vld [vmem:[%s2211_s18 + $0x20] ss:$16 sps:$4 sm:$0xff]   ;;  %v1806_v8 = vld [vmem:[%s2211_s18 + $0x28] ss:$16 sps:$4 sm:$0xff]   ;;  %v1807_v9 = vld [vmem:[%s2211_s18 + $0x44] ss:$16 sps:$4 sm:$0xff]  }
  0x40   : > { %1153 = vmatprep.subr.bf16.mxu0 %v1801_v5  ;;  %1235 = vmatprep.subr.bf16.mxu1 %v1803_v6  ;;  %v1809_v10 = vld [vmem:[%s2211_s18 + $0x4c] ss:$16 sps:$4 sm:$0xff]   ;;  %v1811_v11 = vld [vmem:[%s2211_s18 + $0x40] ss:$16 sps:$4 sm:$0xff]   ;;  %v1812_v12 = vld [vmem:[%s2211_s18 + $0x48] ss:$16 sps:$4 sm:$0xff]  }
  0x41   : > { %v1813_v13 = vld [vmem:[%s2211_s18 + $0x64] ss:$16 sps:$4 sm:$0xff]   ;;  %v1815_v14 = vld [vmem:[%s2211_s18 + $0x6c] ss:$16 sps:$4 sm:$0xff]   ;;  %v1817_v15 = vld [vmem:[%s2211_s18 + $0x60] ss:$16 sps:$4 sm:$0xff]  }
  0x42   : > { %v1818_v16 = vld [vmem:[%s2211_s18 + $0x68] ss:$16 sps:$4 sm:$0xff]   ;;  %v1819_v17 = vld [vmem:[%s2211_s18 + $0x84] ss:$16 sps:$4 sm:$0xff]   ;;  %v1821_v18 = vld [vmem:[%s2211_s18 + $0x8c] ss:$16 sps:$4 sm:$0xff]  }
  0x43   : > { %1154 = vmatpush1.bf16.msra.mxu0 %v1805_v7  ;;  %1236 = vmatpush1.bf16.msra.mxu1 %v1806_v8  ;;  %v1823_v19 = vld [vmem:[%s2211_s18 + $0x80] ss:$16 sps:$4 sm:$0xff]   ;;  %v1824_v20 = vld [vmem:[%s2211_s18 + $0x88] ss:$16 sps:$4 sm:$0xff]   ;;  %v1825_v21 = vld [vmem:[%s2211_s18 + $0xa4] ss:$16 sps:$4 sm:$0xff]  }
  0x44   : > { %1155 = vmatprep.subr.bf16.mxu0 %v1807_v9  ;;  %1237 = vmatprep.subr.bf16.mxu1 %v1809_v10  ;;  %v1827_v22 = vld [vmem:[%s2211_s18 + $0xac] ss:$16 sps:$4 sm:$0xff]   ;;  %v1829_v23 = vld [vmem:[%s2211_s18 + $0xa0] ss:$16 sps:$4 sm:$0xff]   ;;  %v1830_v24 = vld [vmem:[%s2211_s18 + $0xa8] ss:$16 sps:$4 sm:$0xff]  }
  0x45   : > { %v1831_v25 = vld [vmem:[%s2211_s18 + $0xc4] ss:$16 sps:$4 sm:$0xff]   ;;  %v1833_v26 = vld [vmem:[%s2211_s18 + $0xcc] ss:$16 sps:$4 sm:$0xff]   ;;  %v1835_v27 = vld [vmem:[%s2211_s18 + $0xc0] ss:$16 sps:$4 sm:$0xff]  }
  0x46   : > { %v1836_v28 = vld [vmem:[%s2211_s18 + $0xc8] ss:$16 sps:$4 sm:$0xff]   ;;  %v1837_v29 = vld [vmem:[%s2211_s18 + $0xe4] ss:$16 sps:$4 sm:$0xff]   ;;  %v1839_v30 = vld [vmem:[%s2211_s18 + $0xec] ss:$16 sps:$4 sm:$0xff]  }
  0x47   : > { %1156 = vmatpush1.bf16.msra.mxu0 %v1811_v11  ;;  %1238 = vmatpush1.bf16.msra.mxu1 %v1812_v12  ;;  %v1841_v31 = vld [vmem:[%s2211_s18 + $0xe0] ss:$16 sps:$4 sm:$0xff]   ;;  %v1842_v32 = vld [vmem:[%s2211_s18 + $0xe8] ss:$16 sps:$4 sm:$0xff]   ;;  %v1843_v33 = vld [vmem:[%s2211_s18 + $0x104] ss:$16 sps:$4 sm:$0xff]  }
  0x48   : > { %1157 = vmatprep.subr.bf16.mxu0 %v1813_v13  ;;  %1239 = vmatprep.subr.bf16.mxu1 %v1815_v14  ;;  %v1845_v34 = vld [vmem:[%s2211_s18 + $0x10c] ss:$16 sps:$4 sm:$0xff]   ;;  %v1847_v35 = vld [vmem:[%s2211_s18 + $0x100] ss:$16 sps:$4 sm:$0xff]   ;;  %v1848_v36 = vld [vmem:[%s2211_s18 + $0x108] ss:$16 sps:$4 sm:$0xff]  }
  0x49   : > { %v2083_v37 = vmov 1983009808   ;;  %v1849_v40 = vld [vmem:[%s2211_s18 + $0x124] ss:$16 sps:$4 sm:$0xff]   ;;  %v1851_v41 = vld [vmem:[%s2211_s18 + $0x12c] ss:$16 sps:$4 sm:$0xff]  }
  0x4a   : > { %v338_v38 = vunpack.c.l.s4 %v2083_v37  ;;  %v1853_v42 = vld [vmem:[%s2211_s18 + $0x120] ss:$16 sps:$4 sm:$0xff]   ;;  %v2276_v44 = vshrl.u32 %v340_v39, 7  ;;  %v1854_v45 = vld [vmem:[%s2211_s18 + $0x128] ss:$16 sps:$4 sm:$0xff]   ;;  %vm1317_vm0 = vcmask 1041408  }
  0x4b   : > { %1158 = vmatpush1.bf16.msra.mxu0 %v1817_v15  ;;  %1240 = vmatpush1.bf16.msra.mxu1 %v1818_v16  ;;  %v1855_v46 = vld [vmem:[%s2211_s18 + $0x144] ss:$16 sps:$4 sm:$0xff]   ;;  %v1857_v47 = vld [vmem:[%s2211_s18 + $0x14c] ss:$16 sps:$4 sm:$0xff]   ;;  %v1859_v48 = vld [vmem:[%s2211_s18 + $0x140] ss:$16 sps:$4 sm:$0xff]  }
  0x4c   : > { %1159 = vmatprep.subr.bf16.mxu0 %v1819_v17  ;;  %1241 = vmatprep.subr.bf16.mxu1 %v1821_v18  ;;  %v339_v43 = vunpack.c.0.s8 %v338_v38  ;;  %v1860_v49 = vld [vmem:[%s2211_s18 + $0x148] ss:$16 sps:$4 sm:$0xff]   ;;  %v1861_v51 = vld [vmem:[%s2211_s18 + $0x164] ss:$16 sps:$4 sm:$0xff]   ;;  %v1863_v52 = vld [vmem:[%s2211_s18 + $0x16c] ss:$16 sps:$4 sm:$0xff]  }
  0x4d   : > { %v334_v53 = vld [vmem:[#allocation2] sm:$0xff]  ;;  %v1865_v54 = vld [vmem:[%s2211_s18 + $0x160] ss:$16 sps:$4 sm:$0xff]   ;;  %v1867_v57 = vld [vmem:[%s2211_s18 + $0x184] ss:$16 sps:$4 sm:$0xff]   ;;  %p1720_p9 = scmp.ne.s32.totalorder %s2070_s21, 3 }
  0x4e   : > { %v2284_v50 = vsub.s32 %v339_v43, %v2276_v44  ;;  %v1866_v56 = vld [vmem:[%s2211_s18 + $0x168] ss:$16 sps:$4 sm:$0xff]   ;;  %v1869_v58 = vld [vmem:[%s2211_s18 + $0x18c] ss:$16 sps:$4 sm:$0xff]   ;;  %v1871_v60 = vld [vmem:[%s2211_s18 + $0x180] ss:$16 sps:$4 sm:$0xff]   ;;  %v336_v5 = vcombine.high %v334_v53, %v334_v53 }
  0x4f   : > { %1160 = vmatpush1.bf16.msra.mxu0 %v1823_v19  ;;  %1242 = vmatpush1.bf16.msra.mxu1 %v1824_v20  ;;  %v1872_v62 = vld [vmem:[%s2211_s18 + $0x188] ss:$16 sps:$4 sm:$0xff]   ;;  %v1873_v63 = vld [vmem:[%s2211_s18 + $0x1a4] ss:$16 sps:$4 sm:$0xff]   ;;  %v1875_v0 = vld [vmem:[%s2211_s18 + $0x1ac] ss:$16 sps:$4 sm:$0xff]  }
  0x50   : > { %1161 = vmatprep.subr.bf16.mxu0 %v1825_v21  ;;  %1243 = vmatprep.subr.bf16.mxu1 %v1827_v22  ;;  %v2290_v55 = vrot.slane %v334_v53, %v2284_v50  ;;  %v1877_v1 = vld [vmem:[%s2211_s18 + $0x1a0] ss:$16 sps:$4 sm:$0xff]   ;;  %v1878_v2 = vld [vmem:[%s2211_s18 + $0x1a8] ss:$16 sps:$4 sm:$0xff]   ;;  %v1879_v3 = vld [vmem:[%s2211_s18 + $0x1c4] ss:$16 sps:$4 sm:$0xff]   ;;  %v2314_v10 = vrot.slane %v336_v5, %v2284_v50 }
  0x51   : > { %v1881_v4 = vld [vmem:[%s2211_s18 + $0x1cc] ss:$16 sps:$4 sm:$0xff]   ;;  %v1883_v6 = vld [vmem:[%s2211_s18 + $0x1c0] ss:$16 sps:$4 sm:$0xff]   ;;  %v1884_v7 = vld [vmem:[%s2211_s18 + $0x1c8] ss:$16 sps:$4 sm:$0xff]  }
  0x52   : > { %v2297_v59 = vcombine.high %v2290_v55, %v2290_v55  ;;  %v1885_v8 = vld [vmem:[%s2211_s18 + $0x1e4] ss:$16 sps:$4 sm:$0xff]   ;;  %v1887_v9 = vld [vmem:[%s2211_s18 + $0x1ec] ss:$16 sps:$4 sm:$0xff]   ;;  %v1889_v11 = vld [vmem:[%s2211_s18 + $0x1e0] ss:$16 sps:$4 sm:$0xff]   ;;  %v2322_v15 = vcombine.high %v2314_v10, %v2314_v10  ;;  %v357_v17 = vpack.c.bf16 %v2290_v55, %v2290_v55 }
  0x53   : > { %1162 = vmatpush1.bf16.msra.mxu0 %v1829_v23  ;;  %1244 = vmatpush1.bf16.msra.mxu1 %v1830_v24  ;;  %v1890_v12 = vld [vmem:[%s2211_s18 + $0x1e8] ss:$16 sps:$4 sm:$0xff]   ;;  %v1893_v13 = vld [vmem:[%s2211_s18 + $0x204] ss:$16 sps:$4 sm:$0xff]   ;;  %v1896_v14 = vld [vmem:[%s2211_s18 + $0x20c] ss:$16 sps:$4 sm:$0xff]  }
  0x54   : > { %1163 = vmatprep.subr.bf16.mxu0 %v1831_v25  ;;  %1245 = vmatprep.subr.bf16.mxu1 %v1833_v26  ;;  %v358_v61 = vpack.c.bf16 %v2297_v59, %v2297_v59  ;;  %v1891_v16 = vld [vmem:[%s2211_s18 + $0x200] ss:$16 sps:$4 sm:$0xff]   ;;  %v1894_v18 = vld [vmem:[%s2211_s18 + $0x208] ss:$16 sps:$4 sm:$0xff]   ;;  %v1899_v19 = vld [vmem:[%s2211_s18 + $0x224] ss:$16 sps:$4 sm:$0xff]   ;;  %v360_v21 = vpack.c.bf16 %v2322_v15, %v2322_v15 }
  0x55   : > { %v1902_v20 = vld [vmem:[%s2211_s18 + $0x22c] ss:$16 sps:$4 sm:$0xff]   ;;  %v1897_v22 = vld [vmem:[%s2211_s18 + $0x220] ss:$16 sps:$4 sm:$0xff]   ;;  %v1900_v23 = vld [vmem:[%s2211_s18 + $0x228] ss:$16 sps:$4 sm:$0xff]  }
  0x56   : > { %1183 = vmatprep.mubr.bf16.mxu0 %v358_v61  ;;  %1265 = vmatprep.mubr.bf16.mxu1 %v358_v61  ;;  %v1905_v24 = vld [vmem:[%s2211_s18 + $0x244] ss:$16 sps:$4 sm:$0xff]   ;;  %v1908_v25 = vld [vmem:[%s2211_s18 + $0x24c] ss:$16 sps:$4 sm:$0xff]   ;;  %v1903_v26 = vld [vmem:[%s2211_s18 + $0x240] ss:$16 sps:$4 sm:$0xff]  }
  0x57   : > { %1164 = vmatpush1.bf16.msra.mxu0 %v1835_v27  ;;  %1246 = vmatpush1.bf16.msra.mxu1 %v1836_v28  ;;  %v1906_v27 = vld [vmem:[%s2211_s18 + $0x248] ss:$16 sps:$4 sm:$0xff]   ;;  %v1911_v28 = vld [vmem:[%s2211_s18 + $0x264] ss:$16 sps:$4 sm:$0xff]   ;;  %v1926_v37 = vld [vmem:[%s2211_s18 + $0x2ac] ss:$16 sps:$4 sm:$0xff]  }
  0x58   : > { %1165 = vmatprep.subr.bf16.mxu0 %v1837_v29  ;;  %1247 = vmatprep.subr.bf16.mxu1 %v1839_v30  ;;  %v1914_v29 = vld [vmem:[%s2211_s18 + $0x26c] ss:$16 sps:$4 sm:$0xff]   ;;  %v1909_v30 = vld [vmem:[%s2211_s18 + $0x260] ss:$16 sps:$4 sm:$0xff]   ;;  %v1924_v39 = vld [vmem:[%s2211_s18 + $0x2a8] ss:$16 sps:$4 sm:$0xff]  }
  0x59   : > { %v1921_v38 = vld [vmem:[%s2211_s18 + $0x2a0] ss:$16 sps:$4 sm:$0xff]   ;;  %v1930_v43 = vld [vmem:[%s2211_s18 + $0x2c8] ss:$16 sps:$4 sm:$0xff]   ;;  %v1956_v61 = vld [vmem:[%s2211_s18 + $0x34c] ss:$16 sps:$4 sm:$0xff]  }
  0x5a   : > { %v1942_v53 = vld [vmem:[%s2211_s18 + $0x308] ss:$16 sps:$4 sm:$0xff]   ;;  %v1968_v5 = vld [vmem:[%s2211_s18 + $0x38c] ss:$16 sps:$4 sm:$0xff]  }
  0x5b   : > { %1166 = vmatpush1.bf16.msra.mxu0 %v1841_v31  ;;  %1248 = vmatpush1.bf16.msra.mxu1 %v1842_v32  ;;  %v1912_v31 = vld [vmem:[%s2211_s18 + $0x268] ss:$16 sps:$4 sm:$0xff]   ;;  %v1917_v32 = vld [vmem:[%s2211_s18 + $0x284] ss:$16 sps:$4 sm:$0xff]  }
  0x5c   : > { %1167 = vmatprep.subr.bf16.mxu0 %v1843_v33  ;;  %1249 = vmatprep.subr.bf16.mxu1 %v1845_v34  ;;  %v1920_v33 = vld [vmem:[%s2211_s18 + $0x28c] ss:$16 sps:$4 sm:$0xff]   ;;  %v1915_v34 = vld [vmem:[%s2211_s18 + $0x280] ss:$16 sps:$4 sm:$0xff]  }
  0x5f   : > { %1168 = vmatpush1.bf16.msra.mxu0 %v1847_v35  ;;  %1250 = vmatpush1.bf16.msra.mxu1 %v1848_v36  ;;  %v1918_v35 = vld [vmem:[%s2211_s18 + $0x288] ss:$16 sps:$4 sm:$0xff]   ;;  %v1923_v36 = vld [vmem:[%s2211_s18 + $0x2a4] ss:$16 sps:$4 sm:$0xff]  }
  0x60   : > { %1169 = vmatprep.subr.bf16.mxu0 %v1849_v40  ;;  %1251 = vmatprep.subr.bf16.mxu1 %v1851_v41  ;;  %v1929_v40 = vld [vmem:[%s2211_s18 + $0x2c4] ss:$16 sps:$4 sm:$0xff]   ;;  %v1932_v41 = vld [vmem:[%s2211_s18 + $0x2cc] ss:$16 sps:$4 sm:$0xff]  }
  0x63   : > { %1170 = vmatpush1.bf16.msra.mxu0 %v1853_v42  ;;  %1252 = vmatpush1.bf16.msra.mxu1 %v1854_v45  ;;  %v1927_v42 = vld [vmem:[%s2211_s18 + $0x2c0] ss:$16 sps:$4 sm:$0xff]   ;;  %v1935_v45 = vld [vmem:[%s2211_s18 + $0x2e4] ss:$16 sps:$4 sm:$0xff]  }
  0x64   : > { %1171 = vmatprep.subr.bf16.mxu0 %v1855_v46  ;;  %1253 = vmatprep.subr.bf16.mxu1 %v1857_v47  ;;  %v1938_v46 = vld [vmem:[%s2211_s18 + $0x2ec] ss:$16 sps:$4 sm:$0xff]   ;;  %v1933_v47 = vld [vmem:[%s2211_s18 + $0x2e0] ss:$16 sps:$4 sm:$0xff]  }
  0x67   : > { %1172 = vmatpush1.bf16.msra.mxu0 %v1859_v48  ;;  %1254 = vmatpush1.bf16.msra.mxu1 %v1860_v49  ;;  %v1936_v48 = vld [vmem:[%s2211_s18 + $0x2e8] ss:$16 sps:$4 sm:$0xff]   ;;  %v1941_v49 = vld [vmem:[%s2211_s18 + $0x304] ss:$16 sps:$4 sm:$0xff]  }
  0x68   : > { %1173 = vmatprep.subr.bf16.mxu0 %v1861_v51  ;;  %1255 = vmatprep.subr.bf16.mxu1 %v1863_v52  ;;  %v1944_v51 = vld [vmem:[%s2211_s18 + $0x30c] ss:$16 sps:$4 sm:$0xff]   ;;  %v1939_v52 = vld [vmem:[%s2211_s18 + $0x300] ss:$16 sps:$4 sm:$0xff]  }
  0x6b   : > { %1174 = vmatpush1.bf16.msra.mxu0 %v1865_v54  ;;  %1256 = vmatpush1.bf16.msra.mxu1 %v1866_v56  ;;  %v1947_v54 = vld [vmem:[%s2211_s18 + $0x324] ss:$16 sps:$4 sm:$0xff]   ;;  %v1950_v56 = vld [vmem:[%s2211_s18 + $0x32c] ss:$16 sps:$4 sm:$0xff]  }
  0x6c   : > { %1175 = vmatprep.subr.bf16.mxu0 %v1867_v57  ;;  %1257 = vmatprep.subr.bf16.mxu1 %v1869_v58  ;;  %v1945_v57 = vld [vmem:[%s2211_s18 + $0x320] ss:$16 sps:$4 sm:$0xff]   ;;  %v1948_v58 = vld [vmem:[%s2211_s18 + $0x328] ss:$16 sps:$4 sm:$0xff]  }
  0x6f   : > { %1176 = vmatpush1.bf16.msra.mxu0 %v1871_v60  ;;  %1258 = vmatpush1.bf16.msra.mxu1 %v1872_v62  ;;  %v1953_v60 = vld [vmem:[%s2211_s18 + $0x344] ss:$16 sps:$4 sm:$0xff]   ;;  %v1951_v62 = vld [vmem:[%s2211_s18 + $0x340] ss:$16 sps:$4 sm:$0xff]  }
  0x70   : > { %1177 = vmatprep.subr.bf16.mxu0 %v1873_v63  ;;  %1259 = vmatprep.subr.bf16.mxu1 %v1875_v0  ;;  %v1954_v63 = vld [vmem:[%s2211_s18 + $0x348] ss:$16 sps:$4 sm:$0xff]   ;;  %v1959_v0 = vld [vmem:[%s2211_s18 + $0x364] ss:$16 sps:$4 sm:$0xff]  }
  0x73   : > { %1178 = vmatpush1.bf16.msra.mxu0 %v1877_v1  ;;  %1260 = vmatpush1.bf16.msra.mxu1 %v1878_v2  ;;  %v1962_v1 = vld [vmem:[%s2211_s18 + $0x36c] ss:$16 sps:$4 sm:$0xff]   ;;  %v1957_v2 = vld [vmem:[%s2211_s18 + $0x360] ss:$16 sps:$4 sm:$0xff]  }
  0x74   : > { %1179 = vmatprep.subr.bf16.mxu0 %v1879_v3  ;;  %1261 = vmatprep.subr.bf16.mxu1 %v1881_v4  ;;  %v1960_v3 = vld [vmem:[%s2211_s18 + $0x368] ss:$16 sps:$4 sm:$0xff]   ;;  %v1965_v4 = vld [vmem:[%s2211_s18 + $0x384] ss:$16 sps:$4 sm:$0xff]  }
  0x77   : > { %1180 = vmatpush1.bf16.msra.mxu0 %v1883_v6  ;;  %1262 = vmatpush1.bf16.msra.mxu1 %v1884_v7  ;;  %v1963_v6 = vld [vmem:[%s2211_s18 + $0x380] ss:$16 sps:$4 sm:$0xff]   ;;  %v1966_v7 = vld [vmem:[%s2211_s18 + $0x388] ss:$16 sps:$4 sm:$0xff]  }
  0x78   : > { %1181 = vmatprep.subr.bf16.mxu0 %v1885_v8  ;;  %1263 = vmatprep.subr.bf16.mxu1 %v1887_v9  ;;  %v1971_v8 = vld [vmem:[%s2211_s18 + $0x3a4] ss:$16 sps:$4 sm:$0xff]   ;;  %v1974_v9 = vld [vmem:[%s2211_s18 + $0x3ac] ss:$16 sps:$4 sm:$0xff]  }
  0x7b   : > { %1182 = vmatpush1.bf16.msra.mxu0 %v1889_v11  ;;  %1264 = vmatpush1.bf16.msra.mxu1 %v1890_v12  ;;  %v1969_v11 = vld [vmem:[%s2211_s18 + $0x3a0] ss:$16 sps:$4 sm:$0xff]   ;;  %v1972_v12 = vld [vmem:[%s2211_s18 + $0x3a8] ss:$16 sps:$4 sm:$0xff]  }
  0x7c   : > { %1192 = vmatprep.subr.bf16.mxu0 %v1893_v13  ;;  %1274 = vmatprep.subr.bf16.mxu1 %v1896_v14  ;;  %v1977_v13 = vld [vmem:[%s2211_s18 + $0x3c4] ss:$16 sps:$4 sm:$0xff]   ;;  %v1980_v14 = vld [vmem:[%s2211_s18 + $0x3cc] ss:$16 sps:$4 sm:$0xff]  }
  0x7e   : > { %1184 = vmatmul.mubr.bf16.vlgmr.msra.gmra.mrb[0].mxu0 %v357_v17  ;;  %1266 = vmatmul.mubr.bf16.vlgmr.msra.gmra.mrb[0].mxu1 %v357_v17  ;;  %v1978_v17 = vld [vmem:[%s2211_s18 + $0x3c8] ss:$16 sps:$4 sm:$0xff]  }
  0x7f   : > { %1193 = vmatpush1.bf16.msra.mxu0 %v1891_v16  ;;  %1275 = vmatpush1.bf16.msra.mxu1 %v1894_v18  ;;  %v1975_v16 = vld [vmem:[%s2211_s18 + $0x3c0] ss:$16 sps:$4 sm:$0xff]   ;;  %v1983_v18 = vld [vmem:[%s2211_s18 + $0x3e4] ss:$16 sps:$4 sm:$0xff]  }
  0x80   : > { %1194 = vmatprep.subr.bf16.mxu0 %v1899_v19  ;;  %1276 = vmatprep.subr.bf16.mxu1 %v1902_v20  ;;  %v1986_v19 = vld [vmem:[%s2211_s18 + $0x3ec] ss:$16 sps:$4 sm:$0xff]   ;;  %v1981_v20 = vld [vmem:[%s2211_s18 + $0x3e0] ss:$16 sps:$4 sm:$0xff]  }
  0x81   : > { %1224 = vmatprep.mubr.bf16.mxu0 %v360_v21  ;;  %1306 = vmatprep.mubr.bf16.mxu1 %v360_v21  ;;  %v1984_v21 = vld [vmem:[%s2211_s18 + $0x3e8] ss:$16 sps:$4 sm:$0xff]  }
  0x83   : > { %1195 = vmatpush1.bf16.msra.mxu0 %v1897_v22  ;;  %1277 = vmatpush1.bf16.msra.mxu1 %v1900_v23  ;;  %v359_v22 = vpack.c.bf16 %v2314_v10, %v2314_v10  ;;  %v2393_v23 = vsub.s32 0, %v2276_v44 }
  0x84   : > { %1196 = vmatprep.subr.bf16.mxu0 %v1905_v24  ;;  %1278 = vmatprep.subr.bf16.mxu1 %v1908_v25  ;;  %v489_v24 = vld [vmem:[%s314_s24] sm:$0xf]  ;;  %v2401_v25 = vsub.s32 2, %v2276_v44 }
  0x87   : > { %1197 = vmatpush1.bf16.msra.mxu0 %v1903_v26  ;;  %1279 = vmatpush1.bf16.msra.mxu1 %v1906_v27  ;;  %v2404_v26 = vsub.s32 1, %v2276_v44  ;;  %v2407_v27 = vsub.s32 3, %v2276_v44 }
  0x88   : > { %1198 = vmatprep.subr.bf16.mxu0 %v1911_v28  ;;  %1280 = vmatprep.subr.bf16.mxu1 %v1914_v29  ;;  %v494_v28 = vrot.slane %v489_v24, %v2393_v23  ;;  %v502_v29 = vrot.slane %v489_v24, %v2401_v25 }
  0x8b   : > { %1199 = vmatpush1.bf16.msra.mxu0 %v1909_v30  ;;  %1281 = vmatpush1.bf16.msra.mxu1 %v1912_v31  ;;  %v498_v30 = vrot.slane %v489_v24, %v2404_v26 }
  0x8c   : > { %1200 = vmatprep.subr.bf16.mxu0 %v1917_v32  ;;  %1282 = vmatprep.subr.bf16.mxu1 %v1920_v33  ;;  %v506_v33 = vrot.slane %v489_v24, %v2407_v27 }
  0x8f   : > { %1201 = vmatpush1.bf16.msra.mxu0 %v1915_v34  ;;  %1283 = vmatpush1.bf16.msra.mxu1 %v1918_v35 }
  0x90   : > { %1202 = vmatprep.subr.bf16.mxu0 %v1923_v36  ;;  %1284 = vmatprep.subr.bf16.mxu1 %v1926_v37 }
  0x93   : > { %1203 = vmatpush1.bf16.msra.mxu0 %v1921_v38  ;;  %1285 = vmatpush1.bf16.msra.mxu1 %v1924_v39 }
  0x94   : > { %1204 = vmatprep.subr.bf16.mxu0 %v1929_v40  ;;  %1286 = vmatprep.subr.bf16.mxu1 %v1932_v41 }
  0x97   : > { %1205 = vmatpush1.bf16.msra.mxu0 %v1927_v42  ;;  %1287 = vmatpush1.bf16.msra.mxu1 %v1930_v43 }
  0x98   : > { %1206 = vmatprep.subr.bf16.mxu0 %v1935_v45  ;;  %1288 = vmatprep.subr.bf16.mxu1 %v1938_v46 }
  0x9b   : > { %1207 = vmatpush1.bf16.msra.mxu0 %v1933_v47  ;;  %1289 = vmatpush1.bf16.msra.mxu1 %v1936_v48 }
  0x9c   : > { %1208 = vmatprep.subr.bf16.mxu0 %v1941_v49  ;;  %1290 = vmatprep.subr.bf16.mxu1 %v1944_v51 }
  0x9f   : > { %1209 = vmatpush1.bf16.msra.mxu0 %v1939_v52  ;;  %1291 = vmatpush1.bf16.msra.mxu1 %v1942_v53 }
  0xa0   : > { %1210 = vmatprep.subr.bf16.mxu0 %v1947_v54  ;;  %1292 = vmatprep.subr.bf16.mxu1 %v1950_v56 }
  0xa3   : > { %1211 = vmatpush1.bf16.msra.mxu0 %v1945_v57  ;;  %1293 = vmatpush1.bf16.msra.mxu1 %v1948_v58 }
  0xa4   : > { %1212 = vmatprep.subr.bf16.mxu0 %v1953_v60  ;;  %1294 = vmatprep.subr.bf16.mxu1 %v1956_v61 }
  0xa7   : > { %1213 = vmatpush1.bf16.msra.mxu0 %v1951_v62  ;;  %1295 = vmatpush1.bf16.msra.mxu1 %v1954_v63 }
  0xa8   : > { %1214 = vmatprep.subr.bf16.mxu0 %v1959_v0  ;;  %1296 = vmatprep.subr.bf16.mxu1 %v1962_v1 }
  0xab   : > { %1215 = vmatpush1.bf16.msra.mxu0 %v1957_v2  ;;  %1297 = vmatpush1.bf16.msra.mxu1 %v1960_v3 }
  0xac   : > { %1216 = vmatprep.subr.bf16.mxu0 %v1965_v4  ;;  %1298 = vmatprep.subr.bf16.mxu1 %v1968_v5 }
  0xaf   : > { %1217 = vmatpush1.bf16.msra.mxu0 %v1963_v6  ;;  %1299 = vmatpush1.bf16.msra.mxu1 %v1966_v7 }
  0xb0   : > { %1218 = vmatprep.subr.bf16.mxu0 %v1971_v8  ;;  %1300 = vmatprep.subr.bf16.mxu1 %v1974_v9 }
  0xb3   : > { %1219 = vmatpush1.bf16.msra.mxu0 %v1969_v11  ;;  %1301 = vmatpush1.bf16.msra.mxu1 %v1972_v12  ;;  %v1315_v11 = vld [vmem:[%s318_s28] sm:$0xf] }
  0xb4   : > { %1220 = vmatprep.subr.bf16.mxu0 %v1977_v13  ;;  %1302 = vmatprep.subr.bf16.mxu1 %v1980_v14  ;;  %v1316_v12 = vld [vmem:[%s322_s7] sm:$0xf]  ;;  %v1357_v13 = vrot.slane %v1315_v11, %v2393_v23  ;;  %v1365_v14 = vrot.slane %v1315_v11, %v2401_v25 }
  0xb7   : > { %1221 = vmatpush1.bf16.msra.mxu0 %v1975_v16  ;;  %1303 = vmatpush1.bf16.msra.mxu1 %v1978_v17  ;;  %v1361_v16 = vrot.slane %v1315_v11, %v2404_v26  ;;  %v1369_v17 = vrot.slane %v1315_v11, %v2407_v27 }
  0xb8   : > { %1222 = vmatprep.subr.bf16.mxu0 %v1983_v18  ;;  %1304 = vmatprep.subr.bf16.mxu1 %v1986_v19  ;;  %v1382_v19 = vrot.slane %v1316_v12, %v2393_v23 }
  0xbb   : > { %1223 = vmatpush1.bf16.msra.mxu0 %v1981_v20  ;;  %1305 = vmatpush1.bf16.msra.mxu1 %v1984_v21  ;;  %v1390_v20 = vrot.slane %v1316_v12, %v2401_v25  ;;  %v1386_v21 = vrot.slane %v1316_v12, %v2404_v26 }
  0xbe   : > { %1225 = vmatmul.mubr.bf16.vlgmr.msra.gmra.mrb[0].mxu0 %v359_v22  ;;  %1307 = vmatmul.mubr.bf16.vlgmr.msra.gmra.mrb[0].mxu1 %v359_v22  ;;  %v1394_v22 = vrot.slane %v1316_v12, %v2407_v27 }
 0x191   : > { %v1226_v31 = vpop.f32.mrb[0].mxu0  ;;  %v1308_v32 = vpop.f32.mrb[0].mxu1 }
 0x192   : > { %v1725_v34 = vadd.f32 %v1226_v31, %v494_v28  ;;  %v1228_v35 = vpop.f32.mrb[1].mxu0  ;;  %v1310_v36 = vpop.f32.mrb[1].mxu1  ;;  %v1727_v37 = vadd.f32 %v1308_v32, %v502_v29 }
 0x193   : > { %v1726_v38 = vadd.f32 %v1228_v35, %v498_v30  ;;  %v1230_v39 = vpop.f32.mrb[2].mxu0  ;;  %v1312_v40 = vpop.f32.mrb[2].mxu1  ;;  %v1728_v45 = vadd.f32 %v1310_v36, %v506_v33 }
 0x194   : > { %v1318_v44 = vsel %vm1317_vm0, %v1725_v34, 0.0  ;;  %v1231_v41 = vpop.f32.mrb[3].mxu0  ;;  %v1313_v42 = vpop.f32.mrb[3].mxu1  ;;  %v1321_v47 = vsel %vm1317_vm0, %v1727_v37, 0.0 }
 0x195   : > { %v1319_v43 = vsel %vm1317_vm0, %v1726_v38, 0.0  ;;  %v1323_v49 = vsel %vm1317_vm0, %v1728_v45, 0.0 }
 0x196   : > { %v1320_v46 = vadd.f32 %v1319_v43, %v1318_v44 }
 0x198   : > { %v1322_v48 = vadd.f32 %v1321_v47, %v1320_v46 }
 0x19a   : > { %v1324_v51 = vadd.f32 %v1323_v49, %v1322_v48 }
 0x19c   : > { %1325 = vadd.xlane.f32.xlu0 %v1324_v51 }
 0x229   : > { %v1326_v52 = vpop.xlane.xlu0 %1325 }
 0x22a   : > { %v1328_v53 = vmul.f32 0.001953125, %v1326_v52 }
 0x22c   : > { %v1329_v54 = vsub.f32 %v1725_v34, %v1328_v53  ;;  %v1330_v56 = vsub.f32 %v1726_v38, %v1328_v53  ;;  %v1331_v57 = vsub.f32 %v1727_v37, %v1328_v53  ;;  %v1332_v58 = vsub.f32 %v1728_v45, %v1328_v53 }
 0x22e   : > { %v1333_v60 = vmul.f32 %v1329_v54, %v1329_v54  ;;  %v1334_v61 = vmul.f32 %v1330_v56, %v1330_v56  ;;  %v1335_v62 = vmul.f32 %v1331_v57, %v1331_v57  ;;  %v1336_v63 = vmul.f32 %v1332_v58, %v1332_v58 }
 0x230   : > { %v1337_v0 = vsel %vm1317_vm0, %v1333_v60, 0.0  ;;  %v1338_v1 = vsel %vm1317_vm0, %v1334_v61, 0.0  ;;  %v1340_v3 = vsel %vm1317_vm0, %v1335_v62, 0.0  ;;  %v1342_v5 = vsel %vm1317_vm0, %v1336_v63, 0.0 }
 0x231   : > { %v1339_v2 = vadd.f32 %v1338_v1, %v1337_v0 }
 0x233   : > { %v1341_v4 = vadd.f32 %v1340_v3, %v1339_v2 }
 0x235   : > { %v1343_v6 = vadd.f32 %v1342_v5, %v1341_v4 }
 0x237   : > { %1344 = vadd.xlane.f32.xlu0 %v1343_v6 }
 0x2c4   : > { %v1345_v7 = vpop.xlane.xlu0 %1344 }
 0x2c5   : > { %v1346_v8 = vmul.f32 0.001953125, %v1345_v7 }
 0x2c7   : > { %v1347_v9 = vadd.f32 1e-05, %v1346_v8 }
 0x2c9   : > { %1988 = vrsqrt.f32 %v1347_v9 }
 0x2d3   : > { %v1989_v18 = vpop.eup %1988 }
 0x2d4   : > { %v1349_v24 = vmul.f32 %v1989_v18, %v1329_v54  ;;  %v1350_v28 = vmul.f32 %v1989_v18, %v1330_v56  ;;  %v1351_v29 = vmul.f32 %v1989_v18, %v1331_v57  ;;  %v1352_v30 = vmul.f32 %v1989_v18, %v1332_v58 }
 0x2d6   : > { %v1374_v31 = vmul.f32 %v1357_v13, %v1349_v24  ;;  %v1375_v32 = vmul.f32 %v1361_v16, %v1350_v28  ;;  %v1376_v33 = vmul.f32 %v1365_v14, %v1351_v29  ;;  %v1377_v34 = vmul.f32 %v1369_v17, %v1352_v30 }
 0x2d8   : > { %v1399_v35 = vadd.f32 %v1382_v19, %v1374_v31  ;;  %v1400_v36 = vadd.f32 %v1386_v21, %v1375_v32  ;;  %v1401_v37 = vadd.f32 %v1390_v20, %v1376_v33  ;;  %v1402_v38 = vadd.f32 %v1394_v22, %v1377_v34 }
 0x2da   : > { %v1407_v39 = vmul.f32 0.70710677, %v1399_v35  ;;  %v1408_v23 = vmul.f32 0.70710677, %v1400_v36  ;;  %v1409_v40 = vmul.f32 0.70710677, %v1401_v37 }
 0x2db   : > { %v1410_v25 = vmul.f32 0.70710677, %v1402_v38  ;;  %v1403_v44 = vmul.f32 0.5, %v1399_v35  ;;  %v1404_v43 = vmul.f32 0.5, %v1400_v36  ;;  %v1405_v47 = vmul.f32 0.5, %v1401_v37 }
 0x2dc   : > { %1990 = verf.f32 %v1407_v39  ;;  %v1406_v51 = vmul.f32 0.5, %v1402_v38 }
 0x2dd   : > { %1992 = verf.f32 %v1408_v23 }
 0x2de   : > { %1994 = verf.f32 %v1409_v40 }
 0x2df   : > { %1996 = verf.f32 %v1410_v25 }
 0x2e6   : > { %v1991_v26 = vpop.eup %1990 }
 0x2e7   : > { %v1993_v27 = vpop.eup %1992  ;;  %v1415_v41 = vadd.f32 1.0, %v1991_v26 }
 0x2e8   : > { %v1995_v42 = vpop.eup %1994  ;;  %v1416_v45 = vadd.f32 1.0, %v1993_v27 }
 0x2e9   : > { %v1997_v46 = vpop.eup %1996  ;;  %v1417_v48 = vadd.f32 1.0, %v1995_v42  ;;  %v1419_v49 = vmul.f32 %v1415_v41, %v1403_v44 }
 0x2ea   : > { %v1418_v52 = vadd.f32 1.0, %v1997_v46  ;;  %v1420_v53 = vmul.f32 %v1416_v45, %v1404_v43 }
 0x2eb   : > { %v1421_v54 = vmul.f32 %v1417_v48, %v1405_v47  ;;  %v1423_v56 = vadd.f32 %v1419_v49, %v2290_v55 }
 0x2ec   : > { %v1422_v57 = vmul.f32 %v1418_v52, %v1406_v51  ;;  %v1424_v58 = vadd.f32 %v1420_v53, %v2297_v59 }
 0x2ed   : > { %v1425_v60 = vadd.f32 %v1421_v54, %v2314_v10 }
 0x2ee   : > { %v1426_v61 = vadd.f32 %v1422_v57, %v2322_v15  ;;  %v1431_v62 = vcombine.low %v1423_v56, %v1424_v58 }
 0x2f0   : > { %v1432_v63 = vcombine.low %v1425_v60, %v1426_v61  ;;  %v1439_v0 = vrot.slane %v1431_v62, %v2284_v50  ;;  %1453 = sbr.rel (%p1720_p9) target bundleno = 767 (0x2ff), region = 52 }
 0x2f2   : > { %v1446_v1 = vrot.slane %v1432_v63, %v2284_v50 }
 0x2f4   : > { %v1447_v2 = vcombine.low %v1439_v0, %v1446_v1 }
 0x2f6   : > { %1449 = vst [vmem:[#allocation2] sm:$0xff] %v1447_v2 }
 0x2fd   : > { %v1454_v3 = vld [vmem:[#allocation2] sm:$0xff] }
 0x2fe   : > { %1455 = vst [vmem:[%s2472_s5] sm:$0xff] %v1454_v3 }
 0x2ff PF: > { %s18_s23 = sadd.s32 1, %s2078_s23   ;;  %s2476_s18 = smov %s2062_s19 }
 0x300   : > { %p15_p5 = scmp.ge.s32.totalorder %s18_s23, 6   ;;  %s2477_s19 = smov %s2066_s20 }
 0x301   : > { %s2478_s20 = smov %s2163_s30  ;;  %s2479_s21 = smov %s2074_s22 }
 0x302   : > { %s2480_s22 = smov %s2482_s25  ;;  %17 = sbr.rel (!%p15_p5) target bundleno = 4 (0x4), region = 100 }
 0x309   :  { %1477 = vsyncpa [#allocation4], 1 }
 0x30a   :  { %1479 = vsyncpa [#allocation4 + $0x1], 1 }

// kernel: brain_mlp_forward.9
= control target key start
LH: loop header
LB: loop body
LE: loop exit
PB: predicated region body
PF: predicated region fallthrough
CT: control target
= control target key end

     0   :  { %v32_v0 = vlaneseq  ;;  %v1022_v1 = vmov 1983009808   ;;  %vm81_vm0 = vcmask 1041408   ;;  %v1023_v30 = vmov 269488144   ;;  %s1341_s0 = inlined_call_operand.vmem [shape: f32[2,256], index: 0, kind: input, shape index: {}]   ;;  %s1342_s1 = inlined_call_operand.vmem [shape: bf16[256,512], index: 1, kind: input, shape index: {}]   ;;  %s1343_s5 = inlined_call_operand.vmem [shape: f32[1,256], index: 5, kind: input, shape index: {}]   ;;  %s1344_s6 = inlined_call_operand.vmem [shape: f32[1,256], index: 6, kind: input, shape index: {}]   ;;  %s1345_s2 = inlined_call_operand.vmem [shape: f32[1,512], index: 2, kind: input, shape index: {}]   ;;  %s1346_s3 = inlined_call_operand.vmem [shape: f32[1,512], index: 3, kind: input, shape index: {}]   ;;  %s1347_s4 = inlined_call_operand.vmem [shape: f32[1,512], index: 4, kind: input, shape index: {}]   ;;  %s1348_s7 = inlined_call_operand.vmem [shape: f32[2,512], index: 7, kind: output, shape index: {}]  }
   0x1   :  { %v51_v2 = vunpack.c.l.s4 %v1022_v1  ;;  %v67_v5 = vld [vmem:[%s1341_s0] sm:$0xf]  ;;  %v918_v12 = vld [vmem:[%s1342_s1 + $0x4] ss:$16 sps:$4 sm:$0xff]   ;;  %v920_v13 = vld [vmem:[%s1342_s1 + $0xc] ss:$16 sps:$4 sm:$0xff]   ;;  %v91_v31 = vunpack.c.l.s4 %v1023_v30 }
   0x2   :  { %v1064_v3 = vshrl.u32 %v32_v0, 7  ;;  %570 = vmatprep.subr.bf16.mxu0 %v918_v12  ;;  %v922_v14 = vld [vmem:[%s1342_s1] ss:$16 sps:$4 sm:$0xff]   ;;  %v923_v15 = vld [vmem:[%s1342_s1 + $0x8] ss:$16 sps:$4 sm:$0xff]   ;;  %611 = vmatprep.subr.bf16.mxu1 %v920_v13 }
   0x3   :  { %v52_v4 = vunpack.c.0.s8 %v51_v2  ;;  %v924_v16 = vld [vmem:[%s1342_s1 + $0x24] ss:$16 sps:$4 sm:$0xff]   ;;  %571 = vmatpush1.bf16.msra.mxu0 %v922_v14  ;;  %612 = vmatpush1.bf16.msra.mxu1 %v923_v15  ;;  %v926_v17 = vld [vmem:[%s1342_s1 + $0x2c] ss:$16 sps:$4 sm:$0xff]   ;;  %v928_v18 = vld [vmem:[%s1342_s1 + $0x20] ss:$16 sps:$4 sm:$0xff]   ;;  %v92_v32 = vunpack.c.0.s8 %v91_v31 }
   0x4   :  { %572 = vmatprep.subr.bf16.mxu0 %v924_v16  ;;  %v929_v19 = vld [vmem:[%s1342_s1 + $0x28] ss:$16 sps:$4 sm:$0xff]   ;;  %613 = vmatprep.subr.bf16.mxu1 %v926_v17  ;;  %v930_v20 = vld [vmem:[%s1342_s1 + $0x44] ss:$16 sps:$4 sm:$0xff]   ;;  %v932_v21 = vld [vmem:[%s1342_s1 + $0x4c] ss:$16 sps:$4 sm:$0xff]  }
   0x5   :  { %v1070_v6 = vsub.s32 %v52_v4, %v1064_v3  ;;  %v934_v22 = vld [vmem:[%s1342_s1 + $0x40] ss:$16 sps:$4 sm:$0xff]   ;;  %v935_v23 = vld [vmem:[%s1342_s1 + $0x48] ss:$16 sps:$4 sm:$0xff]   ;;  %v936_v24 = vld [vmem:[%s1342_s1 + $0x64] ss:$16 sps:$4 sm:$0xff]   ;;  %v1130_v33 = vsub.s32 %v92_v32, %v1064_v3 }
   0x6   :  { %v938_v25 = vld [vmem:[%s1342_s1 + $0x6c] ss:$16 sps:$4 sm:$0xff]   ;;  %v940_v26 = vld [vmem:[%s1342_s1 + $0x60] ss:$16 sps:$4 sm:$0xff]   ;;  %v941_v27 = vld [vmem:[%s1342_s1 + $0x68] ss:$16 sps:$4 sm:$0xff]  }
   0x7   :  { %v77_v7 = vrot.slane %v67_v5, %v1070_v6  ;;  %573 = vmatpush1.bf16.msra.mxu0 %v928_v18  ;;  %614 = vmatpush1.bf16.msra.mxu1 %v929_v19  ;;  %v942_v28 = vld [vmem:[%s1342_s1 + $0x84] ss:$16 sps:$4 sm:$0xff]   ;;  %v944_v29 = vld [vmem:[%s1342_s1 + $0x8c] ss:$16 sps:$4 sm:$0xff]   ;;  %v946_v44 = vld [vmem:[%s1342_s1 + $0x80] ss:$16 sps:$4 sm:$0xff]  }
   0x8   :  { %574 = vmatprep.subr.bf16.mxu0 %v930_v20  ;;  %615 = vmatprep.subr.bf16.mxu1 %v932_v21  ;;  %v947_v45 = vld [vmem:[%s1342_s1 + $0x88] ss:$16 sps:$4 sm:$0xff]   ;;  %v948_v46 = vld [vmem:[%s1342_s1 + $0xa4] ss:$16 sps:$4 sm:$0xff]   ;;  %v950_v47 = vld [vmem:[%s1342_s1 + $0xac] ss:$16 sps:$4 sm:$0xff]  }
   0x9   :  { %v78_v8 = vcombine.high %v77_v7, %v77_v7  ;;  %v82_v9 = vsel %vm81_vm0, %v77_v7, 0.0  ;;  %v952_v48 = vld [vmem:[%s1342_s1 + $0xa0] ss:$16 sps:$4 sm:$0xff]   ;;  %v953_v49 = vld [vmem:[%s1342_s1 + $0xa8] ss:$16 sps:$4 sm:$0xff]   ;;  %v1279_v31 = vsub.s32 0, %v1064_v3 }
   0xa   :  { %v954_v50 = vld [vmem:[%s1342_s1 + $0xc4] ss:$16 sps:$4 sm:$0xff]   ;;  %v956_v51 = vld [vmem:[%s1342_s1 + $0xcc] ss:$16 sps:$4 sm:$0xff]   ;;  %v958_v52 = vld [vmem:[%s1342_s1 + $0xc0] ss:$16 sps:$4 sm:$0xff]  }
   0xb   :  { %v83_v10 = vsel %vm81_vm0, %v78_v8, 0.0  ;;  %575 = vmatpush1.bf16.msra.mxu0 %v934_v22  ;;  %616 = vmatpush1.bf16.msra.mxu1 %v935_v23  ;;  %v959_v53 = vld [vmem:[%s1342_s1 + $0xc8] ss:$16 sps:$4 sm:$0xff]   ;;  %v960_v54 = vld [vmem:[%s1342_s1 + $0xe4] ss:$16 sps:$4 sm:$0xff]   ;;  %v1282_v32 = vsub.s32 1, %v1064_v3 }
   0xc   :  { %v84_v11 = vadd.f32 %v83_v10, %v82_v9  ;;  %576 = vmatprep.subr.bf16.mxu0 %v936_v24  ;;  %617 = vmatprep.subr.bf16.mxu1 %v938_v25  ;;  %v962_v55 = vld [vmem:[%s1342_s1 + $0xec] ss:$16 sps:$4 sm:$0xff]   ;;  %v964_v56 = vld [vmem:[%s1342_s1 + $0xe0] ss:$16 sps:$4 sm:$0xff]   ;;  %v965_v57 = vld [vmem:[%s1342_s1 + $0xe8] ss:$16 sps:$4 sm:$0xff]  }
   0xd   :  { %v966_v58 = vld [vmem:[%s1342_s1 + $0x104] ss:$16 sps:$4 sm:$0xff]   ;;  %v968_v59 = vld [vmem:[%s1342_s1 + $0x10c] ss:$16 sps:$4 sm:$0xff]   ;;  %v970_v60 = vld [vmem:[%s1342_s1 + $0x100] ss:$16 sps:$4 sm:$0xff]  }
   0xe   :  { %85 = vadd.xlane.f32.xlu0 %v84_v11  ;;  %v971_v61 = vld [vmem:[%s1342_s1 + $0x108] ss:$16 sps:$4 sm:$0xff]   ;;  %v972_v62 = vld [vmem:[%s1342_s1 + $0x124] ss:$16 sps:$4 sm:$0xff]   ;;  %v974_v63 = vld [vmem:[%s1342_s1 + $0x12c] ss:$16 sps:$4 sm:$0xff]  }
   0xf   :  { %577 = vmatpush1.bf16.msra.mxu0 %v940_v26  ;;  %618 = vmatpush1.bf16.msra.mxu1 %v941_v27  ;;  %v976_v0 = vld [vmem:[%s1342_s1 + $0x120] ss:$16 sps:$4 sm:$0xff]   ;;  %v977_v1 = vld [vmem:[%s1342_s1 + $0x128] ss:$16 sps:$4 sm:$0xff]   ;;  %v978_v2 = vld [vmem:[%s1342_s1 + $0x144] ss:$16 sps:$4 sm:$0xff]  }
  0x10   :  { %578 = vmatprep.subr.bf16.mxu0 %v942_v28  ;;  %619 = vmatprep.subr.bf16.mxu1 %v944_v29  ;;  %v980_v4 = vld [vmem:[%s1342_s1 + $0x14c] ss:$16 sps:$4 sm:$0xff]   ;;  %v983_v7 = vld [vmem:[%s1342_s1 + $0x148] ss:$16 sps:$4 sm:$0xff]   ;;  %v984_v8 = vld [vmem:[%s1342_s1 + $0x164] ss:$16 sps:$4 sm:$0xff]  }
  0x11   :  { %v986_v9 = vld [vmem:[%s1342_s1 + $0x16c] ss:$16 sps:$4 sm:$0xff]   ;;  %v988_v10 = vld [vmem:[%s1342_s1 + $0x160] ss:$16 sps:$4 sm:$0xff]   ;;  %v989_v11 = vld [vmem:[%s1342_s1 + $0x168] ss:$16 sps:$4 sm:$0xff]  }
  0x12   :  { %v990_v12 = vld [vmem:[%s1342_s1 + $0x184] ss:$16 sps:$4 sm:$0xff]   ;;  %v992_v13 = vld [vmem:[%s1342_s1 + $0x18c] ss:$16 sps:$4 sm:$0xff]   ;;  %v994_v14 = vld [vmem:[%s1342_s1 + $0x180] ss:$16 sps:$4 sm:$0xff]  }
  0x13   :  { %579 = vmatpush1.bf16.msra.mxu0 %v946_v44  ;;  %620 = vmatpush1.bf16.msra.mxu1 %v947_v45  ;;  %v995_v15 = vld [vmem:[%s1342_s1 + $0x188] ss:$16 sps:$4 sm:$0xff]   ;;  %v996_v16 = vld [vmem:[%s1342_s1 + $0x1a4] ss:$16 sps:$4 sm:$0xff]   ;;  %v998_v17 = vld [vmem:[%s1342_s1 + $0x1ac] ss:$16 sps:$4 sm:$0xff]  }
  0x14   :  { %580 = vmatprep.subr.bf16.mxu0 %v948_v46  ;;  %621 = vmatprep.subr.bf16.mxu1 %v950_v47  ;;  %v1000_v18 = vld [vmem:[%s1342_s1 + $0x1a0] ss:$16 sps:$4 sm:$0xff]   ;;  %v1001_v19 = vld [vmem:[%s1342_s1 + $0x1a8] ss:$16 sps:$4 sm:$0xff]   ;;  %v1002_v20 = vld [vmem:[%s1342_s1 + $0x1c4] ss:$16 sps:$4 sm:$0xff]  }
  0x15   :  { %v1004_v21 = vld [vmem:[%s1342_s1 + $0x1cc] ss:$16 sps:$4 sm:$0xff]   ;;  %v1006_v22 = vld [vmem:[%s1342_s1 + $0x1c0] ss:$16 sps:$4 sm:$0xff]   ;;  %v1007_v23 = vld [vmem:[%s1342_s1 + $0x1c8] ss:$16 sps:$4 sm:$0xff]  }
  0x16   :  { %v1008_v24 = vld [vmem:[%s1342_s1 + $0x1e4] ss:$16 sps:$4 sm:$0xff]   ;;  %v1010_v25 = vld [vmem:[%s1342_s1 + $0x1ec] ss:$16 sps:$4 sm:$0xff]   ;;  %v1012_v26 = vld [vmem:[%s1342_s1 + $0x1e0] ss:$16 sps:$4 sm:$0xff]  }
  0x17   :  { %581 = vmatpush1.bf16.msra.mxu0 %v952_v48  ;;  %622 = vmatpush1.bf16.msra.mxu1 %v953_v49  ;;  %v1013_v27 = vld [vmem:[%s1342_s1 + $0x1e8] ss:$16 sps:$4 sm:$0xff]  }
  0x18   :  { %582 = vmatprep.subr.bf16.mxu0 %v954_v50  ;;  %623 = vmatprep.subr.bf16.mxu1 %v956_v51 }
  0x1b   :  { %583 = vmatpush1.bf16.msra.mxu0 %v958_v52  ;;  %624 = vmatpush1.bf16.msra.mxu1 %v959_v53 }
  0x1c   :  { %584 = vmatprep.subr.bf16.mxu0 %v960_v54  ;;  %625 = vmatprep.subr.bf16.mxu1 %v962_v55 }
  0x1f   :  { %585 = vmatpush1.bf16.msra.mxu0 %v964_v56  ;;  %626 = vmatpush1.bf16.msra.mxu1 %v965_v57 }
  0x20   :  { %586 = vmatprep.subr.bf16.mxu0 %v966_v58  ;;  %627 = vmatprep.subr.bf16.mxu1 %v968_v59  ;;  %v46_v59 = vsub.s32 3, %v1064_v3 }
  0x23   :  { %587 = vmatpush1.bf16.msra.mxu0 %v970_v60  ;;  %628 = vmatpush1.bf16.msra.mxu1 %v971_v61  ;;  %v30_v60 = vld [vmem:[%s1345_s2] sm:$0xf] }
  0x24   :  { %588 = vmatprep.subr.bf16.mxu0 %v972_v62  ;;  %629 = vmatprep.subr.bf16.mxu1 %v974_v63  ;;  %v35_v61 = vrot.slane %v30_v60, %v1279_v31  ;;  %v39_v62 = vrot.slane %v30_v60, %v1282_v32 }
  0x27   :  { %589 = vmatpush1.bf16.msra.mxu0 %v976_v0  ;;  %630 = vmatpush1.bf16.msra.mxu1 %v977_v1  ;;  %v47_v0 = vrot.slane %v30_v60, %v46_v59  ;;  %v48_v1 = vcombine.low %v35_v61, %v39_v62 }
  0x28   :  { %590 = vmatprep.subr.bf16.mxu0 %v978_v2  ;;  %631 = vmatprep.subr.bf16.mxu1 %v980_v4 }
  0x2b   :  { %632 = vmatpush1.bf16.msra.mxu1 %v983_v7  ;;  %v56_v7 = vrot.slane %v48_v1, %v1070_v6 }
  0x2c   :  { %633 = vmatprep.subr.bf16.mxu1 %v986_v9 }
  0x2f   :  { %634 = vmatpush1.bf16.msra.mxu1 %v989_v11 }
  0x30   :  { %635 = vmatprep.subr.bf16.mxu1 %v992_v13 }
  0x33   :  { %636 = vmatpush1.bf16.msra.mxu1 %v995_v15 }
  0x34   :  { %637 = vmatprep.subr.bf16.mxu1 %v998_v17 }
  0x37   :  { %638 = vmatpush1.bf16.msra.mxu1 %v1001_v19 }
  0x38   :  { %639 = vmatprep.subr.bf16.mxu1 %v1004_v21 }
  0x3b   :  { %640 = vmatpush1.bf16.msra.mxu1 %v1007_v23 }
  0x3c   :  { %641 = vmatprep.subr.bf16.mxu1 %v1010_v25 }
  0x3f   :  { %642 = vmatpush1.bf16.msra.mxu1 %v1013_v27 }
  0x9b   :  { %v86_v34 = vpop.xlane.xlu0 %85 }
  0x9c   :  { %v88_v35 = vmul.f32 0.00390625, %v86_v34  ;;  %v68_v34 = vld [vmem:[%s1343_s5] sm:$0x3] }
  0x9e   :  { %v96_v36 = vrot.slane %v88_v35, %v1130_v33  ;;  %v69_v35 = vld [vmem:[%s1344_s6] sm:$0x3] }
  0xa0   :  { %v1133_v37 = vsub.f32 %v67_v5, %v96_v36  ;;  %v982_v5 = vld [vmem:[%s1342_s1 + $0x140] ss:$16 sps:$4 sm:$0xff]   ;;  %v133_v36 = vrot.slane %v68_v34, %v1279_v31 }
  0xa1   :  { %591 = vmatpush1.bf16.msra.mxu0 %v982_v5 }
  0xa2   :  { %v99_v38 = vmul.f32 %v1133_v37, %v1133_v37  ;;  %592 = vmatprep.subr.bf16.mxu0 %v984_v8 }
  0xa4   :  { %v107_v39 = vrot.slane %v99_v38, %v1070_v6  ;;  %v137_v38 = vrot.slane %v68_v34, %v1282_v32 }
  0xa5   :  { %593 = vmatpush1.bf16.msra.mxu0 %v988_v10 }
  0xa6   :  { %v108_v40 = vcombine.high %v107_v39, %v107_v39  ;;  %v111_v41 = vsel %vm81_vm0, %v107_v39, 0.0  ;;  %594 = vmatprep.subr.bf16.mxu0 %v990_v12  ;;  %v152_v39 = vrot.slane %v69_v35, %v1279_v31 }
  0xa8   :  { %v112_v42 = vsel %vm81_vm0, %v108_v40, 0.0  ;;  %v156_v40 = vrot.slane %v69_v35, %v1282_v32 }
  0xa9   :  { %v113_v43 = vadd.f32 %v112_v42, %v111_v41  ;;  %595 = vmatpush1.bf16.msra.mxu0 %v994_v14  ;;  %v138_v41 = vcombine.low %v133_v36, %v137_v38  ;;  %v680_v36 = vld [vmem:[%s1346_s3] sm:$0xf] }
  0xaa   :  { %596 = vmatprep.subr.bf16.mxu0 %v996_v16  ;;  %v157_v42 = vcombine.low %v152_v39, %v156_v40  ;;  %v681_v38 = vld [vmem:[%s1347_s4] sm:$0xf]  ;;  %v786_v40 = vrot.slane %v680_v36, %v46_v59  ;;  %v778_v1 = vrot.slane %v680_v36, %v1282_v32 }
  0xab   :  { %114 = vadd.xlane.f32.xlu0 %v113_v43  ;;  %v145_v45 = vrot.slane %v138_v41, %v1070_v6 }
  0xac   :  { %v164_v47 = vrot.slane %v157_v42, %v1070_v6  ;;  %v822_v42 = vrot.slane %v681_v38, %v46_v59 }
  0xad   :  { %597 = vmatpush1.bf16.msra.mxu0 %v1000_v18 }
  0xae   :  { %598 = vmatprep.subr.bf16.mxu0 %v1002_v20 }
  0xb1   :  { %599 = vmatpush1.bf16.msra.mxu0 %v1006_v22 }
  0xb2   :  { %600 = vmatprep.subr.bf16.mxu0 %v1008_v24 }
  0xb5   :  { %601 = vmatpush1.bf16.msra.mxu0 %v1012_v26 }
 0x138   :  { %v115_v28 = vpop.xlane.xlu0 %114 }
 0x139   :  { %v116_v29 = vmul.f32 0.00390625, %v115_v28 }
 0x13b   :  { %v117_v30 = vadd.f32 1e-05, %v116_v29 }
 0x13d   :  { %1014 = vrsqrt.f32 %v117_v30 }
 0x147   :  { %v1015_v43 = vpop.eup %1014 }
 0x148   :  { %v126_v44 = vrot.slane %v1015_v43, %v1130_v33 }
 0x14a   :  { %v128_v46 = vmul.f32 %v126_v44, %v1133_v37  ;;  %v42_v37 = vsub.s32 2, %v1064_v3 }
 0x14c   :  { %v147_v48 = vmul.f32 %v145_v45, %v128_v46  ;;  %v43_v63 = vrot.slane %v30_v60, %v42_v37  ;;  %v782_v39 = vrot.slane %v680_v36, %v42_v37  ;;  %v818_v41 = vrot.slane %v681_v38, %v42_v37 }
 0x14e   :  { %v166_v49 = vadd.f32 %v164_v47, %v147_v48  ;;  %v49_v2 = vcombine.low %v43_v63, %v47_v0  ;;  %v788_v43 = vcombine.low %v782_v39, %v786_v40  ;;  %v824_v44 = vcombine.low %v818_v41, %v822_v42 }
 0x14f   :  { %v774_v0 = vrot.slane %v680_v36, %v1279_v31 }
 0x150   :  { %v168_v50 = vmul.f32 0.70710677, %v166_v49  ;;  %v167_v52 = vmul.f32 0.5, %v166_v49  ;;  %v63_v8 = vrot.slane %v49_v2, %v1070_v6  ;;  %v810_v2 = vrot.slane %v681_v38, %v1279_v31 }
 0x152   :  { %1016 = verf.f32 %v168_v50  ;;  %v64_v17 = vcombine.low %v56_v7, %v63_v8 }
 0x15c   :  { %v1017_v51 = vpop.eup %1016 }
 0x15d   :  { %v170_v53 = vadd.f32 1.0, %v1017_v51 }
 0x15f   :  { %v171_v54 = vmul.f32 %v170_v53, %v167_v52 }
 0x161   :  { %v180_v55 = vrot.slane %v171_v54, %v1070_v6 }
 0x163   :  { %v181_v56 = vcombine.high %v180_v55, %v180_v55  ;;  %v184_v58 = vpack.c.bf16 %v180_v55, %v180_v55 }
 0x165   :  { %v185_v57 = vpack.c.bf16 %v181_v56, %v181_v56 }
 0x167   :  { %602 = vmatprep.mubr.bf16.mxu0 %v185_v57  ;;  %643 = vmatprep.mubr.bf16.mxu1 %v185_v57 }
 0x168   :  { %603 = vmatmul.mubr.bf16.vlgmr.msra.gmra.mrb[0].mxu0 %v184_v58  ;;  %644 = vmatmul.mubr.bf16.vlgmr.msra.gmra.mrb[0].mxu1 %v184_v58 }
 0x23b   :  { %v604_v4 = vpop.f32.mrb[0].mxu0  ;;  %v645_v5 = vpop.f32.mrb[0].mxu1 }
 0x23c   :  { %v606_v9 = vpop.f32.mrb[1].mxu0  ;;  %v647_v3 = vpop.f32.mrb[1].mxu1 }
 0x23d   :  { %v656_v10 = vcombine.low %v604_v4, %v606_v9  ;;  %v657_v11 = vcombine.low %v645_v5, %v647_v3  ;;  %v608_v12 = vpop.f32.mrb[2].mxu0  ;;  %v649_v13 = vpop.f32.mrb[2].mxu1  ;;  %v814_v4 = vrot.slane %v681_v38, %v1282_v32  ;;  %v787_v5 = vcombine.low %v774_v0, %v778_v1 }
 0x23e   :  { %v609_v14 = vpop.f32.mrb[3].mxu0  ;;  %v650_v15 = vpop.f32.mrb[3].mxu1  ;;  %v802_v9 = vrot.slane %v788_v43, %v1070_v6 }
 0x23f   :  { %v664_v16 = vrot.slane %v656_v10, %v1070_v6  ;;  %v671_v18 = vrot.slane %v657_v11, %v1070_v6  ;;  %v823_v7 = vcombine.low %v810_v2, %v814_v4  ;;  %v795_v8 = vrot.slane %v787_v5, %v1070_v6 }
 0x240   :  { %v838_v10 = vrot.slane %v824_v44, %v1070_v6 }
 0x241   :  { %v672_v19 = vcombine.low %v664_v16, %v671_v18  ;;  %v831_v3 = vrot.slane %v823_v7, %v1070_v6  ;;  %v803_v12 = vcombine.low %v795_v8, %v802_v9 }
 0x243   :  { %v674_v20 = vadd.f32 %v672_v19, %v64_v17  ;;  %v839_v14 = vcombine.low %v831_v3, %v838_v10 }
 0x245   :  { %v683_v21 = vcombine.high %v674_v20, %v674_v20  ;;  %v690_v22 = vrot.slane %v674_v20, %v1070_v6 }
 0x247   :  { %v697_v23 = vrot.slane %v683_v21, %v1070_v6  ;;  %v698_v24 = vcombine.high %v690_v22, %v690_v22  ;;  %v704_v26 = vsel %vm81_vm0, %v690_v22, 0.0 }
 0x249   :  { %v699_v25 = vcombine.high %v697_v23, %v697_v23  ;;  %v705_v27 = vsel %vm81_vm0, %v698_v24, 0.0  ;;  %v707_v29 = vsel %vm81_vm0, %v697_v23, 0.0 }
 0x24a   :  { %v706_v28 = vadd.f32 %v705_v27, %v704_v26 }
 0x24b   :  { %v709_v34 = vsel %vm81_vm0, %v699_v25, 0.0 }
 0x24c   :  { %v708_v30 = vadd.f32 %v707_v29, %v706_v28 }
 0x24e   :  { %v710_v35 = vadd.f32 %v709_v34, %v708_v30 }
 0x250   :  { %711 = vadd.xlane.f32.xlu1 %v710_v35 }
 0x2dd   :  { %v712_v45 = vpop.xlane.xlu1 %711 }
 0x2de   :  { %v714_v46 = vmul.f32 0.001953125, %v712_v45 }
 0x2e0   :  { %v722_v47 = vrot.slane %v714_v46, %v1130_v33 }
 0x2e2   :  { %v724_v48 = vsub.f32 %v674_v20, %v722_v47 }
 0x2e4   :  { %v725_v49 = vmul.f32 %v724_v48, %v724_v48 }
 0x2e6   :  { %v727_v50 = vcombine.high %v725_v49, %v725_v49  ;;  %v734_v51 = vrot.slane %v725_v49, %v1070_v6 }
 0x2e8   :  { %v741_v52 = vrot.slane %v727_v50, %v1070_v6  ;;  %v742_v53 = vcombine.high %v734_v51, %v734_v51  ;;  %v748_v55 = vsel %vm81_vm0, %v734_v51, 0.0 }
 0x2ea   :  { %v743_v54 = vcombine.high %v741_v52, %v741_v52  ;;  %v749_v56 = vsel %vm81_vm0, %v742_v53, 0.0  ;;  %v751_v58 = vsel %vm81_vm0, %v741_v52, 0.0 }
 0x2eb   :  { %v750_v57 = vadd.f32 %v749_v56, %v748_v55 }
 0x2ec   :  { %v753_v59 = vsel %vm81_vm0, %v743_v54, 0.0 }
 0x2ed   :  { %v752_v37 = vadd.f32 %v751_v58, %v750_v57 }
 0x2ef   :  { %v754_v60 = vadd.f32 %v753_v59, %v752_v37 }
 0x2f1   :  { %755 = vadd.xlane.f32.xlu1 %v754_v60 }
 0x37e   :  { %v756_v61 = vpop.xlane.xlu1 %755 }
 0x37f   :  { %v757_v62 = vmul.f32 0.001953125, %v756_v61 }
 0x381   :  { %v758_v63 = vadd.f32 1e-05, %v757_v62 }
 0x383   :  { %1018 = vrsqrt.f32 %v758_v63 }
 0x38d   :  { %v1019_v11 = vpop.eup %1018 }
 0x38e   :  { %v767_v13 = vrot.slane %v1019_v11, %v1130_v33 }
 0x390   :  { %v769_v15 = vmul.f32 %v767_v13, %v724_v48 }
 0x392   :  { %v805_v16 = vmul.f32 %v803_v12, %v769_v15 }
 0x394   :  { %v841_v31 = vadd.f32 %v839_v14, %v805_v16 }
 0x396   :  { %v843_v17 = vmul.f32 0.70710677, %v841_v31  ;;  %v842_v18 = vmul.f32 0.5, %v841_v31 }
 0x398   :  { %1020 = verf.f32 %v843_v17 }
 0x3a2   :  { %v1021_v32 = vpop.eup %1020 }
 0x3a3   :  { %v845_v19 = vadd.f32 1.0, %v1021_v32 }
 0x3a5   :  { %v846_v20 = vmul.f32 %v845_v19, %v842_v18 }
 0x3a7   :  { %847 = vst [vmem:[%s1348_s7] sm:$0xff] %v846_v20 }

// kernel: brain_mlp_forward.10
= control target key start
LH: loop header
LB: loop body
LE: loop exit
PB: predicated region body
PF: predicated region fallthrough
CT: control target
= control target key end

     0   :  { %v26_v36 = vlaneseq  ;;  %v1557_v37 = vmov 1983009808   ;;  %vm1073_vm0 = vcmask 1041408   ;;  %s2026_s1 = inlined_call_operand.vmem [shape: bf16[512,512], index: 1, kind: input, shape index: {}]   ;;  %s2027_s0 = inlined_call_operand.vmem [shape: f32[2,512], index: 0, kind: input, shape index: {}]   ;;  %s2028_s2 = inlined_call_operand.vmem [shape: f32[1,512], index: 2, kind: input, shape index: {}]   ;;  %s2029_s3 = inlined_call_operand.vmem [shape: f32[1,512], index: 3, kind: input, shape index: {}]   ;;  %s2030_s4 = inlined_call_operand.vmem [shape: f32[1,512], index: 4, kind: input, shape index: {}]   ;;  %s2031_s5 = inlined_call_operand.vmem [shape: f32[2,512], index: 5, kind: output, shape index: {}]  }
   0x1   :  { %v1360_v0 = vld [vmem:[%s2026_s1 + $0x4] ss:$16 sps:$4 sm:$0xff]   ;;  %v1362_v1 = vld [vmem:[%s2026_s1 + $0xc] ss:$16 sps:$4 sm:$0xff]   ;;  %v1364_v2 = vld [vmem:[%s2026_s1] ss:$16 sps:$4 sm:$0xff]   ;;  %v45_v38 = vunpack.c.l.s4 %v1557_v37 }
   0x2   :  { %857 = vmatprep.subr.bf16.mxu0 %v1360_v0  ;;  %v1365_v3 = vld [vmem:[%s2026_s1 + $0x8] ss:$16 sps:$4 sm:$0xff]   ;;  %939 = vmatprep.subr.bf16.mxu1 %v1362_v1  ;;  %v1366_v4 = vld [vmem:[%s2026_s1 + $0x24] ss:$16 sps:$4 sm:$0xff]   ;;  %v1368_v5 = vld [vmem:[%s2026_s1 + $0x2c] ss:$16 sps:$4 sm:$0xff]  }
   0x3   :  { %858 = vmatpush1.bf16.msra.mxu0 %v1364_v2  ;;  %940 = vmatpush1.bf16.msra.mxu1 %v1365_v3  ;;  %v1370_v6 = vld [vmem:[%s2026_s1 + $0x20] ss:$16 sps:$4 sm:$0xff]   ;;  %v1371_v7 = vld [vmem:[%s2026_s1 + $0x28] ss:$16 sps:$4 sm:$0xff]   ;;  %v1372_v8 = vld [vmem:[%s2026_s1 + $0x44] ss:$16 sps:$4 sm:$0xff]   ;;  %v46_v43 = vunpack.c.0.s8 %v45_v38 }
   0x4   :  { %859 = vmatprep.subr.bf16.mxu0 %v1366_v4  ;;  %941 = vmatprep.subr.bf16.mxu1 %v1368_v5  ;;  %v1374_v9 = vld [vmem:[%s2026_s1 + $0x4c] ss:$16 sps:$4 sm:$0xff]   ;;  %v1376_v10 = vld [vmem:[%s2026_s1 + $0x40] ss:$16 sps:$4 sm:$0xff]   ;;  %v1377_v11 = vld [vmem:[%s2026_s1 + $0x48] ss:$16 sps:$4 sm:$0xff]  }
   0x5   :  { %v1378_v12 = vld [vmem:[%s2026_s1 + $0x64] ss:$16 sps:$4 sm:$0xff]   ;;  %v1380_v13 = vld [vmem:[%s2026_s1 + $0x6c] ss:$16 sps:$4 sm:$0xff]   ;;  %v1382_v14 = vld [vmem:[%s2026_s1 + $0x60] ss:$16 sps:$4 sm:$0xff]  }
   0x6   :  { %v1383_v15 = vld [vmem:[%s2026_s1 + $0x68] ss:$16 sps:$4 sm:$0xff]   ;;  %v1384_v16 = vld [vmem:[%s2026_s1 + $0x84] ss:$16 sps:$4 sm:$0xff]   ;;  %v1386_v17 = vld [vmem:[%s2026_s1 + $0x8c] ss:$16 sps:$4 sm:$0xff]  }
   0x7   :  { %860 = vmatpush1.bf16.msra.mxu0 %v1370_v6  ;;  %942 = vmatpush1.bf16.msra.mxu1 %v1371_v7  ;;  %v1388_v18 = vld [vmem:[%s2026_s1 + $0x80] ss:$16 sps:$4 sm:$0xff]   ;;  %v1389_v19 = vld [vmem:[%s2026_s1 + $0x88] ss:$16 sps:$4 sm:$0xff]   ;;  %v1390_v20 = vld [vmem:[%s2026_s1 + $0xa4] ss:$16 sps:$4 sm:$0xff]  }
   0x8   :  { %861 = vmatprep.subr.bf16.mxu0 %v1372_v8  ;;  %943 = vmatprep.subr.bf16.mxu1 %v1374_v9  ;;  %v1392_v21 = vld [vmem:[%s2026_s1 + $0xac] ss:$16 sps:$4 sm:$0xff]   ;;  %v1394_v22 = vld [vmem:[%s2026_s1 + $0xa0] ss:$16 sps:$4 sm:$0xff]   ;;  %v1395_v23 = vld [vmem:[%s2026_s1 + $0xa8] ss:$16 sps:$4 sm:$0xff]  }
   0x9   :  { %v1396_v24 = vld [vmem:[%s2026_s1 + $0xc4] ss:$16 sps:$4 sm:$0xff]   ;;  %v1398_v25 = vld [vmem:[%s2026_s1 + $0xcc] ss:$16 sps:$4 sm:$0xff]   ;;  %v1400_v26 = vld [vmem:[%s2026_s1 + $0xc0] ss:$16 sps:$4 sm:$0xff]  }
   0xa   :  { %v1401_v27 = vld [vmem:[%s2026_s1 + $0xc8] ss:$16 sps:$4 sm:$0xff]   ;;  %v1402_v28 = vld [vmem:[%s2026_s1 + $0xe4] ss:$16 sps:$4 sm:$0xff]   ;;  %v1404_v29 = vld [vmem:[%s2026_s1 + $0xec] ss:$16 sps:$4 sm:$0xff]  }
   0xb   :  { %862 = vmatpush1.bf16.msra.mxu0 %v1376_v10  ;;  %944 = vmatpush1.bf16.msra.mxu1 %v1377_v11  ;;  %v1406_v30 = vld [vmem:[%s2026_s1 + $0xe0] ss:$16 sps:$4 sm:$0xff]   ;;  %v1407_v31 = vld [vmem:[%s2026_s1 + $0xe8] ss:$16 sps:$4 sm:$0xff]   ;;  %v1408_v32 = vld [vmem:[%s2026_s1 + $0x104] ss:$16 sps:$4 sm:$0xff]  }
   0xc   :  { %863 = vmatprep.subr.bf16.mxu0 %v1378_v12  ;;  %945 = vmatprep.subr.bf16.mxu1 %v1380_v13  ;;  %v1410_v33 = vld [vmem:[%s2026_s1 + $0x10c] ss:$16 sps:$4 sm:$0xff]   ;;  %v1412_v34 = vld [vmem:[%s2026_s1 + $0x100] ss:$16 sps:$4 sm:$0xff]   ;;  %v1413_v35 = vld [vmem:[%s2026_s1 + $0x108] ss:$16 sps:$4 sm:$0xff]  }
   0xd   :  { %v1414_v39 = vld [vmem:[%s2026_s1 + $0x124] ss:$16 sps:$4 sm:$0xff]   ;;  %v1416_v40 = vld [vmem:[%s2026_s1 + $0x12c] ss:$16 sps:$4 sm:$0xff]   ;;  %v1418_v41 = vld [vmem:[%s2026_s1 + $0x120] ss:$16 sps:$4 sm:$0xff]  }
   0xe   :  { %v1706_v42 = vshrl.u32 %v26_v36, 7  ;;  %v1419_v44 = vld [vmem:[%s2026_s1 + $0x128] ss:$16 sps:$4 sm:$0xff]   ;;  %v1420_v45 = vld [vmem:[%s2026_s1 + $0x144] ss:$16 sps:$4 sm:$0xff]  }
   0xf   :  { %864 = vmatpush1.bf16.msra.mxu0 %v1382_v14  ;;  %946 = vmatpush1.bf16.msra.mxu1 %v1383_v15  ;;  %v1422_v46 = vld [vmem:[%s2026_s1 + $0x14c] ss:$16 sps:$4 sm:$0xff]   ;;  %v1424_v47 = vld [vmem:[%s2026_s1 + $0x140] ss:$16 sps:$4 sm:$0xff]   ;;  %v1425_v48 = vld [vmem:[%s2026_s1 + $0x148] ss:$16 sps:$4 sm:$0xff]  }
  0x10   :  { %865 = vmatprep.subr.bf16.mxu0 %v1384_v16  ;;  %947 = vmatprep.subr.bf16.mxu1 %v1386_v17  ;;  %v1724_v49 = vsub.s32 %v46_v43, %v1706_v42  ;;  %v1426_v50 = vld [vmem:[%s2026_s1 + $0x164] ss:$16 sps:$4 sm:$0xff]   ;;  %v1428_v51 = vld [vmem:[%s2026_s1 + $0x16c] ss:$16 sps:$4 sm:$0xff]   ;;  %v1430_v53 = vld [vmem:[%s2026_s1 + $0x160] ss:$16 sps:$4 sm:$0xff]  }
  0x11   :  { %v61_v52 = vld [vmem:[%s2027_s0] sm:$0xff]  ;;  %v1431_v55 = vld [vmem:[%s2026_s1 + $0x168] ss:$16 sps:$4 sm:$0xff]   ;;  %v1434_v57 = vld [vmem:[%s2026_s1 + $0x18c] ss:$16 sps:$4 sm:$0xff]  }
  0x12   :  { %v71_v54 = vrot.slane %v61_v52, %v1724_v49  ;;  %v1432_v56 = vld [vmem:[%s2026_s1 + $0x184] ss:$16 sps:$4 sm:$0xff]   ;;  %v1436_v59 = vld [vmem:[%s2026_s1 + $0x180] ss:$16 sps:$4 sm:$0xff]   ;;  %v1437_v61 = vld [vmem:[%s2026_s1 + $0x188] ss:$16 sps:$4 sm:$0xff]   ;;  %v64_v4 = vcombine.high %v61_v52, %v61_v52 }
  0x13   :  { %866 = vmatpush1.bf16.msra.mxu0 %v1388_v18  ;;  %948 = vmatpush1.bf16.msra.mxu1 %v1389_v19  ;;  %v1438_v62 = vld [vmem:[%s2026_s1 + $0x1a4] ss:$16 sps:$4 sm:$0xff]   ;;  %v1440_v63 = vld [vmem:[%s2026_s1 + $0x1ac] ss:$16 sps:$4 sm:$0xff]   ;;  %v1442_v0 = vld [vmem:[%s2026_s1 + $0x1a0] ss:$16 sps:$4 sm:$0xff]  }
  0x14   :  { %867 = vmatprep.subr.bf16.mxu0 %v1390_v20  ;;  %949 = vmatprep.subr.bf16.mxu1 %v1392_v21  ;;  %v79_v58 = vcombine.high %v71_v54, %v71_v54  ;;  %v1443_v1 = vld [vmem:[%s2026_s1 + $0x1a8] ss:$16 sps:$4 sm:$0xff]   ;;  %v1444_v2 = vld [vmem:[%s2026_s1 + $0x1c4] ss:$16 sps:$4 sm:$0xff]   ;;  %v1446_v3 = vld [vmem:[%s2026_s1 + $0x1cc] ss:$16 sps:$4 sm:$0xff]   ;;  %v1785_v9 = vrot.slane %v64_v4, %v1724_v49  ;;  %v85_v16 = vpack.c.bf16 %v71_v54, %v71_v54 }
  0x15   :  { %v1448_v5 = vld [vmem:[%s2026_s1 + $0x1c0] ss:$16 sps:$4 sm:$0xff]   ;;  %v1449_v6 = vld [vmem:[%s2026_s1 + $0x1c8] ss:$16 sps:$4 sm:$0xff]   ;;  %v1450_v7 = vld [vmem:[%s2026_s1 + $0x1e4] ss:$16 sps:$4 sm:$0xff]  }
  0x16   :  { %v86_v60 = vpack.c.bf16 %v79_v58, %v79_v58  ;;  %v1452_v8 = vld [vmem:[%s2026_s1 + $0x1ec] ss:$16 sps:$4 sm:$0xff]   ;;  %v1454_v10 = vld [vmem:[%s2026_s1 + $0x1e0] ss:$16 sps:$4 sm:$0xff]   ;;  %v1455_v11 = vld [vmem:[%s2026_s1 + $0x1e8] ss:$16 sps:$4 sm:$0xff]   ;;  %v80_v14 = vcombine.high %v1785_v9, %v1785_v9 }
  0x17   :  { %868 = vmatpush1.bf16.msra.mxu0 %v1394_v22  ;;  %950 = vmatpush1.bf16.msra.mxu1 %v1395_v23  ;;  %v1459_v12 = vld [vmem:[%s2026_s1 + $0x204] ss:$16 sps:$4 sm:$0xff]   ;;  %v1462_v13 = vld [vmem:[%s2026_s1 + $0x20c] ss:$16 sps:$4 sm:$0xff]   ;;  %v1457_v15 = vld [vmem:[%s2026_s1 + $0x200] ss:$16 sps:$4 sm:$0xff]  }
  0x18   :  { %869 = vmatprep.subr.bf16.mxu0 %v1396_v24  ;;  %951 = vmatprep.subr.bf16.mxu1 %v1398_v25  ;;  %v1460_v17 = vld [vmem:[%s2026_s1 + $0x208] ss:$16 sps:$4 sm:$0xff]   ;;  %v1465_v18 = vld [vmem:[%s2026_s1 + $0x224] ss:$16 sps:$4 sm:$0xff]   ;;  %v1468_v19 = vld [vmem:[%s2026_s1 + $0x22c] ss:$16 sps:$4 sm:$0xff]   ;;  %v88_v20 = vpack.c.bf16 %v80_v14, %v80_v14 }
  0x19   :  { %889 = vmatprep.mubr.bf16.mxu0 %v86_v60  ;;  %971 = vmatprep.mubr.bf16.mxu1 %v86_v60  ;;  %v1463_v21 = vld [vmem:[%s2026_s1 + $0x220] ss:$16 sps:$4 sm:$0xff]   ;;  %v1466_v22 = vld [vmem:[%s2026_s1 + $0x228] ss:$16 sps:$4 sm:$0xff]   ;;  %v1471_v23 = vld [vmem:[%s2026_s1 + $0x244] ss:$16 sps:$4 sm:$0xff]  }
  0x1a   :  { %v1474_v24 = vld [vmem:[%s2026_s1 + $0x24c] ss:$16 sps:$4 sm:$0xff]   ;;  %v1469_v25 = vld [vmem:[%s2026_s1 + $0x240] ss:$16 sps:$4 sm:$0xff]   ;;  %v1490_v38 = vld [vmem:[%s2026_s1 + $0x2a8] ss:$16 sps:$4 sm:$0xff]  }
  0x1b   :  { %870 = vmatpush1.bf16.msra.mxu0 %v1400_v26  ;;  %952 = vmatpush1.bf16.msra.mxu1 %v1401_v27  ;;  %v1472_v26 = vld [vmem:[%s2026_s1 + $0x248] ss:$16 sps:$4 sm:$0xff]   ;;  %v1477_v27 = vld [vmem:[%s2026_s1 + $0x264] ss:$16 sps:$4 sm:$0xff]   ;;  %v1492_v36 = vld [vmem:[%s2026_s1 + $0x2ac] ss:$16 sps:$4 sm:$0xff]  }
  0x1c   :  { %871 = vmatprep.subr.bf16.mxu0 %v1402_v28  ;;  %953 = vmatprep.subr.bf16.mxu1 %v1404_v29  ;;  %v1480_v28 = vld [vmem:[%s2026_s1 + $0x26c] ss:$16 sps:$4 sm:$0xff]   ;;  %v1475_v29 = vld [vmem:[%s2026_s1 + $0x260] ss:$16 sps:$4 sm:$0xff]   ;;  %v1496_v43 = vld [vmem:[%s2026_s1 + $0x2c8] ss:$16 sps:$4 sm:$0xff]  }
  0x1d   :  { %v1487_v37 = vld [vmem:[%s2026_s1 + $0x2a0] ss:$16 sps:$4 sm:$0xff]   ;;  %v1508_v52 = vld [vmem:[%s2026_s1 + $0x308] ss:$16 sps:$4 sm:$0xff]   ;;  %v1516_v54 = vld [vmem:[%s2026_s1 + $0x32c] ss:$16 sps:$4 sm:$0xff]  }
  0x1e   :  { %v1522_v58 = vld [vmem:[%s2026_s1 + $0x34c] ss:$16 sps:$4 sm:$0xff]   ;;  %v1520_v60 = vld [vmem:[%s2026_s1 + $0x348] ss:$16 sps:$4 sm:$0xff]   ;;  %v1549_v14 = vld [vmem:[%s2026_s1 + $0x3e4] ss:$16 sps:$4 sm:$0xff]  }
  0x1f   :  { %872 = vmatpush1.bf16.msra.mxu0 %v1406_v30  ;;  %954 = vmatpush1.bf16.msra.mxu1 %v1407_v31  ;;  %v1478_v30 = vld [vmem:[%s2026_s1 + $0x268] ss:$16 sps:$4 sm:$0xff]   ;;  %v1483_v31 = vld [vmem:[%s2026_s1 + $0x284] ss:$16 sps:$4 sm:$0xff]  }
  0x20   :  { %873 = vmatprep.subr.bf16.mxu0 %v1408_v32  ;;  %955 = vmatprep.subr.bf16.mxu1 %v1410_v33  ;;  %v1486_v32 = vld [vmem:[%s2026_s1 + $0x28c] ss:$16 sps:$4 sm:$0xff]   ;;  %v1481_v33 = vld [vmem:[%s2026_s1 + $0x280] ss:$16 sps:$4 sm:$0xff]   ;;  %v1532_v4 = vld [vmem:[%s2026_s1 + $0x388] ss:$16 sps:$4 sm:$0xff]  }
  0x23   :  { %874 = vmatpush1.bf16.msra.mxu0 %v1412_v34  ;;  %956 = vmatpush1.bf16.msra.mxu1 %v1413_v35  ;;  %v1484_v34 = vld [vmem:[%s2026_s1 + $0x288] ss:$16 sps:$4 sm:$0xff]   ;;  %v1489_v35 = vld [vmem:[%s2026_s1 + $0x2a4] ss:$16 sps:$4 sm:$0xff]  }
  0x24   :  { %875 = vmatprep.subr.bf16.mxu0 %v1414_v39  ;;  %957 = vmatprep.subr.bf16.mxu1 %v1416_v40  ;;  %v1495_v39 = vld [vmem:[%s2026_s1 + $0x2c4] ss:$16 sps:$4 sm:$0xff]   ;;  %v1498_v40 = vld [vmem:[%s2026_s1 + $0x2cc] ss:$16 sps:$4 sm:$0xff]  }
  0x27   :  { %876 = vmatpush1.bf16.msra.mxu0 %v1418_v41  ;;  %958 = vmatpush1.bf16.msra.mxu1 %v1419_v44  ;;  %v1493_v41 = vld [vmem:[%s2026_s1 + $0x2c0] ss:$16 sps:$4 sm:$0xff]   ;;  %v1501_v44 = vld [vmem:[%s2026_s1 + $0x2e4] ss:$16 sps:$4 sm:$0xff]  }
  0x28   :  { %877 = vmatprep.subr.bf16.mxu0 %v1420_v45  ;;  %959 = vmatprep.subr.bf16.mxu1 %v1422_v46  ;;  %v1504_v45 = vld [vmem:[%s2026_s1 + $0x2ec] ss:$16 sps:$4 sm:$0xff]   ;;  %v1499_v46 = vld [vmem:[%s2026_s1 + $0x2e0] ss:$16 sps:$4 sm:$0xff]  }
  0x2b   :  { %878 = vmatpush1.bf16.msra.mxu0 %v1424_v47  ;;  %960 = vmatpush1.bf16.msra.mxu1 %v1425_v48  ;;  %v1502_v47 = vld [vmem:[%s2026_s1 + $0x2e8] ss:$16 sps:$4 sm:$0xff]   ;;  %v1507_v48 = vld [vmem:[%s2026_s1 + $0x304] ss:$16 sps:$4 sm:$0xff]  }
  0x2c   :  { %879 = vmatprep.subr.bf16.mxu0 %v1426_v50  ;;  %961 = vmatprep.subr.bf16.mxu1 %v1428_v51  ;;  %v1510_v50 = vld [vmem:[%s2026_s1 + $0x30c] ss:$16 sps:$4 sm:$0xff]   ;;  %v1505_v51 = vld [vmem:[%s2026_s1 + $0x300] ss:$16 sps:$4 sm:$0xff]  }
  0x2f   :  { %880 = vmatpush1.bf16.msra.mxu0 %v1430_v53  ;;  %962 = vmatpush1.bf16.msra.mxu1 %v1431_v55  ;;  %v1513_v53 = vld [vmem:[%s2026_s1 + $0x324] ss:$16 sps:$4 sm:$0xff]   ;;  %v1511_v55 = vld [vmem:[%s2026_s1 + $0x320] ss:$16 sps:$4 sm:$0xff]  }
  0x30   :  { %881 = vmatprep.subr.bf16.mxu0 %v1432_v56  ;;  %963 = vmatprep.subr.bf16.mxu1 %v1434_v57  ;;  %v1514_v56 = vld [vmem:[%s2026_s1 + $0x328] ss:$16 sps:$4 sm:$0xff]   ;;  %v1519_v57 = vld [vmem:[%s2026_s1 + $0x344] ss:$16 sps:$4 sm:$0xff]  }
  0x33   :  { %882 = vmatpush1.bf16.msra.mxu0 %v1436_v59  ;;  %964 = vmatpush1.bf16.msra.mxu1 %v1437_v61  ;;  %v1517_v59 = vld [vmem:[%s2026_s1 + $0x340] ss:$16 sps:$4 sm:$0xff]   ;;  %v1525_v61 = vld [vmem:[%s2026_s1 + $0x364] ss:$16 sps:$4 sm:$0xff]  }
  0x34   :  { %883 = vmatprep.subr.bf16.mxu0 %v1438_v62  ;;  %965 = vmatprep.subr.bf16.mxu1 %v1440_v63  ;;  %v1528_v62 = vld [vmem:[%s2026_s1 + $0x36c] ss:$16 sps:$4 sm:$0xff]   ;;  %v1523_v63 = vld [vmem:[%s2026_s1 + $0x360] ss:$16 sps:$4 sm:$0xff]  }
  0x37   :  { %884 = vmatpush1.bf16.msra.mxu0 %v1442_v0  ;;  %966 = vmatpush1.bf16.msra.mxu1 %v1443_v1  ;;  %v1526_v0 = vld [vmem:[%s2026_s1 + $0x368] ss:$16 sps:$4 sm:$0xff]   ;;  %v1531_v1 = vld [vmem:[%s2026_s1 + $0x384] ss:$16 sps:$4 sm:$0xff]  }
  0x38   :  { %885 = vmatprep.subr.bf16.mxu0 %v1444_v2  ;;  %967 = vmatprep.subr.bf16.mxu1 %v1446_v3  ;;  %v1534_v2 = vld [vmem:[%s2026_s1 + $0x38c] ss:$16 sps:$4 sm:$0xff]   ;;  %v1529_v3 = vld [vmem:[%s2026_s1 + $0x380] ss:$16 sps:$4 sm:$0xff]  }
  0x3b   :  { %886 = vmatpush1.bf16.msra.mxu0 %v1448_v5  ;;  %968 = vmatpush1.bf16.msra.mxu1 %v1449_v6  ;;  %v1537_v5 = vld [vmem:[%s2026_s1 + $0x3a4] ss:$16 sps:$4 sm:$0xff]   ;;  %v1540_v6 = vld [vmem:[%s2026_s1 + $0x3ac] ss:$16 sps:$4 sm:$0xff]  }
  0x3c   :  { %887 = vmatprep.subr.bf16.mxu0 %v1450_v7  ;;  %969 = vmatprep.subr.bf16.mxu1 %v1452_v8  ;;  %v1535_v7 = vld [vmem:[%s2026_s1 + $0x3a0] ss:$16 sps:$4 sm:$0xff]   ;;  %v1538_v8 = vld [vmem:[%s2026_s1 + $0x3a8] ss:$16 sps:$4 sm:$0xff]  }
  0x3f   :  { %888 = vmatpush1.bf16.msra.mxu0 %v1454_v10  ;;  %970 = vmatpush1.bf16.msra.mxu1 %v1455_v11  ;;  %v1543_v10 = vld [vmem:[%s2026_s1 + $0x3c4] ss:$16 sps:$4 sm:$0xff]   ;;  %v1546_v11 = vld [vmem:[%s2026_s1 + $0x3cc] ss:$16 sps:$4 sm:$0xff]  }
  0x40   :  { %898 = vmatprep.subr.bf16.mxu0 %v1459_v12  ;;  %980 = vmatprep.subr.bf16.mxu1 %v1462_v13  ;;  %v1541_v12 = vld [vmem:[%s2026_s1 + $0x3c0] ss:$16 sps:$4 sm:$0xff]   ;;  %v1544_v13 = vld [vmem:[%s2026_s1 + $0x3c8] ss:$16 sps:$4 sm:$0xff]  }
  0x42   :  { %890 = vmatmul.mubr.bf16.vlgmr.msra.gmra.mrb[0].mxu0 %v85_v16  ;;  %972 = vmatmul.mubr.bf16.vlgmr.msra.gmra.mrb[0].mxu1 %v85_v16  ;;  %v1547_v16 = vld [vmem:[%s2026_s1 + $0x3e0] ss:$16 sps:$4 sm:$0xff]  }
  0x43   :  { %899 = vmatpush1.bf16.msra.mxu0 %v1457_v15  ;;  %981 = vmatpush1.bf16.msra.mxu1 %v1460_v17  ;;  %v1552_v15 = vld [vmem:[%s2026_s1 + $0x3ec] ss:$16 sps:$4 sm:$0xff]   ;;  %v1550_v17 = vld [vmem:[%s2026_s1 + $0x3e8] ss:$16 sps:$4 sm:$0xff]  }
  0x44   :  { %900 = vmatprep.subr.bf16.mxu0 %v1465_v18  ;;  %982 = vmatprep.subr.bf16.mxu1 %v1468_v19  ;;  %v87_v18 = vpack.c.bf16 %v1785_v9, %v1785_v9  ;;  %v28_v19 = vsub.s32 0, %v1706_v42 }
  0x45   :  { %930 = vmatprep.mubr.bf16.mxu0 %v88_v20  ;;  %1012 = vmatprep.mubr.bf16.mxu1 %v88_v20  ;;  %v32_v20 = vsub.s32 1, %v1706_v42 }
  0x47   :  { %901 = vmatpush1.bf16.msra.mxu0 %v1463_v21  ;;  %983 = vmatpush1.bf16.msra.mxu1 %v1466_v22  ;;  %v36_v21 = vsub.s32 2, %v1706_v42  ;;  %v40_v22 = vsub.s32 3, %v1706_v42 }
  0x48   :  { %902 = vmatprep.subr.bf16.mxu0 %v1471_v23  ;;  %984 = vmatprep.subr.bf16.mxu1 %v1474_v24  ;;  %v24_v23 = vld [vmem:[%s2028_s2] sm:$0xf] }
  0x49   :  { %v29_v24 = vrot.slane %v24_v23, %v28_v19  ;;  %v41_v9 = vrot.slane %v24_v23, %v40_v22 }
  0x4b   :  { %903 = vmatpush1.bf16.msra.mxu0 %v1469_v25  ;;  %985 = vmatpush1.bf16.msra.mxu1 %v1472_v26  ;;  %v33_v25 = vrot.slane %v24_v23, %v32_v20  ;;  %v37_v26 = vrot.slane %v24_v23, %v36_v21 }
  0x4c   :  { %904 = vmatprep.subr.bf16.mxu0 %v1477_v27  ;;  %986 = vmatprep.subr.bf16.mxu1 %v1480_v28 }
  0x4d   :  { %v42_v27 = vcombine.low %v29_v24, %v33_v25  ;;  %v43_v28 = vcombine.low %v37_v26, %v41_v9 }
  0x4f   :  { %905 = vmatpush1.bf16.msra.mxu0 %v1475_v29  ;;  %987 = vmatpush1.bf16.msra.mxu1 %v1478_v30 }
  0x50   :  { %906 = vmatprep.subr.bf16.mxu0 %v1483_v31  ;;  %988 = vmatprep.subr.bf16.mxu1 %v1486_v32  ;;  %v50_v31 = vrot.slane %v42_v27, %v1724_v49  ;;  %v57_v32 = vrot.slane %v43_v28, %v1724_v49 }
  0x53   :  { %907 = vmatpush1.bf16.msra.mxu0 %v1481_v33  ;;  %989 = vmatpush1.bf16.msra.mxu1 %v1484_v34 }
  0x54   :  { %908 = vmatprep.subr.bf16.mxu0 %v1489_v35  ;;  %990 = vmatprep.subr.bf16.mxu1 %v1492_v36 }
  0x57   :  { %909 = vmatpush1.bf16.msra.mxu0 %v1487_v37  ;;  %991 = vmatpush1.bf16.msra.mxu1 %v1490_v38 }
  0x58   :  { %910 = vmatprep.subr.bf16.mxu0 %v1495_v39  ;;  %992 = vmatprep.subr.bf16.mxu1 %v1498_v40 }
  0x5b   :  { %911 = vmatpush1.bf16.msra.mxu0 %v1493_v41  ;;  %993 = vmatpush1.bf16.msra.mxu1 %v1496_v43  ;;  %v58_v43 = vcombine.low %v50_v31, %v57_v32 }
  0x5c   :  { %912 = vmatprep.subr.bf16.mxu0 %v1501_v44  ;;  %994 = vmatprep.subr.bf16.mxu1 %v1504_v45 }
  0x5f   :  { %913 = vmatpush1.bf16.msra.mxu0 %v1499_v46  ;;  %995 = vmatpush1.bf16.msra.mxu1 %v1502_v47 }
  0x60   :  { %914 = vmatprep.subr.bf16.mxu0 %v1507_v48  ;;  %996 = vmatprep.subr.bf16.mxu1 %v1510_v50 }
  0x63   :  { %915 = vmatpush1.bf16.msra.mxu0 %v1505_v51  ;;  %997 = vmatpush1.bf16.msra.mxu1 %v1508_v52 }
  0x64   :  { %916 = vmatprep.subr.bf16.mxu0 %v1513_v53  ;;  %998 = vmatprep.subr.bf16.mxu1 %v1516_v54 }
  0x67   :  { %917 = vmatpush1.bf16.msra.mxu0 %v1511_v55  ;;  %999 = vmatpush1.bf16.msra.mxu1 %v1514_v56 }
  0x68   :  { %918 = vmatprep.subr.bf16.mxu0 %v1519_v57  ;;  %1000 = vmatprep.subr.bf16.mxu1 %v1522_v58 }
  0x6b   :  { %919 = vmatpush1.bf16.msra.mxu0 %v1517_v59  ;;  %1001 = vmatpush1.bf16.msra.mxu1 %v1520_v60  ;;  %v1049_v60 = vld [vmem:[%s2029_s3] sm:$0xf] }
  0x6c   :  { %920 = vmatprep.subr.bf16.mxu0 %v1525_v61  ;;  %1002 = vmatprep.subr.bf16.mxu1 %v1528_v62  ;;  %v1050_v61 = vld [vmem:[%s2030_s4] sm:$0xf]  ;;  %v1144_v62 = vrot.slane %v1049_v60, %v28_v19 }
  0x6f   :  { %921 = vmatpush1.bf16.msra.mxu0 %v1523_v63  ;;  %1003 = vmatpush1.bf16.msra.mxu1 %v1526_v0  ;;  %v1148_v63 = vrot.slane %v1049_v60, %v32_v20  ;;  %v1152_v0 = vrot.slane %v1049_v60, %v36_v21 }
  0x70   :  { %922 = vmatprep.subr.bf16.mxu0 %v1531_v1  ;;  %1004 = vmatprep.subr.bf16.mxu1 %v1534_v2  ;;  %v1156_v1 = vrot.slane %v1049_v60, %v40_v22  ;;  %v1180_v2 = vrot.slane %v1050_v61, %v28_v19 }
  0x73   :  { %923 = vmatpush1.bf16.msra.mxu0 %v1529_v3  ;;  %1005 = vmatpush1.bf16.msra.mxu1 %v1532_v4  ;;  %v1184_v3 = vrot.slane %v1050_v61, %v32_v20  ;;  %v1188_v4 = vrot.slane %v1050_v61, %v36_v21 }
  0x74   :  { %924 = vmatprep.subr.bf16.mxu0 %v1537_v5  ;;  %1006 = vmatprep.subr.bf16.mxu1 %v1540_v6  ;;  %v1192_v5 = vrot.slane %v1050_v61, %v40_v22  ;;  %v1157_v6 = vcombine.low %v1144_v62, %v1148_v63 }
  0x77   :  { %925 = vmatpush1.bf16.msra.mxu0 %v1535_v7  ;;  %1007 = vmatpush1.bf16.msra.mxu1 %v1538_v8  ;;  %v1158_v7 = vcombine.low %v1152_v0, %v1156_v1  ;;  %v1193_v8 = vcombine.low %v1180_v2, %v1184_v3 }
  0x78   :  { %926 = vmatprep.subr.bf16.mxu0 %v1543_v10  ;;  %1008 = vmatprep.subr.bf16.mxu1 %v1546_v11  ;;  %v1194_v10 = vcombine.low %v1188_v4, %v1192_v5  ;;  %v1165_v11 = vrot.slane %v1157_v6, %v1724_v49 }
  0x7b   :  { %927 = vmatpush1.bf16.msra.mxu0 %v1541_v12  ;;  %1009 = vmatpush1.bf16.msra.mxu1 %v1544_v13  ;;  %v1172_v12 = vrot.slane %v1158_v7, %v1724_v49  ;;  %v1201_v13 = vrot.slane %v1193_v8, %v1724_v49 }
  0x7c   :  { %928 = vmatprep.subr.bf16.mxu0 %v1549_v14  ;;  %1010 = vmatprep.subr.bf16.mxu1 %v1552_v15  ;;  %v1208_v14 = vrot.slane %v1194_v10, %v1724_v49 }
  0x7d   :  { %v1173_v15 = vcombine.low %v1165_v11, %v1172_v12 }
  0x7f   :  { %929 = vmatpush1.bf16.msra.mxu0 %v1547_v16  ;;  %1011 = vmatpush1.bf16.msra.mxu1 %v1550_v17  ;;  %v1209_v16 = vcombine.low %v1201_v13, %v1208_v14  ;;  %v1558_v17 = vmov 269488144  }
  0x82   :  { %931 = vmatmul.mubr.bf16.vlgmr.msra.gmra.mrb[0].mxu0 %v87_v18  ;;  %1013 = vmatmul.mubr.bf16.vlgmr.msra.gmra.mrb[0].mxu1 %v87_v18  ;;  %v1087_v18 = vunpack.c.l.s4 %v1558_v17 }
  0x84   :  { %v1088_v19 = vunpack.c.0.s8 %v1087_v18 }
  0x86   :  { %v1091_v20 = vsub.s32 %v1088_v19, %v1706_v42 }
 0x155   :  { %v932_v29 = vpop.f32.mrb[0].mxu0  ;;  %v1014_v30 = vpop.f32.mrb[0].mxu1 }
 0x156   :  { %v934_v33 = vpop.f32.mrb[1].mxu0  ;;  %v1016_v34 = vpop.f32.mrb[1].mxu1 }
 0x157   :  { %v1025_v35 = vcombine.low %v932_v29, %v934_v33  ;;  %v1026_v36 = vcombine.low %v1014_v30, %v1016_v34  ;;  %v936_v37 = vpop.f32.mrb[2].mxu0  ;;  %v1018_v38 = vpop.f32.mrb[2].mxu1 }
 0x158   :  { %v937_v39 = vpop.f32.mrb[3].mxu0  ;;  %v1019_v40 = vpop.f32.mrb[3].mxu1 }
 0x159   :  { %v1033_v41 = vrot.slane %v1025_v35, %v1724_v49  ;;  %v1040_v44 = vrot.slane %v1026_v36, %v1724_v49 }
 0x15b   :  { %v1041_v45 = vcombine.low %v1033_v41, %v1040_v44 }
 0x15d   :  { %v1043_v46 = vadd.f32 %v1041_v45, %v58_v43 }
 0x15f   :  { %v1052_v47 = vcombine.high %v1043_v46, %v1043_v46  ;;  %v1059_v48 = vrot.slane %v1043_v46, %v1724_v49 }
 0x161   :  { %v1066_v50 = vrot.slane %v1052_v47, %v1724_v49  ;;  %v1067_v51 = vcombine.high %v1059_v48, %v1059_v48  ;;  %v1074_v53 = vsel %vm1073_vm0, %v1059_v48, 0.0 }
 0x163   :  { %v1068_v52 = vcombine.high %v1066_v50, %v1066_v50  ;;  %v1075_v54 = vsel %vm1073_vm0, %v1067_v51, 0.0  ;;  %v1077_v56 = vsel %vm1073_vm0, %v1066_v50, 0.0 }
 0x164   :  { %v1076_v55 = vadd.f32 %v1075_v54, %v1074_v53 }
 0x165   :  { %v1079_v58 = vsel %vm1073_vm0, %v1068_v52, 0.0 }
 0x166   :  { %v1078_v57 = vadd.f32 %v1077_v56, %v1076_v55 }
 0x168   :  { %v1080_v59 = vadd.f32 %v1079_v58, %v1078_v57 }
 0x16a   :  { %1081 = vadd.xlane.f32.xlu0 %v1080_v59 }
 0x1f7   :  { %v1082_v21 = vpop.xlane.xlu0 %1081 }
 0x1f8   :  { %v1084_v22 = vmul.f32 0.001953125, %v1082_v21 }
 0x1fa   :  { %v1092_v23 = vrot.slane %v1084_v22, %v1091_v20 }
 0x1fc   :  { %v1094_v24 = vsub.f32 %v1043_v46, %v1092_v23 }
 0x1fe   :  { %v1095_v25 = vmul.f32 %v1094_v24, %v1094_v24 }
 0x200   :  { %v1097_v26 = vcombine.high %v1095_v25, %v1095_v25  ;;  %v1104_v9 = vrot.slane %v1095_v25, %v1724_v49 }
 0x202   :  { %v1111_v27 = vrot.slane %v1097_v26, %v1724_v49  ;;  %v1112_v28 = vcombine.high %v1104_v9, %v1104_v9  ;;  %v1118_v30 = vsel %vm1073_vm0, %v1104_v9, 0.0 }
 0x204   :  { %v1113_v29 = vcombine.high %v1111_v27, %v1111_v27  ;;  %v1119_v31 = vsel %vm1073_vm0, %v1112_v28, 0.0  ;;  %v1121_v33 = vsel %vm1073_vm0, %v1111_v27, 0.0 }
 0x205   :  { %v1120_v32 = vadd.f32 %v1119_v31, %v1118_v30 }
 0x206   :  { %v1123_v34 = vsel %vm1073_vm0, %v1113_v29, 0.0 }
 0x207   :  { %v1122_v42 = vadd.f32 %v1121_v33, %v1120_v32 }
 0x209   :  { %v1124_v35 = vadd.f32 %v1123_v34, %v1122_v42 }
 0x20b   :  { %1125 = vadd.xlane.f32.xlu0 %v1124_v35 }
 0x298   :  { %v1126_v36 = vpop.xlane.xlu0 %1125 }
 0x299   :  { %v1127_v37 = vmul.f32 0.001953125, %v1126_v36 }
 0x29b   :  { %v1128_v38 = vadd.f32 1e-05, %v1127_v37 }
 0x29d   :  { %1553 = vrsqrt.f32 %v1128_v38 }
 0x2a7   :  { %v1554_v39 = vpop.eup %1553 }
 0x2a8   :  { %v1137_v49 = vrot.slane %v1554_v39, %v1091_v20 }
 0x2aa   :  { %v1139_v40 = vmul.f32 %v1137_v49, %v1094_v24 }
 0x2ac   :  { %v1175_v41 = vmul.f32 %v1173_v15, %v1139_v40 }
 0x2ae   :  { %v1211_v43 = vadd.f32 %v1209_v16, %v1175_v41 }
 0x2b0   :  { %v1213_v44 = vmul.f32 0.70710677, %v1211_v43  ;;  %v1212_v46 = vmul.f32 0.5, %v1211_v43 }
 0x2b2   :  { %1555 = verf.f32 %v1213_v44 }
 0x2bc   :  { %v1556_v45 = vpop.eup %1555 }
 0x2bd   :  { %v1215_v47 = vadd.f32 1.0, %v1556_v45 }
 0x2bf   :  { %v1216_v48 = vmul.f32 %v1215_v47, %v1212_v46 }
 0x2c1   :  { %1217 = vst [vmem:[%s2031_s5] sm:$0xff] %v1216_v48 }

</bundles_post_ra>
